<compile_context>
chip_gen: v7x
topology: tpu7x:2x2x1
jax: 0.10.0
libtpu: 0.0.40
codegen_flags: <defaults>
</compile_context>

<pallas_src>
import functools
import math

import jax
import jax.numpy as jnp
from jax import lax
from jax.experimental import pallas as pl
from jax.experimental.pallas import tpu as pltpu


_PADL = 128   # lane padding per side; must be >= W + 1 (keeps concats aligned)


# ---------------------------------------------------------------------------
# Fused kernel (one grid step == one batch element)
# ---------------------------------------------------------------------------

def _hmu_kernel(*refs, G, hd, H, W):
    L = H * W
    ed = G * hd
    f32 = jnp.float32

    # ---- unpack refs (inputs ... , output) ----
    idx = 0
    x_ref = refs[idx]; idx += 1            # (1, C, L)   f32
    w_exp = refs[idx]; idx += 1            # (ed, C)     bf16
    b_exp = refs[idx]; idx += 1            # (ed, 1)     f32
    w_int, b_int = [], []
    for _ in range(G):
        w_int.append(refs[idx]); idx += 1  # (Cout_g, 9*Cin_g) bf16
        b_int.append(refs[idx]); idx += 1  # (Cout_g, 1)       f32
    w_g1 = refs[idx]; idx += 1             # (hd, ed)    f32
    b_g1 = refs[idx]; idx += 1             # (hd, 1)     f32
    w_g2 = refs[idx]; idx += 1             # (ed, hd)    f32
    b_g2 = refs[idx]; idx += 1             # (ed, 1)     f32
    w_fuse = refs[idx]; idx += 1           # (C, 9*ed)   bf16
    b_fuse = refs[idx]; idx += 1           # (C, 1)      f32
    o_ref = refs[idx]; idx += 1            # (1, C, L)   f32
    assert idx == len(refs)

    # Image-column masks over the flattened pixels (hoisted: 2 wheres / input).
    col = lax.broadcasted_iota(jnp.int32, (1, L), 1) % W
    keep_l = col != (W - 1)   # dx = -1 taps must never read input column W-1
    keep_r = col != 0         # dx = +1 taps must never read input column 0

    def padded_copies(v):
        """v: (Cin, L) f32 -> 3 lane-padded copies (for kx = 0, 1, 2)."""
        z = jnp.zeros((v.shape[0], _PADL), f32)
        vl = jnp.where(keep_l, v, 0.0)
        vr = jnp.where(keep_r, v, 0.0)
        mk = lambda u: jnp.concatenate([z, u, z], axis=1)   # lane-aligned concat
        return (mk(vl), mk(v), mk(vr))

    def conv3x3(copies_list, w_ref, b_ref):
        """Stacked-K 3x3 conv: 9 taps (x all inputs) -> one bf16 MXU matmul."""
        taps = []
        for ky in range(3):
            for kx in range(3):
                start = _PADL + (ky - 1) * W + (kx - 1)
                for cps in copies_list:
                    taps.append(cps[kx][:, start:start + L])
        stack = jnp.concatenate(taps, axis=0).astype(jnp.bfloat16)  # (K, L)
        y = jnp.dot(w_ref[...], stack, preferred_element_type=f32)  # (Cout, L)
        return y + b_ref[...]

    # ---- expand: 1x1 conv (bias-free) + folded BN + ReLU ----
    x = x_ref[0]                                                    # (C, L) f32
    xe = jnp.dot(w_exp[...], x.astype(jnp.bfloat16),
                 preferred_element_type=f32)
    xe = jnp.maximum(xe + b_exp[...], 0.0)                          # (ed, L) f32
    xe_cps = padded_copies(xe)                                      # (ed, L+2*PADL) x3

    # ---- interacting groups ----
    chunk0s, lasts = [], []
    prev_cps = None
    for g in range(G):
        xs_cps = tuple(c[g * hd:(g + 1) * hd, :] for c in xe_cps)  # xs[g]
        ins = [xs_cps] if g == 0 else [xs_cps, prev_cps]           # cat([xs, prev])
        y = jnp.maximum(conv3x3(ins, w_int[g], b_int[g]), 0.0)     # (Cout_g, L)
        chunk0s.append(y[0:hd, :])
        if g < G - 1:                       # chunk(3): [0], [1]=mid, [2]=last
            prev_cps = padded_copies(y[hd:2 * hd, :])
            lasts.append(y[2 * hd:3 * hd, :])
        else:                               # chunk(2): [0], [1]=last
            lasts.append(y[hd:2 * hd, :])

    # ---- gate: global-avg-pool -> 1x1 -> ReLU -> 1x1 -> softmax(channels) ----
    gfeat = jnp.concatenate(lasts, axis=0)                          # (ed, L) f32
    pooled = jnp.sum(gfeat, axis=1, keepdims=True) * (1.0 / L)      # (ed, 1)
    pooled_b = jnp.broadcast_to(pooled, (ed, 128))                  # lane-replicate
    h = jnp.dot(w_g1[...], pooled_b, preferred_element_type=f32) + b_g1[...]
    h = jnp.maximum(h, 0.0)
    z = jnp.dot(w_g2[...], h, preferred_element_type=f32) + b_g2[...]
    z = z - jnp.max(z, axis=0, keepdims=True)
    e = jnp.exp(z)
    gate = e / jnp.sum(e, axis=0, keepdims=True)                    # (ed, 128)

    # ---- fuse: 3x3 conv on gated out_cat + folded BN, then residual + ReLU ----
    out_cat = jnp.concatenate(chunk0s, axis=0)                      # (ed, L) f32
    out_gated = out_cat * gate[:, 0:1]                              # per-channel gate
    yf = conv3x3([padded_copies(out_gated)], w_fuse, b_fuse)        # (C, L) f32
    o_ref[0] = jnp.maximum(yf + x, 0.0).astype(o_ref.dtype)


# ---------------------------------------------------------------------------
# Wrapper (single pallas_call; no XLA pad/concat/transpose glue)
# ---------------------------------------------------------------------------

def hmu_forward(x_nchw, p):
    G, hd, ed = p["G"], p["hd"], p["ed"]
    N, C, H, W = x_nchw.shape
    L = H * W
    assert W + 1 <= _PADL, "increase _PADL for very wide images"
    x_flat = x_nchw.reshape(N, C, L).astype(jnp.float32)   # free (channels-first)

    args = [x_flat, p["w_expand"], p["b_expand"]]
    for g in range(G):
        args += [p["w_int"][g], p["b_int"][g]]
    args += [p["w_g1"], p["b_g1"], p["w_g2"], p["b_g2"], p["w_fuse"], p["b_fuse"]]

    in_specs = [pl.BlockSpec((1, C, L), lambda n: (n, 0, 0))]
    for a in args[1:]:   # weights/biases: whole array, constant block index
        in_specs.append(pl.BlockSpec(a.shape, lambda n, nd=a.ndim: (0,) * nd))

    # Advisory cost estimate (helps XLA schedule around the custom call).
    flops = 2 * ed * C * L
    for g in range(G):
        cin = hd if g == 0 else 2 * hd
        cout = 2 * hd if g == G - 1 else 3 * hd
        flops += 2 * cout * 9 * cin * L
    flops += 2 * C * 9 * ed * L
    flops *= N
    bytes_accessed = sum(int(a.size) * a.dtype.itemsize for a in args) + N * C * L * 4
    cost = pl.CostEstimate(flops=int(flops), transcendentals=int(N * ed * 128),
                           bytes_accessed=int(bytes_accessed))

    kernel = functools.partial(_hmu_kernel, G=G, hd=hd, H=H, W=W)
    y = pl.pallas_call(
        kernel,
        grid=(N,),
        in_specs=in_specs,
        out_specs=pl.BlockSpec((1, C, L), lambda n: (n, 0, 0)),
        out_shape=jax.ShapeDtypeStruct((N, C, L), jnp.float32),
        compiler_params=pltpu.CompilerParams(
            dimension_semantics=("parallel",),      # N=2 -> both v7x TCs busy
            vmem_limit_bytes=32 * 1024 * 1024,
        ),
        cost_estimate=cost,
    )(*args)
    return y.reshape(N, C, H, W)                    # NCHW, no transpose


# ---------------------------------------------------------------------------
# Parameter init (deterministic, synthetic — no checkpoint)
# ---------------------------------------------------------------------------

def init_params(in_c, num_groups, key):
    hd = in_c // 2
    ed = hd * num_groups
    eps = 1e-5
    bn_s = 1.0 / math.sqrt(1.0 + eps)   # eval BN: gamma=1 beta=0 mean=0 var=1

    keys = iter(jax.random.split(key, 32))

    def rnd(shape, scale=0.1):
        return jax.random.normal(next(keys), shape, jnp.float32) * scale

    p = {"G": num_groups, "hd": hd, "ed": ed}

    # expand: 1x1 conv (no bias) + BN + ReLU  (BN scale folded into bf16 weight)
    p["w_expand"] = (rnd((ed, in_c)) * bn_s).astype(jnp.bfloat16)
    p["b_expand"] = jnp.zeros((ed, 1), jnp.float32)

    # interact: 3x3 convs (no bias) + BN + ReLU; layout (cout, 9*cin) =
    # torch_w.permute(0, 2, 3, 1).reshape(cout, 9*cin)
    p["w_int"], p["b_int"] = [], []
    for g in range(num_groups):
        cin = hd if g == 0 else 2 * hd
        cout = 2 * hd if g == num_groups - 1 else 3 * hd
        p["w_int"].append((rnd((cout, 9 * cin)) * bn_s).astype(jnp.bfloat16))
        p["b_int"].append(jnp.zeros((cout, 1), jnp.float32))

    # gate generator MLP (tiny; kept f32 for softmax precision)
    p["w_g1"] = rnd((hd, ed))
    p["b_g1"] = rnd((hd, 1), 0.05)
    p["w_g2"] = rnd((ed, hd))
    p["b_g2"] = rnd((ed, 1), 0.05)

    # fuse: 3x3 conv (bias=True) + BN (ReLU applied after the residual)
    p["w_fuse"] = (rnd((in_c, 9 * ed)) * bn_s).astype(jnp.bfloat16)
    p["b_fuse"] = rnd((in_c, 1), 0.05) * bn_s
    return p


# ---------------------------------------------------------------------------
# main
# ---------------------------------------------------------------------------

if __name__ == "__main__":
    # in_c=16 -> hidden_dim=8, num_groups=4 -> expand_dim=32 (8-row pieces keep
    # every in-kernel sublane concat/slice tile-aligned for f32).
    N, C, H, W = 2, 16, 16, 16
    x = jax.random.normal(jax.random.PRNGKey(0), (N, C, H, W), jnp.float32)
    params = init_params(in_c=C, num_groups=4, key=jax.random.PRNGKey(1))

    fwd = jax.jit(functools.partial(hmu_forward, p=params))
    y = fwd(x)
    jax.block_until_ready(y)

    assert y.shape == (N, C, H, W)
    assert bool(jnp.all(jnp.isfinite(y)))
    assert bool(jnp.all(y >= 0.0))       # final ReLU
    print("KERNEL_OK")
</pallas_src>

<mosaic_0001>
module attributes {stable_mosaic.version = 11 : i64} {
  func.func @_hmu_kernel(%arg0: i32, %arg1: memref<1x16x256xf32, #tpu.memory_space<vmem>>, %arg2: memref<32x16xbf16, #tpu.memory_space<vmem>>, %arg3: memref<32x1xf32, #tpu.memory_space<vmem>>, %arg4: memref<24x72xbf16, #tpu.memory_space<vmem>>, %arg5: memref<24x1xf32, #tpu.memory_space<vmem>>, %arg6: memref<24x144xbf16, #tpu.memory_space<vmem>>, %arg7: memref<24x1xf32, #tpu.memory_space<vmem>>, %arg8: memref<24x144xbf16, #tpu.memory_space<vmem>>, %arg9: memref<24x1xf32, #tpu.memory_space<vmem>>, %arg10: memref<16x144xbf16, #tpu.memory_space<vmem>>, %arg11: memref<16x1xf32, #tpu.memory_space<vmem>>, %arg12: memref<8x32xf32, #tpu.memory_space<vmem>>, %arg13: memref<8x1xf32, #tpu.memory_space<vmem>>, %arg14: memref<32x8xf32, #tpu.memory_space<vmem>>, %arg15: memref<32x1xf32, #tpu.memory_space<vmem>>, %arg16: memref<16x288xbf16, #tpu.memory_space<vmem>>, %arg17: memref<16x1xf32, #tpu.memory_space<vmem>>, %arg18: memref<1x16x256xf32, #tpu.memory_space<vmem>>) attributes {dimension_semantics = [#tpu.dimension_semantics<parallel>], iteration_bounds = array<i64: 2>, scalar_prefetch = 0 : i64, scratch_operands = 0 : i64, tpu.core_type = #tpu.core_type<tc>, window_params = [{transform_indices = @transform_0, window_bounds = array<i64: 1, 16, 256>}, {pipeline_mode = #tpu.pipeline_mode<synchronous>, transform_indices = @transform_1, window_bounds = array<i64: 32, 16>}, {pipeline_mode = #tpu.pipeline_mode<synchronous>, transform_indices = @transform_2, window_bounds = array<i64: 32, 1>}, {pipeline_mode = #tpu.pipeline_mode<synchronous>, transform_indices = @transform_3, window_bounds = array<i64: 24, 72>}, {pipeline_mode = #tpu.pipeline_mode<synchronous>, transform_indices = @transform_4, window_bounds = array<i64: 24, 1>}, {pipeline_mode = #tpu.pipeline_mode<synchronous>, transform_indices = @transform_5, window_bounds = array<i64: 24, 144>}, {pipeline_mode = #tpu.pipeline_mode<synchronous>, transform_indices = @transform_6, window_bounds = array<i64: 24, 1>}, {pipeline_mode = #tpu.pipeline_mode<synchronous>, transform_indices = @transform_7, window_bounds = array<i64: 24, 144>}, {pipeline_mode = #tpu.pipeline_mode<synchronous>, transform_indices = @transform_8, window_bounds = array<i64: 24, 1>}, {pipeline_mode = #tpu.pipeline_mode<synchronous>, transform_indices = @transform_9, window_bounds = array<i64: 16, 144>}, {pipeline_mode = #tpu.pipeline_mode<synchronous>, transform_indices = @transform_10, window_bounds = array<i64: 16, 1>}, {pipeline_mode = #tpu.pipeline_mode<synchronous>, transform_indices = @transform_11, window_bounds = array<i64: 8, 32>}, {pipeline_mode = #tpu.pipeline_mode<synchronous>, transform_indices = @transform_12, window_bounds = array<i64: 8, 1>}, {pipeline_mode = #tpu.pipeline_mode<synchronous>, transform_indices = @transform_13, window_bounds = array<i64: 32, 8>}, {pipeline_mode = #tpu.pipeline_mode<synchronous>, transform_indices = @transform_14, window_bounds = array<i64: 32, 1>}, {pipeline_mode = #tpu.pipeline_mode<synchronous>, transform_indices = @transform_15, window_bounds = array<i64: 16, 288>}, {pipeline_mode = #tpu.pipeline_mode<synchronous>, transform_indices = @transform_16, window_bounds = array<i64: 16, 1>}, {transform_indices = @transform_17, window_bounds = array<i64: 1, 16, 256>}]} {
    %0 = tpu.iota {dimensions = array<i32: 1>} : vector<1x256xi32>
    %c16_i32 = arith.constant 16 : i32
    %c0_i32 = arith.constant 0 : i32
    %1 = arith.cmpi eq, %c16_i32, %c0_i32 : i32
    %c1_i32 = arith.constant 1 : i32
    %2 = arith.select %1, %c1_i32, %c16_i32 : i32
    %3 = vector.broadcast %2 : i32 to vector<1x256xi32>
    %4 = arith.remsi %0, %3 : vector<1x256xi32>
    %c0_i32_0 = arith.constant 0 : i32
    %5 = vector.broadcast %c0_i32_0 : i32 to vector<1x256xi32>
    %6 = arith.cmpi ne, %4, %5 : vector<1x256xi32>
    %c0_i32_1 = arith.constant 0 : i32
    %7 = vector.broadcast %c0_i32_1 : i32 to vector<1x256xi32>
    %8 = arith.cmpi slt, %4, %7 : vector<1x256xi32>
    %c0_i32_2 = arith.constant 0 : i32
    %9 = arith.cmpi slt, %2, %c0_i32_2 : i32
    %10 = vector.broadcast %9 : i1 to vector<1x256xi1>
    %11 = vector.broadcast %10 : vector<1x256xi1> to vector<1x256xi1>
    %12 = arith.xori %8, %11 : vector<1x256xi1>
    %13 = arith.andi %12, %6 : vector<1x256xi1>
    %14 = vector.broadcast %2 : i32 to vector<1x256xi32>
    %15 = arith.addi %4, %14 : vector<1x256xi32>
    %16 = arith.select %13, %15, %4 : vector<1x256xi1>, vector<1x256xi32>
    %c15_i32 = arith.constant 15 : i32
    %17 = vector.broadcast %c15_i32 : i32 to vector<1x256xi32>
    %18 = arith.cmpi ne, %16, %17 : vector<1x256xi32>
    %c0_i32_3 = arith.constant 0 : i32
    %19 = vector.broadcast %c0_i32_3 : i32 to vector<1x256xi32>
    %20 = arith.cmpi ne, %16, %19 : vector<1x256xi32>
    %c0 = arith.constant 0 : index
    %c0_4 = arith.constant 0 : index
    %c0_5 = arith.constant 0 : index
    %21 = vector.load %arg1[%c0, %c0_4, %c0_5] : memref<1x16x256xf32, #tpu.memory_space<vmem>>, vector<1x16x256xf32>
    %22 = vector.shape_cast %21 : vector<1x16x256xf32> to vector<16x256xf32>
    %c0_6 = arith.constant 0 : index
    %c0_7 = arith.constant 0 : index
    %23 = vector.load %arg2[%c0_6, %c0_7] : memref<32x16xbf16, #tpu.memory_space<vmem>>, vector<32x16xbf16>
    %24 = arith.truncf %22 : vector<16x256xf32> to vector<16x256xbf16>
    %cst = arith.constant dense<0.000000e+00> : vector<32x256xf32>
    %25 = tpu.matmul %23, %24, %cst {dimension_numbers = #tpu.dot_dimension_numbers<[1], [0], [0], [1], [0, 0, 1, 1], [], []>} : vector<32x16xbf16>, vector<16x256xbf16>, vector<32x256xf32> -> vector<32x256xf32>
    %c0_8 = arith.constant 0 : index
    %c0_9 = arith.constant 0 : index
    %26 = vector.load %arg3[%c0_8, %c0_9] : memref<32x1xf32, #tpu.memory_space<vmem>>, vector<32x1xf32>
    %27 = vector.broadcast %26 : vector<32x1xf32> to vector<32x256xf32>
    %28 = arith.addf %25, %27 : vector<32x256xf32>
    %cst_10 = arith.constant 0.000000e+00 : f32
    %29 = vector.broadcast %cst_10 : f32 to vector<32x256xf32>
    %30 = arith.maximumf %28, %29 : vector<32x256xf32>
    %cst_11 = arith.constant 0.000000e+00 : f32
    %31 = vector.broadcast %cst_11 : f32 to vector<32x128xf32>
    %cst_12 = arith.constant 0.000000e+00 : f32
    %32 = vector.shape_cast %18 : vector<1x256xi1> to vector<1x256xi1>
    %33 = vector.broadcast %32 : vector<1x256xi1> to vector<32x256xi1>
    %34 = vector.broadcast %cst_12 : f32 to vector<32x256xf32>
    %35 = arith.select %33, %30, %34 : vector<32x256xi1>, vector<32x256xf32>
    %cst_13 = arith.constant 0.000000e+00 : f32
    %36 = vector.shape_cast %20 : vector<1x256xi1> to vector<1x256xi1>
    %37 = vector.broadcast %36 : vector<1x256xi1> to vector<32x256xi1>
    %38 = vector.broadcast %cst_13 : f32 to vector<32x256xf32>
    %39 = arith.select %37, %30, %38 : vector<32x256xi1>, vector<32x256xf32>
    %40 = tpu.concatenate %31, %35, %31 in 1 : vector<32x128xf32>, vector<32x256xf32>, vector<32x128xf32> -> vector<32x512xf32>
    %41 = tpu.concatenate %31, %30, %31 in 1 : vector<32x128xf32>, vector<32x256xf32>, vector<32x128xf32> -> vector<32x512xf32>
    %42 = tpu.concatenate %31, %39, %31 in 1 : vector<32x128xf32>, vector<32x256xf32>, vector<32x128xf32> -> vector<32x512xf32>
    %43 = vector.extract_strided_slice %40 {offsets = [0, 0], sizes = [8, 512], strides = [1, 1]} : vector<32x512xf32> to vector<8x512xf32>
    %44 = vector.extract_strided_slice %41 {offsets = [0, 0], sizes = [8, 512], strides = [1, 1]} : vector<32x512xf32> to vector<8x512xf32>
    %45 = vector.extract_strided_slice %42 {offsets = [0, 0], sizes = [8, 512], strides = [1, 1]} : vector<32x512xf32> to vector<8x512xf32>
    %46 = vector.extract_strided_slice %43 {offsets = [0, 111], sizes = [8, 256], strides = [1, 1]} : vector<8x512xf32> to vector<8x256xf32>
    %47 = vector.extract_strided_slice %44 {offsets = [0, 112], sizes = [8, 256], strides = [1, 1]} : vector<8x512xf32> to vector<8x256xf32>
    %48 = vector.extract_strided_slice %45 {offsets = [0, 113], sizes = [8, 256], strides = [1, 1]} : vector<8x512xf32> to vector<8x256xf32>
    %49 = vector.extract_strided_slice %43 {offsets = [0, 127], sizes = [8, 256], strides = [1, 1]} : vector<8x512xf32> to vector<8x256xf32>
    %50 = vector.extract_strided_slice %44 {offsets = [0, 128], sizes = [8, 256], strides = [1, 1]} : vector<8x512xf32> to vector<8x256xf32>
    %51 = vector.extract_strided_slice %45 {offsets = [0, 129], sizes = [8, 256], strides = [1, 1]} : vector<8x512xf32> to vector<8x256xf32>
    %52 = vector.extract_strided_slice %43 {offsets = [0, 143], sizes = [8, 256], strides = [1, 1]} : vector<8x512xf32> to vector<8x256xf32>
    %53 = vector.extract_strided_slice %44 {offsets = [0, 144], sizes = [8, 256], strides = [1, 1]} : vector<8x512xf32> to vector<8x256xf32>
    %54 = vector.extract_strided_slice %45 {offsets = [0, 145], sizes = [8, 256], strides = [1, 1]} : vector<8x512xf32> to vector<8x256xf32>
    %55 = tpu.concatenate %46, %47, %48, %49, %50, %51, %52, %53, %54 in 0 : vector<8x256xf32>, vector<8x256xf32>, vector<8x256xf32>, vector<8x256xf32>, vector<8x256xf32>, vector<8x256xf32>, vector<8x256xf32>, vector<8x256xf32>, vector<8x256xf32> -> vector<72x256xf32>
    %56 = arith.truncf %55 : vector<72x256xf32> to vector<72x256xbf16>
    %c0_14 = arith.constant 0 : index
    %c0_15 = arith.constant 0 : index
    %57 = vector.load %arg4[%c0_14, %c0_15] : memref<24x72xbf16, #tpu.memory_space<vmem>>, vector<24x72xbf16>
    %cst_16 = arith.constant dense<0.000000e+00> : vector<24x256xf32>
    %58 = tpu.matmul %57, %56, %cst_16 {dimension_numbers = #tpu.dot_dimension_numbers<[1], [0], [0], [1], [0, 0, 1, 1], [], []>} : vector<24x72xbf16>, vector<72x256xbf16>, vector<24x256xf32> -> vector<24x256xf32>
    %c0_17 = arith.constant 0 : index
    %c0_18 = arith.constant 0 : index
    %59 = vector.load %arg5[%c0_17, %c0_18] : memref<24x1xf32, #tpu.memory_space<vmem>>, vector<24x1xf32>
    %60 = vector.broadcast %59 : vector<24x1xf32> to vector<24x256xf32>
    %61 = arith.addf %58, %60 : vector<24x256xf32>
    %cst_19 = arith.constant 0.000000e+00 : f32
    %62 = vector.broadcast %cst_19 : f32 to vector<24x256xf32>
    %63 = arith.maximumf %61, %62 : vector<24x256xf32>
    %64 = vector.extract_strided_slice %63 {offsets = [0, 0], sizes = [8, 256], strides = [1, 1]} : vector<24x256xf32> to vector<8x256xf32>
    %65 = vector.extract_strided_slice %63 {offsets = [8, 0], sizes = [8, 256], strides = [1, 1]} : vector<24x256xf32> to vector<8x256xf32>
    %cst_20 = arith.constant 0.000000e+00 : f32
    %66 = vector.broadcast %cst_20 : f32 to vector<8x128xf32>
    %cst_21 = arith.constant 0.000000e+00 : f32
    %67 = vector.shape_cast %18 : vector<1x256xi1> to vector<1x256xi1>
    %68 = vector.broadcast %67 : vector<1x256xi1> to vector<8x256xi1>
    %69 = vector.broadcast %cst_21 : f32 to vector<8x256xf32>
    %70 = arith.select %68, %65, %69 : vector<8x256xi1>, vector<8x256xf32>
    %cst_22 = arith.constant 0.000000e+00 : f32
    %71 = vector.shape_cast %20 : vector<1x256xi1> to vector<1x256xi1>
    %72 = vector.broadcast %71 : vector<1x256xi1> to vector<8x256xi1>
    %73 = vector.broadcast %cst_22 : f32 to vector<8x256xf32>
    %74 = arith.select %72, %65, %73 : vector<8x256xi1>, vector<8x256xf32>
    %75 = tpu.concatenate %66, %70, %66 in 1 : vector<8x128xf32>, vector<8x256xf32>, vector<8x128xf32> -> vector<8x512xf32>
    %76 = tpu.concatenate %66, %65, %66 in 1 : vector<8x128xf32>, vector<8x256xf32>, vector<8x128xf32> -> vector<8x512xf32>
    %77 = tpu.concatenate %66, %74, %66 in 1 : vector<8x128xf32>, vector<8x256xf32>, vector<8x128xf32> -> vector<8x512xf32>
    %78 = vector.extract_strided_slice %63 {offsets = [16, 0], sizes = [8, 256], strides = [1, 1]} : vector<24x256xf32> to vector<8x256xf32>
    %79 = vector.extract_strided_slice %40 {offsets = [8, 0], sizes = [8, 512], strides = [1, 1]} : vector<32x512xf32> to vector<8x512xf32>
    %80 = vector.extract_strided_slice %41 {offsets = [8, 0], sizes = [8, 512], strides = [1, 1]} : vector<32x512xf32> to vector<8x512xf32>
    %81 = vector.extract_strided_slice %42 {offsets = [8, 0], sizes = [8, 512], strides = [1, 1]} : vector<32x512xf32> to vector<8x512xf32>
    %82 = vector.extract_strided_slice %79 {offsets = [0, 111], sizes = [8, 256], strides = [1, 1]} : vector<8x512xf32> to vector<8x256xf32>
    %83 = vector.extract_strided_slice %75 {offsets = [0, 111], sizes = [8, 256], strides = [1, 1]} : vector<8x512xf32> to vector<8x256xf32>
    %84 = vector.extract_strided_slice %80 {offsets = [0, 112], sizes = [8, 256], strides = [1, 1]} : vector<8x512xf32> to vector<8x256xf32>
    %85 = vector.extract_strided_slice %76 {offsets = [0, 112], sizes = [8, 256], strides = [1, 1]} : vector<8x512xf32> to vector<8x256xf32>
    %86 = vector.extract_strided_slice %81 {offsets = [0, 113], sizes = [8, 256], strides = [1, 1]} : vector<8x512xf32> to vector<8x256xf32>
    %87 = vector.extract_strided_slice %77 {offsets = [0, 113], sizes = [8, 256], strides = [1, 1]} : vector<8x512xf32> to vector<8x256xf32>
    %88 = vector.extract_strided_slice %79 {offsets = [0, 127], sizes = [8, 256], strides = [1, 1]} : vector<8x512xf32> to vector<8x256xf32>
    %89 = vector.extract_strided_slice %75 {offsets = [0, 127], sizes = [8, 256], strides = [1, 1]} : vector<8x512xf32> to vector<8x256xf32>
    %90 = vector.extract_strided_slice %80 {offsets = [0, 128], sizes = [8, 256], strides = [1, 1]} : vector<8x512xf32> to vector<8x256xf32>
    %91 = vector.extract_strided_slice %76 {offsets = [0, 128], sizes = [8, 256], strides = [1, 1]} : vector<8x512xf32> to vector<8x256xf32>
    %92 = vector.extract_strided_slice %81 {offsets = [0, 129], sizes = [8, 256], strides = [1, 1]} : vector<8x512xf32> to vector<8x256xf32>
    %93 = vector.extract_strided_slice %77 {offsets = [0, 129], sizes = [8, 256], strides = [1, 1]} : vector<8x512xf32> to vector<8x256xf32>
    %94 = vector.extract_strided_slice %79 {offsets = [0, 143], sizes = [8, 256], strides = [1, 1]} : vector<8x512xf32> to vector<8x256xf32>
    %95 = vector.extract_strided_slice %75 {offsets = [0, 143], sizes = [8, 256], strides = [1, 1]} : vector<8x512xf32> to vector<8x256xf32>
    %96 = vector.extract_strided_slice %80 {offsets = [0, 144], sizes = [8, 256], strides = [1, 1]} : vector<8x512xf32> to vector<8x256xf32>
    %97 = vector.extract_strided_slice %76 {offsets = [0, 144], sizes = [8, 256], strides = [1, 1]} : vector<8x512xf32> to vector<8x256xf32>
    %98 = vector.extract_strided_slice %81 {offsets = [0, 145], sizes = [8, 256], strides = [1, 1]} : vector<8x512xf32> to vector<8x256xf32>
    %99 = vector.extract_strided_slice %77 {offsets = [0, 145], sizes = [8, 256], strides = [1, 1]} : vector<8x512xf32> to vector<8x256xf32>
    %100 = tpu.concatenate %82, %83, %84, %85, %86, %87, %88, %89, %90, %91, %92, %93, %94, %95, %96, %97 in 0 : vector<8x256xf32>, vector<8x256xf32>, vector<8x256xf32>, vector<8x256xf32>, vector<8x256xf32>, vector<8x256xf32>, vector<8x256xf32>, vector<8x256xf32>, vector<8x256xf32>, vector<8x256xf32>, vector<8x256xf32>, vector<8x256xf32>, vector<8x256xf32>, vector<8x256xf32>, vector<8x256xf32>, vector<8x256xf32> -> vector<128x256xf32>
    %101 = tpu.concatenate %98, %99 in 0 : vector<8x256xf32>, vector<8x256xf32> -> vector<16x256xf32>
    %102 = tpu.concatenate %100, %101 in 0 : vector<128x256xf32>, vector<16x256xf32> -> vector<144x256xf32>
    %103 = arith.truncf %102 : vector<144x256xf32> to vector<144x256xbf16>
    %c0_23 = arith.constant 0 : index
    %c0_24 = arith.constant 0 : index
    %104 = vector.load %arg6[%c0_23, %c0_24] : memref<24x144xbf16, #tpu.memory_space<vmem>>, vector<24x144xbf16>
    %cst_25 = arith.constant dense<0.000000e+00> : vector<24x256xf32>
    %105 = tpu.matmul %104, %103, %cst_25 {dimension_numbers = #tpu.dot_dimension_numbers<[1], [0], [0], [1], [0, 0, 1, 1], [], []>} : vector<24x144xbf16>, vector<144x256xbf16>, vector<24x256xf32> -> vector<24x256xf32>
    %c0_26 = arith.constant 0 : index
    %c0_27 = arith.constant 0 : index
    %106 = vector.load %arg7[%c0_26, %c0_27] : memref<24x1xf32, #tpu.memory_space<vmem>>, vector<24x1xf32>
    %107 = vector.broadcast %106 : vector<24x1xf32> to vector<24x256xf32>
    %108 = arith.addf %105, %107 : vector<24x256xf32>
    %cst_28 = arith.constant 0.000000e+00 : f32
    %109 = vector.broadcast %cst_28 : f32 to vector<24x256xf32>
    %110 = arith.maximumf %108, %109 : vector<24x256xf32>
    %111 = vector.extract_strided_slice %110 {offsets = [0, 0], sizes = [8, 256], strides = [1, 1]} : vector<24x256xf32> to vector<8x256xf32>
    %112 = vector.extract_strided_slice %110 {offsets = [8, 0], sizes = [8, 256], strides = [1, 1]} : vector<24x256xf32> to vector<8x256xf32>
    %cst_29 = arith.constant 0.000000e+00 : f32
    %113 = vector.broadcast %cst_29 : f32 to vector<8x128xf32>
    %cst_30 = arith.constant 0.000000e+00 : f32
    %114 = vector.shape_cast %18 : vector<1x256xi1> to vector<1x256xi1>
    %115 = vector.broadcast %114 : vector<1x256xi1> to vector<8x256xi1>
    %116 = vector.broadcast %cst_30 : f32 to vector<8x256xf32>
    %117 = arith.select %115, %112, %116 : vector<8x256xi1>, vector<8x256xf32>
    %cst_31 = arith.constant 0.000000e+00 : f32
    %118 = vector.shape_cast %20 : vector<1x256xi1> to vector<1x256xi1>
    %119 = vector.broadcast %118 : vector<1x256xi1> to vector<8x256xi1>
    %120 = vector.broadcast %cst_31 : f32 to vector<8x256xf32>
    %121 = arith.select %119, %112, %120 : vector<8x256xi1>, vector<8x256xf32>
    %122 = tpu.concatenate %113, %117, %113 in 1 : vector<8x128xf32>, vector<8x256xf32>, vector<8x128xf32> -> vector<8x512xf32>
    %123 = tpu.concatenate %113, %112, %113 in 1 : vector<8x128xf32>, vector<8x256xf32>, vector<8x128xf32> -> vector<8x512xf32>
    %124 = tpu.concatenate %113, %121, %113 in 1 : vector<8x128xf32>, vector<8x256xf32>, vector<8x128xf32> -> vector<8x512xf32>
    %125 = vector.extract_strided_slice %110 {offsets = [16, 0], sizes = [8, 256], strides = [1, 1]} : vector<24x256xf32> to vector<8x256xf32>
    %126 = vector.extract_strided_slice %40 {offsets = [16, 0], sizes = [8, 512], strides = [1, 1]} : vector<32x512xf32> to vector<8x512xf32>
    %127 = vector.extract_strided_slice %41 {offsets = [16, 0], sizes = [8, 512], strides = [1, 1]} : vector<32x512xf32> to vector<8x512xf32>
    %128 = vector.extract_strided_slice %42 {offsets = [16, 0], sizes = [8, 512], strides = [1, 1]} : vector<32x512xf32> to vector<8x512xf32>
    %129 = vector.extract_strided_slice %126 {offsets = [0, 111], sizes = [8, 256], strides = [1, 1]} : vector<8x512xf32> to vector<8x256xf32>
    %130 = vector.extract_strided_slice %122 {offsets = [0, 111], sizes = [8, 256], strides = [1, 1]} : vector<8x512xf32> to vector<8x256xf32>
    %131 = vector.extract_strided_slice %127 {offsets = [0, 112], sizes = [8, 256], strides = [1, 1]} : vector<8x512xf32> to vector<8x256xf32>
    %132 = vector.extract_strided_slice %123 {offsets = [0, 112], sizes = [8, 256], strides = [1, 1]} : vector<8x512xf32> to vector<8x256xf32>
    %133 = vector.extract_strided_slice %128 {offsets = [0, 113], sizes = [8, 256], strides = [1, 1]} : vector<8x512xf32> to vector<8x256xf32>
    %134 = vector.extract_strided_slice %124 {offsets = [0, 113], sizes = [8, 256], strides = [1, 1]} : vector<8x512xf32> to vector<8x256xf32>
    %135 = vector.extract_strided_slice %126 {offsets = [0, 127], sizes = [8, 256], strides = [1, 1]} : vector<8x512xf32> to vector<8x256xf32>
    %136 = vector.extract_strided_slice %122 {offsets = [0, 127], sizes = [8, 256], strides = [1, 1]} : vector<8x512xf32> to vector<8x256xf32>
    %137 = vector.extract_strided_slice %127 {offsets = [0, 128], sizes = [8, 256], strides = [1, 1]} : vector<8x512xf32> to vector<8x256xf32>
    %138 = vector.extract_strided_slice %123 {offsets = [0, 128], sizes = [8, 256], strides = [1, 1]} : vector<8x512xf32> to vector<8x256xf32>
    %139 = vector.extract_strided_slice %128 {offsets = [0, 129], sizes = [8, 256], strides = [1, 1]} : vector<8x512xf32> to vector<8x256xf32>
    %140 = vector.extract_strided_slice %124 {offsets = [0, 129], sizes = [8, 256], strides = [1, 1]} : vector<8x512xf32> to vector<8x256xf32>
    %141 = vector.extract_strided_slice %126 {offsets = [0, 143], sizes = [8, 256], strides = [1, 1]} : vector<8x512xf32> to vector<8x256xf32>
    %142 = vector.extract_strided_slice %122 {offsets = [0, 143], sizes = [8, 256], strides = [1, 1]} : vector<8x512xf32> to vector<8x256xf32>
    %143 = vector.extract_strided_slice %127 {offsets = [0, 144], sizes = [8, 256], strides = [1, 1]} : vector<8x512xf32> to vector<8x256xf32>
    %144 = vector.extract_strided_slice %123 {offsets = [0, 144], sizes = [8, 256], strides = [1, 1]} : vector<8x512xf32> to vector<8x256xf32>
    %145 = vector.extract_strided_slice %128 {offsets = [0, 145], sizes = [8, 256], strides = [1, 1]} : vector<8x512xf32> to vector<8x256xf32>
    %146 = vector.extract_strided_slice %124 {offsets = [0, 145], sizes = [8, 256], strides = [1, 1]} : vector<8x512xf32> to vector<8x256xf32>
    %147 = tpu.concatenate %129, %130, %131, %132, %133, %134, %135, %136, %137, %138, %139, %140, %141, %142, %143, %144 in 0 : vector<8x256xf32>, vector<8x256xf32>, vector<8x256xf32>, vector<8x256xf32>, vector<8x256xf32>, vector<8x256xf32>, vector<8x256xf32>, vector<8x256xf32>, vector<8x256xf32>, vector<8x256xf32>, vector<8x256xf32>, vector<8x256xf32>, vector<8x256xf32>, vector<8x256xf32>, vector<8x256xf32>, vector<8x256xf32> -> vector<128x256xf32>
    %148 = tpu.concatenate %145, %146 in 0 : vector<8x256xf32>, vector<8x256xf32> -> vector<16x256xf32>
    %149 = tpu.concatenate %147, %148 in 0 : vector<128x256xf32>, vector<16x256xf32> -> vector<144x256xf32>
    %150 = arith.truncf %149 : vector<144x256xf32> to vector<144x256xbf16>
    %c0_32 = arith.constant 0 : index
    %c0_33 = arith.constant 0 : index
    %151 = vector.load %arg8[%c0_32, %c0_33] : memref<24x144xbf16, #tpu.memory_space<vmem>>, vector<24x144xbf16>
    %cst_34 = arith.constant dense<0.000000e+00> : vector<24x256xf32>
    %152 = tpu.matmul %151, %150, %cst_34 {dimension_numbers = #tpu.dot_dimension_numbers<[1], [0], [0], [1], [0, 0, 1, 1], [], []>} : vector<24x144xbf16>, vector<144x256xbf16>, vector<24x256xf32> -> vector<24x256xf32>
    %c0_35 = arith.constant 0 : index
    %c0_36 = arith.constant 0 : index
    %153 = vector.load %arg9[%c0_35, %c0_36] : memref<24x1xf32, #tpu.memory_space<vmem>>, vector<24x1xf32>
    %154 = vector.broadcast %153 : vector<24x1xf32> to vector<24x256xf32>
    %155 = arith.addf %152, %154 : vector<24x256xf32>
    %cst_37 = arith.constant 0.000000e+00 : f32
    %156 = vector.broadcast %cst_37 : f32 to vector<24x256xf32>
    %157 = arith.maximumf %155, %156 : vector<24x256xf32>
    %158 = vector.extract_strided_slice %157 {offsets = [0, 0], sizes = [8, 256], strides = [1, 1]} : vector<24x256xf32> to vector<8x256xf32>
    %159 = vector.extract_strided_slice %157 {offsets = [8, 0], sizes = [8, 256], strides = [1, 1]} : vector<24x256xf32> to vector<8x256xf32>
    %cst_38 = arith.constant 0.000000e+00 : f32
    %160 = vector.broadcast %cst_38 : f32 to vector<8x128xf32>
    %cst_39 = arith.constant 0.000000e+00 : f32
    %161 = vector.shape_cast %18 : vector<1x256xi1> to vector<1x256xi1>
    %162 = vector.broadcast %161 : vector<1x256xi1> to vector<8x256xi1>
    %163 = vector.broadcast %cst_39 : f32 to vector<8x256xf32>
    %164 = arith.select %162, %159, %163 : vector<8x256xi1>, vector<8x256xf32>
    %cst_40 = arith.constant 0.000000e+00 : f32
    %165 = vector.shape_cast %20 : vector<1x256xi1> to vector<1x256xi1>
    %166 = vector.broadcast %165 : vector<1x256xi1> to vector<8x256xi1>
    %167 = vector.broadcast %cst_40 : f32 to vector<8x256xf32>
    %168 = arith.select %166, %159, %167 : vector<8x256xi1>, vector<8x256xf32>
    %169 = tpu.concatenate %160, %164, %160 in 1 : vector<8x128xf32>, vector<8x256xf32>, vector<8x128xf32> -> vector<8x512xf32>
    %170 = tpu.concatenate %160, %159, %160 in 1 : vector<8x128xf32>, vector<8x256xf32>, vector<8x128xf32> -> vector<8x512xf32>
    %171 = tpu.concatenate %160, %168, %160 in 1 : vector<8x128xf32>, vector<8x256xf32>, vector<8x128xf32> -> vector<8x512xf32>
    %172 = vector.extract_strided_slice %157 {offsets = [16, 0], sizes = [8, 256], strides = [1, 1]} : vector<24x256xf32> to vector<8x256xf32>
    %173 = vector.extract_strided_slice %40 {offsets = [24, 0], sizes = [8, 512], strides = [1, 1]} : vector<32x512xf32> to vector<8x512xf32>
    %174 = vector.extract_strided_slice %41 {offsets = [24, 0], sizes = [8, 512], strides = [1, 1]} : vector<32x512xf32> to vector<8x512xf32>
    %175 = vector.extract_strided_slice %42 {offsets = [24, 0], sizes = [8, 512], strides = [1, 1]} : vector<32x512xf32> to vector<8x512xf32>
    %176 = vector.extract_strided_slice %173 {offsets = [0, 111], sizes = [8, 256], strides = [1, 1]} : vector<8x512xf32> to vector<8x256xf32>
    %177 = vector.extract_strided_slice %169 {offsets = [0, 111], sizes = [8, 256], strides = [1, 1]} : vector<8x512xf32> to vector<8x256xf32>
    %178 = vector.extract_strided_slice %174 {offsets = [0, 112], sizes = [8, 256], strides = [1, 1]} : vector<8x512xf32> to vector<8x256xf32>
    %179 = vector.extract_strided_slice %170 {offsets = [0, 112], sizes = [8, 256], strides = [1, 1]} : vector<8x512xf32> to vector<8x256xf32>
    %180 = vector.extract_strided_slice %175 {offsets = [0, 113], sizes = [8, 256], strides = [1, 1]} : vector<8x512xf32> to vector<8x256xf32>
    %181 = vector.extract_strided_slice %171 {offsets = [0, 113], sizes = [8, 256], strides = [1, 1]} : vector<8x512xf32> to vector<8x256xf32>
    %182 = vector.extract_strided_slice %173 {offsets = [0, 127], sizes = [8, 256], strides = [1, 1]} : vector<8x512xf32> to vector<8x256xf32>
    %183 = vector.extract_strided_slice %169 {offsets = [0, 127], sizes = [8, 256], strides = [1, 1]} : vector<8x512xf32> to vector<8x256xf32>
    %184 = vector.extract_strided_slice %174 {offsets = [0, 128], sizes = [8, 256], strides = [1, 1]} : vector<8x512xf32> to vector<8x256xf32>
    %185 = vector.extract_strided_slice %170 {offsets = [0, 128], sizes = [8, 256], strides = [1, 1]} : vector<8x512xf32> to vector<8x256xf32>
    %186 = vector.extract_strided_slice %175 {offsets = [0, 129], sizes = [8, 256], strides = [1, 1]} : vector<8x512xf32> to vector<8x256xf32>
    %187 = vector.extract_strided_slice %171 {offsets = [0, 129], sizes = [8, 256], strides = [1, 1]} : vector<8x512xf32> to vector<8x256xf32>
    %188 = vector.extract_strided_slice %173 {offsets = [0, 143], sizes = [8, 256], strides = [1, 1]} : vector<8x512xf32> to vector<8x256xf32>
    %189 = vector.extract_strided_slice %169 {offsets = [0, 143], sizes = [8, 256], strides = [1, 1]} : vector<8x512xf32> to vector<8x256xf32>
    %190 = vector.extract_strided_slice %174 {offsets = [0, 144], sizes = [8, 256], strides = [1, 1]} : vector<8x512xf32> to vector<8x256xf32>
    %191 = vector.extract_strided_slice %170 {offsets = [0, 144], sizes = [8, 256], strides = [1, 1]} : vector<8x512xf32> to vector<8x256xf32>
    %192 = vector.extract_strided_slice %175 {offsets = [0, 145], sizes = [8, 256], strides = [1, 1]} : vector<8x512xf32> to vector<8x256xf32>
    %193 = vector.extract_strided_slice %171 {offsets = [0, 145], sizes = [8, 256], strides = [1, 1]} : vector<8x512xf32> to vector<8x256xf32>
    %194 = tpu.concatenate %176, %177, %178, %179, %180, %181, %182, %183, %184, %185, %186, %187, %188, %189, %190, %191 in 0 : vector<8x256xf32>, vector<8x256xf32>, vector<8x256xf32>, vector<8x256xf32>, vector<8x256xf32>, vector<8x256xf32>, vector<8x256xf32>, vector<8x256xf32>, vector<8x256xf32>, vector<8x256xf32>, vector<8x256xf32>, vector<8x256xf32>, vector<8x256xf32>, vector<8x256xf32>, vector<8x256xf32>, vector<8x256xf32> -> vector<128x256xf32>
    %195 = tpu.concatenate %192, %193 in 0 : vector<8x256xf32>, vector<8x256xf32> -> vector<16x256xf32>
    %196 = tpu.concatenate %194, %195 in 0 : vector<128x256xf32>, vector<16x256xf32> -> vector<144x256xf32>
    %197 = arith.truncf %196 : vector<144x256xf32> to vector<144x256xbf16>
    %c0_41 = arith.constant 0 : index
    %c0_42 = arith.constant 0 : index
    %198 = vector.load %arg10[%c0_41, %c0_42] : memref<16x144xbf16, #tpu.memory_space<vmem>>, vector<16x144xbf16>
    %cst_43 = arith.constant dense<0.000000e+00> : vector<16x256xf32>
    %199 = tpu.matmul %198, %197, %cst_43 {dimension_numbers = #tpu.dot_dimension_numbers<[1], [0], [0], [1], [0, 0, 1, 1], [], []>} : vector<16x144xbf16>, vector<144x256xbf16>, vector<16x256xf32> -> vector<16x256xf32>
    %c0_44 = arith.constant 0 : index
    %c0_45 = arith.constant 0 : index
    %200 = vector.load %arg11[%c0_44, %c0_45] : memref<16x1xf32, #tpu.memory_space<vmem>>, vector<16x1xf32>
    %201 = vector.broadcast %200 : vector<16x1xf32> to vector<16x256xf32>
    %202 = arith.addf %199, %201 : vector<16x256xf32>
    %cst_46 = arith.constant 0.000000e+00 : f32
    %203 = vector.broadcast %cst_46 : f32 to vector<16x256xf32>
    %204 = arith.maximumf %202, %203 : vector<16x256xf32>
    %205 = vector.extract_strided_slice %204 {offsets = [0, 0], sizes = [8, 256], strides = [1, 1]} : vector<16x256xf32> to vector<8x256xf32>
    %206 = vector.extract_strided_slice %204 {offsets = [8, 0], sizes = [8, 256], strides = [1, 1]} : vector<16x256xf32> to vector<8x256xf32>
    %207 = tpu.concatenate %78, %125, %172, %206 in 0 : vector<8x256xf32>, vector<8x256xf32>, vector<8x256xf32>, vector<8x256xf32> -> vector<32x256xf32>
    %cst_47 = arith.constant dense<0.000000e+00> : vector<32xf32>
    %208 = vector.multi_reduction <add>, %207, %cst_47 [1] : vector<32x256xf32> to vector<32xf32>
    %209 = vector.shape_cast %208 : vector<32xf32> to vector<32x1xf32>
    %cst_48 = arith.constant 3.906250e-03 : f32
    %210 = vector.broadcast %cst_48 : f32 to vector<32x1xf32>
    %211 = arith.mulf %209, %210 : vector<32x1xf32>
    %212 = vector.shape_cast %211 : vector<32x1xf32> to vector<32x1xf32>
    %213 = vector.broadcast %212 : vector<32x1xf32> to vector<32x128xf32>
    %c0_49 = arith.constant 0 : index
    %c0_50 = arith.constant 0 : index
    %214 = vector.load %arg12[%c0_49, %c0_50] : memref<8x32xf32, #tpu.memory_space<vmem>>, vector<8x32xf32>
    %cst_51 = arith.constant dense<0.000000e+00> : vector<8x128xf32>
    %215 = tpu.matmul %214, %213, %cst_51 {dimension_numbers = #tpu.dot_dimension_numbers<[1], [0], [0], [1], [0, 0, 1, 1], [], []>} : vector<8x32xf32>, vector<32x128xf32>, vector<8x128xf32> -> vector<8x128xf32>
    %c0_52 = arith.constant 0 : index
    %c0_53 = arith.constant 0 : index
    %216 = vector.load %arg13[%c0_52, %c0_53] : memref<8x1xf32, #tpu.memory_space<vmem>>, vector<8x1xf32>
    %217 = vector.broadcast %216 : vector<8x1xf32> to vector<8x128xf32>
    %218 = arith.addf %215, %217 : vector<8x128xf32>
    %cst_54 = arith.constant 0.000000e+00 : f32
    %219 = vector.broadcast %cst_54 : f32 to vector<8x128xf32>
    %220 = arith.maximumf %218, %219 : vector<8x128xf32>
    %c0_55 = arith.constant 0 : index
    %c0_56 = arith.constant 0 : index
    %221 = vector.load %arg14[%c0_55, %c0_56] : memref<32x8xf32, #tpu.memory_space<vmem>>, vector<32x8xf32>
    %cst_57 = arith.constant dense<0.000000e+00> : vector<32x128xf32>
    %222 = tpu.matmul %221, %220, %cst_57 {dimension_numbers = #tpu.dot_dimension_numbers<[1], [0], [0], [1], [0, 0, 1, 1], [], []>} : vector<32x8xf32>, vector<8x128xf32>, vector<32x128xf32> -> vector<32x128xf32>
    %c0_58 = arith.constant 0 : index
    %c0_59 = arith.constant 0 : index
    %223 = vector.load %arg15[%c0_58, %c0_59] : memref<32x1xf32, #tpu.memory_space<vmem>>, vector<32x1xf32>
    %224 = vector.broadcast %223 : vector<32x1xf32> to vector<32x128xf32>
    %225 = arith.addf %222, %224 : vector<32x128xf32>
    %cst_60 = arith.constant dense<0xFF800000> : vector<128xf32>
    %226 = vector.multi_reduction <maximumf>, %225, %cst_60 [0] : vector<32x128xf32> to vector<128xf32>
    %227 = vector.shape_cast %226 : vector<128xf32> to vector<1x128xf32>
    %228 = vector.broadcast %227 : vector<1x128xf32> to vector<32x128xf32>
    %229 = arith.subf %225, %228 : vector<32x128xf32>
    %230 = math.exp %229 : vector<32x128xf32>
    %cst_61 = arith.constant dense<0.000000e+00> : vector<128xf32>
    %231 = vector.multi_reduction <add>, %230, %cst_61 [0] : vector<32x128xf32> to vector<128xf32>
    %232 = vector.shape_cast %231 : vector<128xf32> to vector<1x128xf32>
    %233 = vector.broadcast %232 : vector<1x128xf32> to vector<32x128xf32>
    %234 = arith.divf %230, %233 : vector<32x128xf32>
    %235 = tpu.concatenate %64, %111, %158, %205 in 0 : vector<8x256xf32>, vector<8x256xf32>, vector<8x256xf32>, vector<8x256xf32> -> vector<32x256xf32>
    %236 = vector.extract_strided_slice %234 {offsets = [0, 0], sizes = [32, 1], strides = [1, 1]} : vector<32x128xf32> to vector<32x1xf32>
    %237 = vector.broadcast %236 : vector<32x1xf32> to vector<32x256xf32>
    %238 = arith.mulf %235, %237 : vector<32x256xf32>
    %cst_62 = arith.constant 0.000000e+00 : f32
    %239 = vector.broadcast %cst_62 : f32 to vector<32x128xf32>
    %cst_63 = arith.constant 0.000000e+00 : f32
    %240 = vector.shape_cast %18 : vector<1x256xi1> to vector<1x256xi1>
    %241 = vector.broadcast %240 : vector<1x256xi1> to vector<32x256xi1>
    %242 = vector.broadcast %cst_63 : f32 to vector<32x256xf32>
    %243 = arith.select %241, %238, %242 : vector<32x256xi1>, vector<32x256xf32>
    %cst_64 = arith.constant 0.000000e+00 : f32
    %244 = vector.shape_cast %20 : vector<1x256xi1> to vector<1x256xi1>
    %245 = vector.broadcast %244 : vector<1x256xi1> to vector<32x256xi1>
    %246 = vector.broadcast %cst_64 : f32 to vector<32x256xf32>
    %247 = arith.select %245, %238, %246 : vector<32x256xi1>, vector<32x256xf32>
    %248 = tpu.concatenate %239, %243, %239 in 1 : vector<32x128xf32>, vector<32x256xf32>, vector<32x128xf32> -> vector<32x512xf32>
    %249 = tpu.concatenate %239, %238, %239 in 1 : vector<32x128xf32>, vector<32x256xf32>, vector<32x128xf32> -> vector<32x512xf32>
    %250 = tpu.concatenate %239, %247, %239 in 1 : vector<32x128xf32>, vector<32x256xf32>, vector<32x128xf32> -> vector<32x512xf32>
    %251 = vector.extract_strided_slice %248 {offsets = [0, 111], sizes = [32, 256], strides = [1, 1]} : vector<32x512xf32> to vector<32x256xf32>
    %252 = vector.extract_strided_slice %249 {offsets = [0, 112], sizes = [32, 256], strides = [1, 1]} : vector<32x512xf32> to vector<32x256xf32>
    %253 = vector.extract_strided_slice %250 {offsets = [0, 113], sizes = [32, 256], strides = [1, 1]} : vector<32x512xf32> to vector<32x256xf32>
    %254 = vector.extract_strided_slice %248 {offsets = [0, 127], sizes = [32, 256], strides = [1, 1]} : vector<32x512xf32> to vector<32x256xf32>
    %255 = vector.extract_strided_slice %249 {offsets = [0, 128], sizes = [32, 256], strides = [1, 1]} : vector<32x512xf32> to vector<32x256xf32>
    %256 = vector.extract_strided_slice %250 {offsets = [0, 129], sizes = [32, 256], strides = [1, 1]} : vector<32x512xf32> to vector<32x256xf32>
    %257 = vector.extract_strided_slice %248 {offsets = [0, 143], sizes = [32, 256], strides = [1, 1]} : vector<32x512xf32> to vector<32x256xf32>
    %258 = vector.extract_strided_slice %249 {offsets = [0, 144], sizes = [32, 256], strides = [1, 1]} : vector<32x512xf32> to vector<32x256xf32>
    %259 = vector.extract_strided_slice %250 {offsets = [0, 145], sizes = [32, 256], strides = [1, 1]} : vector<32x512xf32> to vector<32x256xf32>
    %260 = tpu.concatenate %251, %252, %253, %254, %255, %256, %257, %258, %259 in 0 : vector<32x256xf32>, vector<32x256xf32>, vector<32x256xf32>, vector<32x256xf32>, vector<32x256xf32>, vector<32x256xf32>, vector<32x256xf32>, vector<32x256xf32>, vector<32x256xf32> -> vector<288x256xf32>
    %261 = arith.truncf %260 : vector<288x256xf32> to vector<288x256xbf16>
    %c0_65 = arith.constant 0 : index
    %c0_66 = arith.constant 0 : index
    %262 = vector.load %arg16[%c0_65, %c0_66] : memref<16x288xbf16, #tpu.memory_space<vmem>>, vector<16x288xbf16>
    %cst_67 = arith.constant dense<0.000000e+00> : vector<16x256xf32>
    %263 = tpu.matmul %262, %261, %cst_67 {dimension_numbers = #tpu.dot_dimension_numbers<[1], [0], [0], [1], [0, 0, 1, 1], [], []>} : vector<16x288xbf16>, vector<288x256xbf16>, vector<16x256xf32> -> vector<16x256xf32>
    %c0_68 = arith.constant 0 : index
    %c0_69 = arith.constant 0 : index
    %264 = vector.load %arg17[%c0_68, %c0_69] : memref<16x1xf32, #tpu.memory_space<vmem>>, vector<16x1xf32>
    %265 = vector.broadcast %264 : vector<16x1xf32> to vector<16x256xf32>
    %266 = arith.addf %263, %265 : vector<16x256xf32>
    %267 = arith.addf %266, %22 : vector<16x256xf32>
    %cst_70 = arith.constant 0.000000e+00 : f32
    %268 = vector.broadcast %cst_70 : f32 to vector<16x256xf32>
    %269 = arith.maximumf %267, %268 : vector<16x256xf32>
    %c0_71 = arith.constant 0 : index
    %c0_72 = arith.constant 0 : index
    %c0_73 = arith.constant 0 : index
    %270 = vector.load %arg18[%c0_71, %c0_72, %c0_73] : memref<1x16x256xf32, #tpu.memory_space<vmem>>, vector<1x16x256xf32>
    %271 = vector.shape_cast %270 : vector<1x16x256xf32> to vector<16x256xf32>
    %272 = vector.shape_cast %269 : vector<16x256xf32> to vector<1x16x256xf32>
    tpu.vector_store %arg18[%c0_71, %c0_72, %c0_73], %272 {strides = array<i32>} : memref<1x16x256xf32, #tpu.memory_space<vmem>>, vector<1x16x256xf32>,
    return
  }
  func.func @transform_0(%arg0: i32) -> (i32, i32, i32) {
    %c0_i32 = arith.constant 0 : i32
    %c0_i32_0 = arith.constant 0 : i32
    %c0_i32_1 = arith.constant 0 : i32
    return %arg0, %c0_i32, %c0_i32_0 : i32, i32, i32
  }
  func.func @transform_1(%arg0: i32) -> (i32, i32) {
    %c0_i32 = arith.constant 0 : i32
    %c0_i32_0 = arith.constant 0 : i32
    %c0_i32_1 = arith.constant 0 : i32
    return %c0_i32, %c0_i32_0 : i32, i32
  }
  func.func @transform_2(%arg0: i32) -> (i32, i32) {
    %c0_i32 = arith.constant 0 : i32
    %c0_i32_0 = arith.constant 0 : i32
    %c0_i32_1 = arith.constant 0 : i32
    return %c0_i32, %c0_i32_0 : i32, i32
  }
  func.func @transform_3(%arg0: i32) -> (i32, i32) {
    %c0_i32 = arith.constant 0 : i32
    %c0_i32_0 = arith.constant 0 : i32
    %c0_i32_1 = arith.constant 0 : i32
    return %c0_i32, %c0_i32_0 : i32, i32
  }
  func.func @transform_4(%arg0: i32) -> (i32, i32) {
    %c0_i32 = arith.constant 0 : i32
    %c0_i32_0 = arith.constant 0 : i32
    %c0_i32_1 = arith.constant 0 : i32
    return %c0_i32, %c0_i32_0 : i32, i32
  }
  func.func @transform_5(%arg0: i32) -> (i32, i32) {
    %c0_i32 = arith.constant 0 : i32
    %c0_i32_0 = arith.constant 0 : i32
    %c0_i32_1 = arith.constant 0 : i32
    return %c0_i32, %c0_i32_0 : i32, i32
  }
  func.func @transform_6(%arg0: i32) -> (i32, i32) {
    %c0_i32 = arith.constant 0 : i32
    %c0_i32_0 = arith.constant 0 : i32
    %c0_i32_1 = arith.constant 0 : i32
    return %c0_i32, %c0_i32_0 : i32, i32
  }
  func.func @transform_7(%arg0: i32) -> (i32, i32) {
    %c0_i32 = arith.constant 0 : i32
    %c0_i32_0 = arith.constant 0 : i32
    %c0_i32_1 = arith.constant 0 : i32
    return %c0_i32, %c0_i32_0 : i32, i32
  }
  func.func @transform_8(%arg0: i32) -> (i32, i32) {
    %c0_i32 = arith.constant 0 : i32
    %c0_i32_0 = arith.constant 0 : i32
    %c0_i32_1 = arith.constant 0 : i32
    return %c0_i32, %c0_i32_0 : i32, i32
  }
  func.func @transform_9(%arg0: i32) -> (i32, i32) {
    %c0_i32 = arith.constant 0 : i32
    %c0_i32_0 = arith.constant 0 : i32
    %c0_i32_1 = arith.constant 0 : i32
    return %c0_i32, %c0_i32_0 : i32, i32
  }
  func.func @transform_10(%arg0: i32) -> (i32, i32) {
    %c0_i32 = arith.constant 0 : i32
    %c0_i32_0 = arith.constant 0 : i32
    %c0_i32_1 = arith.constant 0 : i32
    return %c0_i32, %c0_i32_0 : i32, i32
  }
  func.func @transform_11(%arg0: i32) -> (i32, i32) {
    %c0_i32 = arith.constant 0 : i32
    %c0_i32_0 = arith.constant 0 : i32
    %c0_i32_1 = arith.constant 0 : i32
    return %c0_i32, %c0_i32_0 : i32, i32
  }
  func.func @transform_12(%arg0: i32) -> (i32, i32) {
    %c0_i32 = arith.constant 0 : i32
    %c0_i32_0 = arith.constant 0 : i32
    %c0_i32_1 = arith.constant 0 : i32
    return %c0_i32, %c0_i32_0 : i32, i32
  }
  func.func @transform_13(%arg0: i32) -> (i32, i32) {
    %c0_i32 = arith.constant 0 : i32
    %c0_i32_0 = arith.constant 0 : i32
    %c0_i32_1 = arith.constant 0 : i32
    return %c0_i32, %c0_i32_0 : i32, i32
  }
  func.func @transform_14(%arg0: i32) -> (i32, i32) {
    %c0_i32 = arith.constant 0 : i32
    %c0_i32_0 = arith.constant 0 : i32
    %c0_i32_1 = arith.constant 0 : i32
    return %c0_i32, %c0_i32_0 : i32, i32
  }
  func.func @transform_15(%arg0: i32) -> (i32, i32) {
    %c0_i32 = arith.constant 0 : i32
    %c0_i32_0 = arith.constant 0 : i32
    %c0_i32_1 = arith.constant 0 : i32
    return %c0_i32, %c0_i32_0 : i32, i32
  }
  func.func @transform_16(%arg0: i32) -> (i32, i32) {
    %c0_i32 = arith.constant 0 : i32
    %c0_i32_0 = arith.constant 0 : i32
    %c0_i32_1 = arith.constant 0 : i32
    return %c0_i32, %c0_i32_0 : i32, i32
  }
  func.func @transform_17(%arg0: i32) -> (i32, i32, i32) {
    %c0_i32 = arith.constant 0 : i32
    %c0_i32_0 = arith.constant 0 : i32
    %c0_i32_1 = arith.constant 0 : i32
    return %arg0, %c0_i32, %c0_i32_0 : i32, i32, i32
  }
}

</mosaic_0001>

<bundles_post_ra>
// kernel: hmu_forward.1
= control target key start
LH: loop header
LB: loop body
LE: loop exit
PB: predicated region body
PF: predicated region fallthrough
CT: control target
= control target key end

     0   :  { %s3941_s24 = smov 0   ;;  %s5139_s0 = inlined_call_operand.vmem [shape: f32[2,16,256], index: 0, kind: input, shape index: {}]   ;;  %s5140_s1 = inlined_call_operand.vmem [shape: bf16[32,16], index: 1, kind: input, shape index: {}]   ;;  %s5141_s2 = inlined_call_operand.vmem [shape: f32[32,1], index: 2, kind: input, shape index: {}]   ;;  %s5142_s3 = inlined_call_operand.vmem [shape: bf16[24,72], index: 3, kind: input, shape index: {}]   ;;  %s5143_s4 = inlined_call_operand.vmem [shape: f32[24,1], index: 4, kind: input, shape index: {}, may-alias: {4,6,8}]   ;;  %s5144_s5 = inlined_call_operand.vmem [shape: bf16[24,144], index: 5, kind: input, shape index: {}]   ;;  %s5145_s6 = inlined_call_operand.vmem [shape: f32[24,1], index: 6, kind: input, shape index: {}, may-alias: {4,6,8}]   ;;  %s5146_s7 = inlined_call_operand.vmem [shape: bf16[24,144], index: 7, kind: input, shape index: {}]   ;;  %s5147_s8 = inlined_call_operand.vmem [shape: f32[24,1], index: 8, kind: input, shape index: {}, may-alias: {4,6,8}]   ;;  %s5148_s9 = inlined_call_operand.vmem [shape: bf16[16,144], index: 9, kind: input, shape index: {}]   ;;  %s5149_s10 = inlined_call_operand.vmem [shape: f32[16,1], index: 10, kind: input, shape index: {}]   ;;  %s5150_s11 = inlined_call_operand.vmem [shape: f32[8,32], index: 11, kind: input, shape index: {}]   ;;  %s5151_s12 = inlined_call_operand.vmem [shape: f32[8,1], index: 12, kind: input, shape index: {}]   ;;  %s5152_s13 = inlined_call_operand.vmem [shape: f32[32,8], index: 13, kind: input, shape index: {}]   ;;  %s5153_s14 = inlined_call_operand.vmem [shape: f32[32,1], index: 14, kind: input, shape index: {}]   ;;  %s5154_s15 = inlined_call_operand.vmem [shape: bf16[16,288], index: 15, kind: input, shape index: {}]   ;;  %s5155_s16 = inlined_call_operand.vmem [shape: f32[16,1], index: 16, kind: input, shape index: {}]   ;;  %s5156_s17 = inlined_call_operand.vmem [shape: f32[2,16,256], index: 17, kind: output, shape index: {}]  }
   0x1   :  { %5177 = sst [smem:[#allocation2_spill]] %s5139_s0 }
   0x2   :  { %5178 = sst [smem:[#allocation3_spill]] %s5140_s1 }
   0x3   :  { %5179 = sst [smem:[#allocation4_spill]] %s5141_s2 }
   0x4   :  { %5180 = sst [smem:[#allocation5_spill]] %s5142_s3 }
   0x5   :  { %5181 = sst [smem:[#allocation6_spill]] %s5144_s5 }
   0x6   :  { %5182 = sst [smem:[#allocation7_spill]] %s5146_s7 }
   0x7   :  { %5183 = sst [smem:[#allocation8_spill]] %s5148_s9 }
   0x8 LB: > { %s3243_s25 = sadd.s32 4294967295, %s3836_s24   ;;  %p3247_p0 = scmp.ge.s32.totalorder %s3836_s24, 1  ;;  %s3836_s24 = sphi %s3941_s24, %s27_s24  }
   0x9   : > { %p487_p1 = scmp.lt.s32.totalorder %s3836_s24, 3 }
   0xb   : > { %p488_p2 = pnand %p3247_p0, %p487_p1 }
   0xc   : > { %p539_p3 = scmp.lt.s32.totalorder (!%p488_p2), %s3243_s25, 1  ;;  %v3838_v0 = vmov (!%p488_p2), 0   ;;  %s5184_s2 = sld [smem:[#allocation4_spill]] (!%p488_p2)  ;;  %v3839_v2 = vmov (!%p488_p2), 0.0   ;;  %vm625_vm0 = vcmask (!%p488_p2), 130048   ;;  %v550_v10 = vlaneseq (!%p488_p2) }
   0xd   : > { %491 = sbr.rel (%p488_p2) target bundleno = 3632 (0xe30), region = 88  ;;  %664 = vmatprep.mubr.bf16.mxu0 (!%p488_p2), %v3838_v0  ;;  %3353 = vset.pattern.permute.xlu0 (!%p488_p2), %v3838_v0  ;;  %s5173_s28 = smov (!%p488_p2), 127   ;;  %vm726_vm5 = vcmask (!%p488_p2), 1039360   ;;  %vm754_vm6 = vcmask (!%p488_p2), 916480   ;;  %vm740_vm7 = vcmask (!%p488_p2), 1031168   ;;  %vm775_vm8 = vcmask (!%p488_p2), 900096  }
   0xe   : > { %720 = vrot.lane.b32.xlu1 (!%p488_p2), %v3839_v2, %s5173_s28  ;;  %971 = vmatprep.mubr.bf16.mxu1 (!%p488_p2), %v3838_v0  ;;  %s5185_s18 = sld [smem:[#allocation2_spill]] (!%p488_p2)  ;;  %s5171_s1 = smov (!%p488_p2), 126   ;;  %v551_v11 = vand.u32 (!%p488_p2), 127, %v550_v10  ;;  %vm787_vm9 = vcmask (!%p488_p2), 785408   ;;  %vm799_vm10 = vcmask (!%p488_p2), 777216   ;;  %vm764_vm11 = vcmask (!%p488_p2), 908288  }
   0xf   : > { %3394 = vset.pattern.permute.xlu1 (!%p488_p2), %v3838_v0  ;;  %s5186_s22 = sld [smem:[#allocation3_spill]] (!%p488_p2)  ;;  %s5165_s23 = smov (!%p488_p2), 110   ;;  %vm811_vm12 = vcmask (!%p488_p2), 769024   ;;  %vm906_vm13 = vcmask (!%p488_p2), 138240   ;;  %vm932_vm14 = vcmask (!%p488_p2), 1043456   ;;  %vm925_vm15 = vcmask (!%p488_p2), 588800  }
  0x10   : > { %s5169_s26 = smov (!%p488_p2), 112   ;;  %v552_v12 = vadd.s32 (!%p488_p2), 128, %v551_v11  ;;  %v557_v14 = vand.u32 (!%p488_p2), 15, %v551_v11  ;;  %s5167_s27 = smov (!%p488_p2), 111  }
  0x11   : > { %s5161_s0 = smov (!%p488_p2), 95   ;;  %s5163_s30 = smov (!%p488_p2), 96  }
  0x12   : > { %v591_v1 = vld [vmem:[%s5184_s2] sm:$0xff] (!%p488_p2)  ;;  %734 = vrot.lane.b32.xlu1 (!%p488_p2), %v3839_v2, %s5171_s1  ;;  %v564_v15 = vand.u32 (!%p488_p2), 15, %v552_v12  ;;  %vm3985_vm1 = vcmp.ne.s32.totalorder (!%p488_p2), %v557_v14, 0  ;;  %vm4001_vm3 = vcmp.ne.s32.totalorder (!%p488_p2), %v557_v14, 15  ;;  %s5175_s20 = smov (!%p488_p2), 17   ;;  %s5195_s3 = sld [smem:[#allocation5_spill]] (!%p488_p2) }
  0x13   : > { %597 = vperm.xlu0 (!%p488_p2), %3353, %v591_v1   ;;  %s5197_s21 = smov (!%p488_p2), 94   ;;  %s5198_s5 = sld [smem:[#allocation6_spill]] (!%p488_p2) }
  0x14   : > { %s5210_s25 = smov (!%p539_p3, %s3243_s25), 1  ;;  %vm3991_vm2 = vcmp.ne.s32.totalorder %v564_v15, 0  ;;  %vm4005_vm4 = vcmp.ne.s32.totalorder %v564_v15, 15  ;;  %s5201_s7 = sld [smem:[#allocation7_spill]] }
  0x15   : > { %s5158_s29 = sshll.u32 %s5210_s25, 5  ;;  %v3795_v9 = vld [vmem:[%s5186_s22] sm:$0xff]   ;;  %s5204_s9 = sld [smem:[#allocation8_spill]] }
  0x16   : > { %s3966_s19 = scalar_lea.vmem %s5185_s18, %s5158_s29  ;;  %773 = vrot.lane.b32.xlu1 %v3839_v2, %s5165_s23  ;;  %s5159_s18 = smov 94  }
  0x17   : > { %v582_v3 = vld [vmem:[%s3966_s19 + $0x8] sm:$0xff]  ;;  %v584_v4 = vld [vmem:[%s3966_s19 + $0x18] sm:$0xff]  ;;  %v581_v5 = vld [vmem:[%s3966_s19] sm:$0xff]  ;;  %748 = vrot.lane.b32.xlu0 %v3839_v2, %s5169_s26  ;;  %s5199_s29 = smov 110  }
  0x18   : > { %v590_v6 = vpack.c.bf16 %v584_v4, %v582_v3  ;;  %v583_v7 = vld [vmem:[%s3966_s19 + $0x10] sm:$0xff] }
  0x19   : > { %v589_v8 = vpack.c.bf16 %v583_v7, %v581_v5 }
  0x1a   : > { %632 = vmatprep.subr.bf16.mxu0 %v590_v6 }
  0x1b   : > { %633 = vmatpush1.bf16.msra.mxu0 %v589_v8 }
  0x1e   : > { %3254 = vmatmul.mubr.msk.bf16.vlgmr.msra.gmra.mrb[0].mxu0 %vm625_vm0, %v3795_v9 }
  0x1f   : > { %674 = vmatprep.mubr.bf16.mxu0 %v3838_v0 }
  0x80   : > { %v4028_v35 = vpop.permute.xlu1 %720 }
  0x84   : > { %v4032_v37 = vpop.permute.xlu1 %734 }
  0x88   : > { %v4034_v41 = vpop.permute.xlu1 %773 }
  0x92   : > { %v598_v13 = vpop.permute.xlu0 %597 }
  0x96   : > { %v4030_v36 = vpop.permute.xlu0 %748 }
  0xf1   : > { %v666_v16 = vpop.f32.mrb[0].mxu0 }
  0xf2   : > { %v667_v17 = vadd.f32 %v666_v16, %v598_v13  ;;  %v668_v18 = vpop.f32.mrb[1].mxu0 }
  0xf3   : > { %v669_v19 = vadd.f32 %v668_v18, %v598_v13  ;;  %v3983_v20 = vpop.f32.mrb[2].mxu0 }
  0xf4   : > { %v685_v22 = vmax.f32 %v667_v17, 0.0  ;;  %v3989_v23 = vpop.f32.mrb[3].mxu0 }
  0xf5   : > { %v686_v25 = vmax.f32 %v669_v19, 0.0 }
  0xf6   : > { %v709_v26 = vsel %vm3985_vm1, %v685_v22, 0.0  ;;  %v4011_v32 = vsel %vm4001_vm3, %v685_v22, 0.0 }
  0xf7   : > { %v3359_v27 = vpack.i.bf16 %v686_v25, %v685_v22  ;;  %v710_v28 = vsel %vm3991_vm2, %v686_v25, 0.0  ;;  %v698_v33 = vsel %vm4005_vm4, %v686_v25, 0.0 }
  0xf8   : > { %v3364_v29 = vpack.i.bf16 %v710_v28, %v709_v26  ;;  %v3374_v34 = vpack.i.bf16 %v698_v33, %v4011_v32 }
  0xf9   : > { %3360 = vrot.lane.b32.xlu1 %v3359_v27, %s5167_s27  ;;  %3355 = vrot.lane.b32.xlu0 %v3359_v27, %s5173_s28 }
  0xfd   : > { %3370 = vrot.lane.b32.xlu0 %v3359_v27, %s5161_s0  ;;  %3365 = vrot.lane.b32.xlu1 %v3364_v29, %s5171_s1 }
 0x101   : > { %785 = vrot.lane.b32.xlu1 %v3839_v2, %s5163_s30  ;;  %3375 = vrot.lane.b32.xlu0 %v3374_v34, %s5169_s26 }
 0x105   : > { %797 = vrot.lane.b32.xlu1 %v3839_v2, %s5161_s0  ;;  %3380 = vrot.lane.b32.xlu0 %v3364_v29, %s5165_s23  ;;  %s5200_s0 = smov 96  }
 0x109   : > { %3385 = vrot.lane.b32.xlu0 %v3374_v34, %s5163_s30  ;;  %809 = vrot.lane.b32.xlu1 %v3839_v2, %s5159_s18 }
 0x10d   : > { %3390 = vrot.lane.b32.xlu0 %v3364_v29, %s5159_s18  ;;  %s5196_s18 = smov 95  }
 0x16b   : > { %v3356_v38 = vpop.permute.xlu0 %3355  ;;  %v3361_v47 = vpop.permute.xlu1 %3360 }
 0x16c   : > { %v3358_v39 = vunpack.i.h.bf16 %v3356_v38  ;;  %v3357_v40 = vunpack.i.l.bf16 %v3356_v38  ;;  %v3362_v49 = vunpack.i.l.bf16 %v3361_v47  ;;  %v3363_v14 = vunpack.i.h.bf16 %v3361_v47 }
 0x16e   : > { %v819_v42 = vpack.c.bf16 %v3358_v39, %v698_v33  ;;  %v727_v43 = vsel %vm726_vm5, %v4028_v35, %v3357_v40  ;;  %v728_v7 = vsel %vm726_vm5, %v3357_v40, %v3358_v39  ;;  %v765_v27 = vsel %vm764_vm11, %v3362_v49, %v3363_v14 }
 0x16f   : > { %v4038_v44 = vpop.permute.xlu0 %3370  ;;  %v817_v45 = vpack.c.bf16 %v727_v43, %v3839_v2  ;;  %v3366_v51 = vpop.permute.xlu1 %3365  ;;  %v818_v11 = vpack.c.bf16 %v728_v7, %v4011_v32  ;;  %v592_v43 = vld [vmem:[%s5184_s2 + $0x8] sm:$0xff] }
 0x170   : > { %880 = vrot.lane.b32.xlu1 %v819_v42, %s5175_s20  ;;  %v3372_v55 = vunpack.i.l.bf16 %v4038_v44  ;;  %v3367_v57 = vunpack.i.l.bf16 %v3366_v51  ;;  %v3368_v63 = vunpack.i.h.bf16 %v3366_v51  ;;  %v3373_v15 = vunpack.i.h.bf16 %v4038_v44 }
 0x171   : > { %876 = vrot.lane.b32.xlu0 %v817_v45, %s5175_s20  ;;  %v836_v45 = vld [vmem:[%s5143_s4 + $0x8] sm:$0xff] }
 0x172   : > { %v741_v1 = vsel %vm740_vm7, %v4032_v37, %v3367_v57  ;;  %v742_v8 = vsel %vm740_vm7, %v3367_v57, %v3368_v63  ;;  %v800_v26 = vsel %vm799_vm10, %v3372_v55, %v3373_v15 }
 0x173   : > { %v3376_v46 = vpop.permute.xlu0 %3375  ;;  %v4055_v9 = vpop.permute.xlu1 %785 }
 0x174   : > { %v3377_v53 = vunpack.i.l.bf16 %v3376_v46  ;;  %v3378_v59 = vunpack.i.h.bf16 %v3376_v46 }
 0x176   : > { %v755_v61 = vsel %vm754_vm6, %v4030_v36, %v3377_v53  ;;  %v756_v6 = vsel %vm754_vm6, %v3377_v53, %v3378_v59  ;;  %v822_v17 = vpack.c.bf16 %v3378_v59, %v3368_v63 }
 0x177   : > { %v3381_v48 = vpop.permute.xlu0 %3380  ;;  %v820_v4 = vpack.c.bf16 %v755_v61, %v741_v1  ;;  %v821_v10 = vpack.c.bf16 %v756_v6, %v742_v8  ;;  %v4065_v25 = vpop.permute.xlu1 %797 }
 0x178   : > { %v3382_v50 = vunpack.i.l.bf16 %v3381_v48  ;;  %v3383_v5 = vunpack.i.h.bf16 %v3381_v48  ;;  %v801_v38 = vsel %vm799_vm10, %v3373_v15, %v4065_v25 }
 0x17a   : > { %v823_v52 = vpack.c.bf16 %v3382_v50, %v3362_v49  ;;  %v777_v13 = vsel %vm775_vm8, %v3383_v5, %v4034_v41  ;;  %v776_v22 = vsel %vm775_vm8, %v3382_v50, %v3383_v5 }
 0x17b   : > { %v3386_v54 = vpop.permute.xlu0 %3385  ;;  %v825_v16 = vpack.c.bf16 %v777_v13, %v3363_v14  ;;  %v824_v29 = vpack.c.bf16 %v776_v22, %v765_v27  ;;  %v4074_v34 = vpop.permute.xlu1 %809  ;;  %v3849_v27 = vmov 0.0|0.0  }
 0x17c   : > { %v3387_v56 = vunpack.i.l.bf16 %v3386_v54  ;;  %888 = vrot.lane.b32.xlu0 %v823_v52, %s5175_s20  ;;  %v3388_v12 = vunpack.i.h.bf16 %v3386_v54 }
 0x17e   : > { %v826_v58 = vpack.c.bf16 %v3372_v55, %v3387_v56  ;;  %v788_v19 = vsel %vm787_vm9, %v3387_v56, %v3388_v12  ;;  %v789_v33 = vsel %vm787_vm9, %v3388_v12, %v4055_v9 }
 0x17f   : > { %v3391_v60 = vpop.permute.xlu0 %3390  ;;  %v827_v28 = vpack.c.bf16 %v800_v26, %v788_v19  ;;  %v828_v40 = vpack.c.bf16 %v801_v38, %v789_v33 }
 0x180   : > { %v3392_v62 = vunpack.i.l.bf16 %v3391_v60  ;;  %894 = vrot.lane.b32.xlu1 %v826_v58, %s5175_s20  ;;  %v3393_v18 = vunpack.i.h.bf16 %v3391_v60 }
 0x182   : > { %v829_v3 = vpack.c.bf16 %v3392_v62, %v3392_v62  ;;  %v812_v32 = vsel %vm811_vm12, %v3392_v62, %v3393_v18  ;;  %v813_v42 = vsel %vm811_vm12, %v3393_v18, %v4074_v34 }
 0x183   : > { %v830_v39 = vpack.c.bf16 %v812_v32, %v812_v32  ;;  %v831_v44 = vpack.c.bf16 %v813_v42, %v813_v42 }
 0x184   : > { %900 = vrot.lane.b32.xlu0 %v829_v3, %s5175_s20  ;;  %882 = vrot.lane.b32.xlu1 %v820_v4, %s5175_s20 }
 0x188   : > { %884 = vrot.lane.b32.xlu1 %v821_v10, %s5175_s20  ;;  %878 = vrot.lane.b32.xlu0 %v818_v11, %s5175_s20  ;;  %v3796_v11 = vld [vmem:[%s5195_s3] sm:$0xff]  }
 0x18c   : > { %892 = vrot.lane.b32.xlu1 %v825_v16, %s5175_s20  ;;  %886 = vrot.lane.b32.xlu0 %v822_v17, %s5175_s20 }
 0x190   : > { %896 = vrot.lane.b32.xlu1 %v827_v28, %s5175_s20  ;;  %890 = vrot.lane.b32.xlu0 %v824_v29, %s5175_s20  ;;  %v3797_v28 = vld [vmem:[%s5186_s22 + $0x8] sm:$0xff]  }
 0x191   : > { %3255 = vmatmul.mubr.msk.bf16.gmra.mrb[4].mxu0 %vm625_vm0, %v3797_v28 }
 0x194   : > { %902 = vrot.lane.b32.xlu1 %v830_v39, %s5175_s20  ;;  %898 = vrot.lane.b32.xlu0 %v828_v40, %s5175_s20 }
 0x198   : > { %602 = vperm.xlu1 %3394, %v592_v43   ;;  %904 = vrot.lane.b32.xlu0 %v831_v44, %s5175_s20 }
 0x19c   : > { %845 = vperm.xlu0 %3353, %v836_v45  }
 0x1e2   : > { %v881_v46 = vpop.permute.xlu1 %880 }
 0x1e3   : > { %v877_v47 = vpop.permute.xlu0 %876 }
 0x1ee   : > { %v889_v48 = vpop.permute.xlu0 %888 }
 0x1f2   : > { %v895_v49 = vpop.permute.xlu1 %894 }
 0x1f6   : > { %v901_v50 = vpop.permute.xlu0 %900  ;;  %v883_v51 = vpop.permute.xlu1 %882 }
 0x1fa   : > { %v885_v52 = vpop.permute.xlu1 %884  ;;  %v879_v53 = vpop.permute.xlu0 %878 }
 0x1fb   : > { %v908_v54 = vsel %vm906_vm13, %v879_v53, %v881_v46  ;;  %v907_v55 = vsel %vm906_vm13, %v877_v47, %v879_v53  ;;  %v909_v59 = vsel %vm906_vm13, %v883_v51, %v885_v52 }
 0x1fc   : > { %939 = vmatprep.subr.bf16.mxu1 %v908_v54 }
 0x1fd   : > { %940 = vmatpush1.bf16.msra.mxu1 %v907_v55 }
 0x1fe   : > { %v893_v56 = vpop.permute.xlu1 %892  ;;  %v887_v57 = vpop.permute.xlu0 %886 }
 0x1ff   : > { %v910_v58 = vsel %vm906_vm13, %v885_v52, %v887_v57 }
 0x200   : > { %941 = vmatprep.subr.bf16.mxu1 %v910_v58 }
 0x201   : > { %942 = vmatpush1.bf16.msra.mxu1 %v909_v59 }
 0x202   : > { %v897_v60 = vpop.permute.xlu1 %896  ;;  %v891_v61 = vpop.permute.xlu0 %890 }
 0x203   : > { %v912_v62 = vsel %vm906_vm13, %v891_v61, %v893_v56  ;;  %v911_v63 = vsel %vm906_vm13, %v889_v48, %v891_v61  ;;  %v913_v5 = vsel %vm906_vm13, %v895_v49, %v897_v60 }
 0x204   : > { %943 = vmatprep.subr.bf16.mxu1 %v912_v62 }
 0x205   : > { %944 = vmatpush1.bf16.msra.mxu1 %v911_v63 }
 0x206   : > { %v903_v1 = vpop.permute.xlu1 %902  ;;  %v899_v3 = vpop.permute.xlu0 %898 }
 0x207   : > { %v914_v4 = vsel %vm906_vm13, %v897_v60, %v899_v3  ;;  %v915_v6 = vsel %vm906_vm13, %v901_v50, %v903_v1 }
 0x208   : > { %945 = vmatprep.subr.bf16.mxu1 %v914_v4  ;;  %v934_v10 = vsel %vm932_vm14, %v915_v6, 0 }
 0x209   : > { %946 = vmatpush1.bf16.msra.mxu1 %v913_v5 }
 0x20a   : > { %v905_v7 = vpop.permute.xlu0 %904 }
 0x20b   : > { %v916_v8 = vsel %vm906_vm13, %v903_v1, %v905_v7 }
 0x20c   : > { %3258 = vmatprep.subr.msk.bf16.mxu1 %vm932_vm14, %v916_v8  ;;  %vm2188_vm14 = vcmask 261120  }
 0x20d   : > { %948 = vmatpush1.bf16.msra.mxu1 %v934_v10 }
 0x210   : > { %3259 = vmatmul.mubr.msk.bf16.vlgmr.msra.gmra.mrb[0].mxu1 %vm925_vm15, %v3796_v11 }
 0x211   : > { %981 = vmatprep.mubr.bf16.mxu1 %v3838_v0 }
 0x217   : > { %v603_v12 = vpop.permute.xlu1 %602 }
 0x218   : > { %v671_v13 = vadd.f32 %v3983_v20, %v603_v12  ;;  %v673_v14 = vadd.f32 %v3989_v23, %v603_v12 }
 0x21a   : > { %v687_v15 = vmax.f32 %v671_v13, 0.0  ;;  %v688_v16 = vmax.f32 %v673_v14, 0.0 }
 0x21b   : > { %v846_v33 = vpop.permute.xlu0 %845 }
 0x21c   : > { %v3395_v17 = vpack.i.bf16 %v688_v16, %v687_v15  ;;  %v711_v18 = vsel %vm3985_vm1, %v687_v15, 0.0  ;;  %v712_v19 = vsel %vm3991_vm2, %v688_v16, 0.0  ;;  %v699_v26 = vsel %vm4001_vm3, %v687_v15, 0.0 }
 0x21d   : > { %v3400_v22 = vpack.i.bf16 %v712_v19, %v711_v18  ;;  %v700_v20 = vsel %vm4005_vm4, %v688_v16, 0.0 }
 0x21e   : > { %3396 = vrot.lane.b32.xlu1 %v3395_v17, %s5173_s28  ;;  %v3405_v23 = vpack.i.bf16 %v700_v20, %v699_v26 }
 0x222   : > { %3401 = vrot.lane.b32.xlu1 %v3400_v22, %s5171_s1 }
 0x226   : > { %3406 = vrot.lane.b32.xlu1 %v3405_v23, %s5169_s26 }
 0x22a   : > { %3411 = vrot.lane.b32.xlu1 %v3395_v17, %s5167_s27 }
 0x22e   : > { %3436 = vrot.lane.b32.xlu1 %v3400_v22, %s5165_s23 }
 0x232   : > { %3441 = vrot.lane.b32.xlu1 %v3405_v23, %s5163_s30 }
 0x236   : > { %3446 = vrot.lane.b32.xlu1 %v3395_v17, %s5196_s18 }
 0x23a   : > { %3466 = vrot.lane.b32.xlu1 %v3400_v22, %s5197_s21 }
 0x23e   : > { %1244 = vrot.lane.b32.xlu1 %v3849_v27, %s5175_s20 }
 0x290   : > { %v3397_v54 = vpop.permute.xlu1 %3396 }
 0x291   : > { %v3398_v58 = vunpack.i.l.bf16 %v3397_v54  ;;  %v3399_v60 = vunpack.i.h.bf16 %v3397_v54 }
 0x293   : > { %v1006_v4 = vsel %vm726_vm5, %v4028_v35, %v3398_v58 }
 0x294   : > { %v3402_v55 = vpop.permute.xlu1 %3401 }
 0x295   : > { %v3403_v63 = vunpack.i.l.bf16 %v3402_v55  ;;  %v3404_v28 = vunpack.i.h.bf16 %v3402_v55 }
 0x297   : > { %v1028_v10 = vsel %vm740_vm7, %v4032_v37, %v3403_v63 }
 0x298   : > { %v4152_v56 = vpop.permute.xlu1 %3406 }
 0x299   : > { %v3409_v14 = vunpack.i.h.bf16 %v4152_v56 }
 0x29c   : > { %v3412_v57 = vpop.permute.xlu1 %3411 }
 0x29d   : > { %v3414_v17 = vunpack.i.h.bf16 %v3412_v57  ;;  %v3413_v18 = vunpack.i.l.bf16 %v3412_v57 }
 0x2a0   : > { %v4154_v1 = vpop.permute.xlu1 %3436 }
 0x2a4   : > { %v4169_v15 = vpop.permute.xlu1 %3441 }
 0x2e3   : > { %v4130_v29 = vpop.f32.mrb[0].mxu1 }
 0x2e4   : > { %v4132_v32 = vpop.f32.mrb[1].mxu1 }
 0x2e5   : > { %v977_v38 = vpop.f32.mrb[2].mxu1 }
 0x2e6   : > { %v978_v39 = vadd.f32 %v977_v38, %v846_v33  ;;  %v979_v40 = vpop.f32.mrb[3].mxu1 }
 0x2e7   : > { %v980_v42 = vadd.f32 %v979_v40, %v846_v33  ;;  %v4176_v33 = vpop.permute.xlu1 %3446 }
 0x2e8   : > { %v992_v43 = vmax.f32 %v978_v39, 0.0  ;;  %v1070_v39 = vsel %vm764_vm11, %v3413_v18, %v3414_v17 }
 0x2e9   : > { %v993_v44 = vmax.f32 %v980_v42, 0.0 }
 0x2ea   : > { %v996_v45 = vsel %vm4001_vm3, %v992_v43, 0.0  ;;  %v998_v46 = vsel %vm3985_vm1, %v992_v43, 0.0 }
 0x2eb   : > { %v3415_v47 = vpack.i.bf16 %v993_v44, %v992_v43  ;;  %v1155_v48 = vpack.c.bf16 %v996_v45, %v699_v26  ;;  %v999_v49 = vsel %vm3991_vm2, %v993_v44, 0.0  ;;  %v997_v50 = vsel %vm4005_vm4, %v993_v44, 0.0 }
 0x2ec   : > { %v3420_v51 = vpack.i.bf16 %v999_v49, %v998_v46  ;;  %v3425_v52 = vpack.i.bf16 %v997_v50, %v996_v45  ;;  %v1156_v53 = vpack.c.bf16 %v997_v50, %v700_v20  ;;  %v1007_v46 = vsel %vm726_vm5, %v3398_v58, %v3399_v60 }
 0x2ed   : > { %3416 = vrot.lane.b32.xlu0 %v3415_v47, %s5173_s28  ;;  %1246 = vrot.lane.b32.xlu1 %v1155_v48, %s5175_s20  ;;  %v1029_v48 = vsel %vm740_vm7, %v3403_v63, %v3404_v28 }
 0x2f1   : > { %3421 = vrot.lane.b32.xlu0 %v3420_v51, %s5171_s1 }
 0x2f5   : > { %3426 = vrot.lane.b32.xlu0 %v3425_v52, %s5169_s26 }
 0x2f9   : > { %3431 = vrot.lane.b32.xlu0 %v3415_v47, %s5167_s27 }
 0x2fd   : > { %3451 = vrot.lane.b32.xlu0 %v3420_v51, %s5165_s23  ;;  %s5202_s23 = smov 112  }
 0x301   : > { %3456 = vrot.lane.b32.xlu0 %v3425_v52, %s5163_s30  ;;  %v4191_v52 = vpop.permute.xlu1 %3466  ;;  %s5203_s30 = smov 111  }
 0x305   : > { %3461 = vrot.lane.b32.xlu0 %v3415_v47, %s5196_s18 }
 0x309   : > { %3471 = vrot.lane.b32.xlu0 %v3420_v51, %s5197_s21 }
 0x30d   : > { %1248 = vrot.lane.b32.xlu0 %v1156_v53, %s5175_s20  ;;  %v3408_v53 = vunpack.i.l.bf16 %v4152_v56  ;;  %v3798_v56 = vld [vmem:[%s5195_s3 + $0x8] ss:$0 sps:$4 sm:$0xff]   ;;  %s5206_s3 = smov 126  }
 0x30e   : > { %3260 = vmatmul.mubr.msk.bf16.gmra.mrb[4].mxu1 %vm925_vm15, %v3798_v56  ;;  %vm2291_vm15 = vcmask 64512  }
 0x30f   : > { %v1050_v63 = vsel %vm754_vm6, %v4030_v36, %v3408_v53 }
 0x35f   : > { %v3417_v59 = vpop.permute.xlu0 %3416 }
 0x360   : > { %v3419_v61 = vunpack.i.h.bf16 %v3417_v59  ;;  %v3418_v62 = vunpack.i.l.bf16 %v3417_v59 }
 0x362   : > { %v1159_v3 = vpack.c.bf16 %v3419_v61, %v3399_v60  ;;  %v1017_v5 = vsel %vm726_vm5, %v4028_v35, %v3418_v62  ;;  %v1018_v44 = vsel %vm726_vm5, %v3418_v62, %v3419_v61  ;;  %v4201_v60 = vpop.permute.xlu1 %1244  ;;  %v3443_v62 = vunpack.i.l.bf16 %v4169_v15 }
 0x363   : > { %v3422_v6 = vpop.permute.xlu0 %3421  ;;  %v1157_v7 = vpack.c.bf16 %v1017_v5, %v1006_v4  ;;  %v1158_v47 = vpack.c.bf16 %v1018_v44, %v1007_v46 }
 0x364   : > { %v3423_v8 = vunpack.i.l.bf16 %v3422_v6  ;;  %1254 = vrot.lane.b32.xlu1 %v1159_v3, %s5175_s20  ;;  %v3424_v26 = vunpack.i.h.bf16 %v3422_v6  ;;  %v3439_v3 = vunpack.i.h.bf16 %v4154_v1 }
 0x365   : > { %1250 = vrot.lane.b32.xlu0 %v1157_v7, %s5175_s20 }
 0x366   : > { %v1039_v11 = vsel %vm740_vm7, %v4032_v37, %v3423_v8  ;;  %v1040_v45 = vsel %vm740_vm7, %v3423_v8, %v3424_v26  ;;  %v1162_v54 = vpack.c.bf16 %v3424_v26, %v3404_v28  ;;  %v3438_v8 = vunpack.i.l.bf16 %v4154_v1 }
 0x367   : > { %v4166_v12 = vpop.permute.xlu0 %3426  ;;  %v1160_v13 = vpack.c.bf16 %v1039_v11, %v1028_v10  ;;  %v1161_v51 = vpack.c.bf16 %v1040_v45, %v1029_v48  ;;  %v3468_v48 = vunpack.i.l.bf16 %v4191_v52 }
 0x368   : > { %v3429_v16 = vunpack.i.h.bf16 %v4166_v12  ;;  %v3428_v49 = vunpack.i.l.bf16 %v4166_v12  ;;  %v3444_v12 = vunpack.i.h.bf16 %v4169_v15  ;;  %v3449_v15 = vunpack.i.h.bf16 %v4176_v33 }
 0x369   : > { %1256 = vrot.lane.b32.xlu1 %v1160_v13, %s5175_s20  ;;  %v1247_v13 = vpop.permute.xlu1 %1246 }
 0x36a   : > { %v1165_v19 = vpack.c.bf16 %v3429_v16, %v3409_v14  ;;  %v1061_v59 = vsel %vm754_vm6, %v4030_v36, %v3428_v49 }
 0x36b   : > { %v3432_v22 = vpop.permute.xlu0 %3431  ;;  %v1163_v5 = vpack.c.bf16 %v1061_v59, %v1050_v63 }
 0x36c   : > { %v3434_v20 = vunpack.i.h.bf16 %v3432_v22  ;;  %v3433_v23 = vunpack.i.l.bf16 %v3432_v22 }
 0x36d   : > { %1266 = vrot.lane.b32.xlu1 %v1165_v19, %s5175_s20 }
 0x36e   : > { %v1168_v38 = vpack.c.bf16 %v3434_v20, %v3414_v17  ;;  %v1078_v40 = vsel %vm764_vm11, %v3433_v23, %v3434_v20  ;;  %v1166_v58 = vpack.c.bf16 %v3433_v23, %v3413_v18  ;;  %v1087_v18 = vsel %vm775_vm8, %v3439_v3, %v4034_v41 }
 0x36f   : > { %v4180_v42 = vpop.permute.xlu0 %3451  ;;  %v1167_v43 = vpack.c.bf16 %v1078_v40, %v1070_v39  ;;  %v1062_v20 = vsel %vm754_vm6, %v3428_v49, %v3429_v16  ;;  %v1298_v39 = vsel %vm906_vm13, %v4201_v60, %v1247_v13  ;;  %v1051_v16 = vsel %vm754_vm6, %v3408_v53, %v3409_v14 }
 0x370   : > { %1272 = vrot.lane.b32.xlu0 %v1168_v38, %s5175_s20  ;;  %v3454_v61 = vunpack.i.h.bf16 %v4180_v42  ;;  %v3453_v4 = vunpack.i.l.bf16 %v4180_v42  ;;  %v3448_v38 = vunpack.i.l.bf16 %v4176_v33  ;;  %v1164_v40 = vpack.c.bf16 %v1062_v20, %v1051_v16 }
 0x371   : > { %1270 = vrot.lane.b32.xlu1 %v1167_v43, %s5175_s20  ;;  %v1104_v42 = vsel %vm787_vm9, %v3443_v62, %v3444_v12 }
 0x372   : > { %v1096_v11 = vsel %vm775_vm8, %v3454_v61, %v4034_v41  ;;  %v1169_v17 = vpack.c.bf16 %v3453_v4, %v3438_v8  ;;  %v1122_v14 = vsel %vm799_vm10, %v3448_v38, %v3449_v15  ;;  %v1095_v53 = vsel %vm775_vm8, %v3453_v4, %v3454_v61 }
 0x373   : > { %v4189_v50 = vpop.permute.xlu0 %3456  ;;  %v1171_v26 = vpack.c.bf16 %v1096_v11, %v1087_v18  ;;  %v1105_v61 = vsel %vm787_vm9, %v3444_v12, %v4055_v9  ;;  %v593_v12 = vld [vmem:[%s5184_s2 + $0x10] sm:$0xff] }
 0x374   : > { %1252 = vrot.lane.b32.xlu0 %v1158_v47, %s5175_s20  ;;  %v3458_v55 = vunpack.i.l.bf16 %v4189_v50  ;;  %v3459_v10 = vunpack.i.h.bf16 %v4189_v50  ;;  %v3469_v47 = vunpack.i.h.bf16 %v4191_v52  ;;  %v1123_v50 = vsel %vm799_vm10, %v3449_v15, %v4065_v25 }
 0x375   : > { %1258 = vrot.lane.b32.xlu1 %v1161_v51, %s5175_s20 }
 0x376   : > { %v1172_v7 = vpack.c.bf16 %v3458_v55, %v3443_v62  ;;  %v1113_v28 = vsel %vm787_vm9, %v3458_v55, %v3459_v10  ;;  %v1086_v55 = vsel %vm775_vm8, %v3438_v8, %v3439_v3  ;;  %v1144_v52 = vsel %vm811_vm12, %v3468_v48, %v3469_v47  ;;  %v3801_v62 = vld [vmem:[%s5198_s5 + $0x4] ss:$8 sps:$4 sm:$0xff]  }
 0x377   : > { %v4197_v57 = vpop.permute.xlu0 %3461  ;;  %v1173_v43 = vpack.c.bf16 %v1113_v28, %v1104_v42  ;;  %v1114_v59 = vsel %vm787_vm9, %v3459_v10, %v4055_v9  ;;  %3265 = vmatprep.mubr.msk.bf16.mxu1 %vm625_vm0, %v3801_v62  ;;  %v1145_v8 = vsel %vm811_vm12, %v3469_v47, %v4074_v34 }
 0x378   : > { %1260 = vrot.lane.b32.xlu0 %v1162_v54, %s5175_s20  ;;  %v3464_v19 = vunpack.i.h.bf16 %v4197_v57  ;;  %v3463_v1 = vunpack.i.l.bf16 %v4197_v57  ;;  %v1170_v57 = vpack.c.bf16 %v1095_v53, %v1086_v55  ;;  %v1174_v63 = vpack.c.bf16 %v1114_v59, %v1105_v61 }
 0x379   : > { %1268 = vrot.lane.b32.xlu1 %v1166_v58, %s5175_s20 }
 0x37a   : > { %v1131_v44 = vsel %vm799_vm10, %v3463_v1, %v3464_v19  ;;  %v1132_v46 = vsel %vm799_vm10, %v3464_v19, %v4065_v25  ;;  %v1175_v4 = vpack.c.bf16 %v3463_v1, %v3448_v38 }
 0x37b   : > { %v4211_v6 = vpop.permute.xlu0 %3471  ;;  %v1176_v49 = vpack.c.bf16 %v1131_v44, %v1122_v14  ;;  %v1177_v51 = vpack.c.bf16 %v1132_v46, %v1123_v50 }
 0x37c   : > { %1262 = vrot.lane.b32.xlu0 %v1163_v5, %s5175_s20  ;;  %v3474_v45 = vunpack.i.h.bf16 %v4211_v6  ;;  %v3473_v33 = vunpack.i.l.bf16 %v4211_v6  ;;  %v1185_v5 = vld [vmem:[%s5145_s6 + $0x8] sm:$0xff] }
 0x37d   : > { %1280 = vrot.lane.b32.xlu1 %v1172_v7, %s5175_s20  ;;  %v4277_v7 = vpop.f32.mrb[4].mxu0 }
 0x37e   : > { %v1146_v54 = vsel %vm811_vm12, %v3473_v33, %v3474_v45  ;;  %v1178_v3 = vpack.c.bf16 %v3473_v33, %v3468_v48  ;;  %v1147_v6 = vsel %vm811_vm12, %v3474_v45, %v4074_v34  ;;  %v4281_v10 = vpop.f32.mrb[5].mxu0 }
 0x37f   : > { %v1249_v22 = vpop.permute.xlu0 %1248  ;;  %v1179_v58 = vpack.c.bf16 %v1146_v54, %v1144_v52  ;;  %v1180_v11 = vpack.c.bf16 %v1147_v6, %v1145_v8 }
 0x380   : > { %1274 = vrot.lane.b32.xlu0 %v1169_v17, %s5175_s20  ;;  %v1299_v23 = vsel %vm906_vm13, %v1247_v13, %v1249_v22 }
 0x381   : > { %1278 = vrot.lane.b32.xlu1 %v1171_v26, %s5175_s20  ;;  %1340 = vmatprep.subr.bf16.mxu1 %v1299_v23 }
 0x382   : > { %1341 = vmatpush1.bf16.msra.mxu1 %v1298_v39 }
 0x384   : > { %1264 = vrot.lane.b32.xlu0 %v1164_v40, %s5175_s20 }
 0x385   : > { %1282 = vrot.lane.b32.xlu1 %v1173_v43, %s5175_s20 }
 0x388   : > { %1288 = vrot.lane.b32.xlu0 %v1176_v49, %s5175_s20 }
 0x389   : > { %1290 = vrot.lane.b32.xlu1 %v1177_v51, %s5175_s20 }
 0x38c   : > { %1276 = vrot.lane.b32.xlu0 %v1170_v57, %s5175_s20 }
 0x38d   : > { %1294 = vrot.lane.b32.xlu1 %v1179_v58, %s5175_s20 }
 0x390   : > { %1284 = vrot.lane.b32.xlu0 %v1174_v63, %s5175_s20 }
 0x391   : > { %1292 = vrot.lane.b32.xlu1 %v1178_v3, %s5175_s20 }
 0x394   : > { %1286 = vrot.lane.b32.xlu0 %v1175_v4, %s5175_s20 }
 0x395   : > { %1194 = vperm.xlu1 %3394, %v1185_v5   ;;  %v3799_v5 = vld [vmem:[%s5198_s5] ss:$8 sps:$4 sm:$0xff]  }
 0x398   : > { %1296 = vrot.lane.b32.xlu0 %v1180_v11, %s5175_s20 }
 0x39c   : > { %607 = vperm.xlu0 %3353, %v593_v12  }
 0x3d6   : > { %v1255_v13 = vpop.permute.xlu1 %1254 }
 0x3d7   : > { %v1251_v18 = vpop.permute.xlu0 %1250 }
 0x3db   : > { %v1257_v17 = vpop.permute.xlu1 %1256 }
 0x3df   : > { %v1267_v19 = vpop.permute.xlu1 %1266 }
 0x3e2   : > { %v1273_v1 = vpop.permute.xlu0 %1272 }
 0x3e3   : > { %v1271_v22 = vpop.permute.xlu1 %1270 }
 0x3e4   : > { %v1307_v14 = vsel %vm906_vm13, %v1271_v22, %v1273_v1 }
 0x3e6   : > { %v1253_v26 = vpop.permute.xlu0 %1252 }
 0x3e7   : > { %v1259_v20 = vpop.permute.xlu1 %1258  ;;  %v1301_v23 = vsel %vm906_vm13, %v1253_v26, %v1255_v13  ;;  %v1300_v28 = vsel %vm906_vm13, %v1251_v18, %v1253_v26  ;;  %v4324_v26 = vpop.f32.mrb[4].mxu1 }
 0x3e8   : > { %1342 = vmatprep.subr.bf16.mxu1 %v1301_v23  ;;  %v1302_v16 = vsel %vm906_vm13, %v1257_v17, %v1259_v20 }
 0x3e9   : > { %1343 = vmatpush1.bf16.msra.mxu1 %v1300_v28 }
 0x3ea   : > { %v1261_v15 = vpop.permute.xlu0 %1260 }
 0x3eb   : > { %v1269_v38 = vpop.permute.xlu1 %1268  ;;  %v1303_v39 = vsel %vm906_vm13, %v1259_v20, %v1261_v15  ;;  %v4326_v20 = vpop.f32.mrb[5].mxu1 }
 0x3ec   : > { %1344 = vmatprep.subr.bf16.mxu1 %v1303_v39  ;;  %v1306_v48 = vsel %vm906_vm13, %v1269_v38, %v1271_v22  ;;  %v987_v23 = vpop.f32.mrb[6].mxu1  ;;  %v4328_v15 = vpop.f32.mrb[6].mxu0 }
 0x3ed   : > { %1345 = vmatpush1.bf16.msra.mxu1 %v1302_v16  ;;  %v988_v28 = vpop.f32.mrb[7].mxu1  ;;  %v4330_v38 = vpop.f32.mrb[7].mxu0 }
 0x3ee   : > { %v1263_v40 = vpop.permute.xlu0 %1262 }
 0x3ef   : > { %v1281_v42 = vpop.permute.xlu1 %1280 }
 0x3f2   : > { %v1275_v43 = vpop.permute.xlu0 %1274 }
 0x3f3   : > { %v1279_v44 = vpop.permute.xlu1 %1278 }
 0x3f6   : > { %v1265_v45 = vpop.permute.xlu0 %1264 }
 0x3f7   : > { %v1283_v33 = vpop.permute.xlu1 %1282  ;;  %v1305_v46 = vsel %vm906_vm13, %v1265_v45, %v1267_v19  ;;  %v1304_v56 = vsel %vm906_vm13, %v1263_v40, %v1265_v45 }
 0x3f8   : > { %1346 = vmatprep.subr.bf16.mxu1 %v1305_v46  ;;  %v1310_v52 = vsel %vm906_vm13, %v1281_v42, %v1283_v33 }
 0x3f9   : > { %1347 = vmatpush1.bf16.msra.mxu1 %v1304_v56 }
 0x3fa   : > { %v1289_v47 = vpop.permute.xlu0 %1288  ;;  %1348 = vmatprep.subr.bf16.mxu1 %v1307_v14 }
 0x3fb   : > { %v1291_v49 = vpop.permute.xlu1 %1290 }
 0x3fc   : > { %v1313_v58 = vsel %vm906_vm13, %v1289_v47, %v1291_v49 }
 0x3fd   : > { %1349 = vmatpush1.bf16.msra.mxu1 %v1306_v48 }
 0x3fe   : > { %v1277_v50 = vpop.permute.xlu0 %1276 }
 0x3ff   : > { %v1309_v51 = vsel %vm906_vm13, %v1277_v50, %v1279_v44  ;;  %v1308_v53 = vsel %vm906_vm13, %v1275_v43, %v1277_v50  ;;  %v1295_v55 = vpop.permute.xlu1 %1294 }
 0x400   : > { %1350 = vmatprep.subr.bf16.mxu1 %v1309_v51 }
 0x401   : > { %1351 = vmatpush1.bf16.msra.mxu1 %v1308_v53 }
 0x402   : > { %v1285_v54 = vpop.permute.xlu0 %1284 }
 0x403   : > { %v1311_v57 = vsel %vm906_vm13, %v1283_v33, %v1285_v54  ;;  %v1293_v62 = vpop.permute.xlu1 %1292 }
 0x404   : > { %1352 = vmatprep.subr.bf16.mxu1 %v1311_v57  ;;  %v1314_v4 = vsel %vm906_vm13, %v1293_v62, %v1295_v55 }
 0x405   : > { %1353 = vmatpush1.bf16.msra.mxu1 %v1310_v52 }
 0x406   : > { %v1287_v59 = vpop.permute.xlu0 %1286  ;;  %1354 = vmatprep.subr.bf16.mxu1 %v1313_v58 }
 0x407   : > { %v1312_v61 = vsel %vm906_vm13, %v1287_v59, %v1289_v47 }
 0x409   : > { %1355 = vmatpush1.bf16.msra.mxu1 %v1312_v61 }
 0x40a   : > { %v1297_v63 = vpop.permute.xlu0 %1296 }
 0x40b   : > { %v1315_v3 = vsel %vm906_vm13, %v1295_v55, %v1297_v63 }
 0x40c   : > { %1356 = vmatprep.subr.bf16.mxu1 %v1315_v3 }
 0x40d   : > { %1357 = vmatpush1.bf16.msra.mxu1 %v1314_v4 }
 0x410   : > { %1373 = vmatmul.mubr.bf16.vlgmr.msra.gmra.mrb[8].mxu1 %v3799_v5 }
 0x414   : > { %v1195_v40 = vpop.permute.xlu1 %1194 }
 0x41b   : > { %v608_v6 = vpop.permute.xlu0 %607 }
 0x41c   : > { %v677_v8 = vadd.f32 %v4277_v7, %v608_v6  ;;  %v679_v11 = vadd.f32 %v4281_v10, %v608_v6 }
 0x41e   : > { %v689_v12 = vmax.f32 %v677_v8, 0.0  ;;  %v690_v13 = vmax.f32 %v679_v11, 0.0 }
 0x420   : > { %v3475_v17 = vpack.i.bf16 %v690_v13, %v689_v12  ;;  %v713_v18 = vsel %vm3985_vm1, %v689_v12, 0.0  ;;  %v714_v19 = vsel %vm3991_vm2, %v690_v13, 0.0  ;;  %v701_v22 = vsel %vm4001_vm3, %v689_v12, 0.0 }
 0x421   : > { %v3480_v1 = vpack.i.bf16 %v714_v19, %v713_v18  ;;  %v702_v7 = vsel %vm4005_vm4, %v690_v13, 0.0 }
 0x422   : > { %3476 = vrot.lane.b32.xlu0 %v3475_v17, %s5173_s28  ;;  %v3485_v10 = vpack.i.bf16 %v702_v7, %v701_v22 }
 0x426   : > { %3481 = vrot.lane.b32.xlu0 %v3480_v1, %s5171_s1 }
 0x42a   : > { %3486 = vrot.lane.b32.xlu0 %v3485_v10, %s5169_s26 }
 0x42e   : > { %3491 = vrot.lane.b32.xlu0 %v3475_v17, %s5167_s27 }
 0x432   : > { %3516 = vrot.lane.b32.xlu0 %v3480_v1, %s5199_s29 }
 0x436   : > { %3521 = vrot.lane.b32.xlu0 %v3485_v10, %s5200_s0 }
 0x43a   : > { %3526 = vrot.lane.b32.xlu0 %v3475_v17, %s5196_s18 }
 0x43e   : > { %3546 = vrot.lane.b32.xlu0 %v3480_v1, %s5197_s21 }
 0x494   : > { %v3477_v55 = vpop.permute.xlu0 %3476 }
 0x495   : > { %v3478_v58 = vunpack.i.l.bf16 %v3477_v55  ;;  %v3479_v61 = vunpack.i.h.bf16 %v3477_v55 }
 0x497   : > { %v1407_v6 = vsel %vm726_vm5, %v4028_v35, %v3478_v58 }
 0x498   : > { %v3482_v57 = vpop.permute.xlu0 %3481 }
 0x499   : > { %v3483_v3 = vunpack.i.l.bf16 %v3482_v57 }
 0x49b   : > { %v1429_v17 = vsel %vm740_vm7, %v4032_v37, %v3483_v3 }
 0x49c   : > { %v4354_v52 = vpop.permute.xlu0 %3486 }
 0x4a0   : > { %v3492_v4 = vpop.permute.xlu0 %3491 }
 0x4a1   : > { %v3494_v23 = vunpack.i.h.bf16 %v3492_v4  ;;  %v3493_v28 = vunpack.i.l.bf16 %v3492_v4 }
 0x4e3   : > { %v4332_v39 = vpop.f32.mrb[8].mxu1 }
 0x4e4   : > { %v4334_v16 = vpop.f32.mrb[9].mxu1 }
 0x4e5   : > { %v1378_v42 = vpop.f32.mrb[10].mxu1 }
 0x4e6   : > { %v1379_v43 = vadd.f32 %v1378_v42, %v1195_v40  ;;  %v1380_v44 = vpop.f32.mrb[11].mxu1 }
 0x4e7   : > { %v1381_v45 = vadd.f32 %v1380_v44, %v1195_v40 }
 0x4e8   : > { %v1393_v33 = vmax.f32 %v1379_v43, 0.0 }
 0x4e9   : > { %v1394_v46 = vmax.f32 %v1381_v45, 0.0 }
 0x4ea   : > { %v1397_v56 = vsel %vm4001_vm3, %v1393_v33, 0.0  ;;  %v1399_v14 = vsel %vm3985_vm1, %v1393_v33, 0.0 }
 0x4eb   : > { %v3495_v47 = vpack.i.bf16 %v1394_v46, %v1393_v33  ;;  %v1555_v48 = vpack.c.bf16 %v1397_v56, %v701_v22  ;;  %v1400_v49 = vsel %vm3991_vm2, %v1394_v46, 0.0  ;;  %v1398_v50 = vsel %vm4005_vm4, %v1394_v46, 0.0 }
 0x4ec   : > { %v3500_v51 = vpack.i.bf16 %v1400_v49, %v1399_v14  ;;  %v3505_v53 = vpack.i.bf16 %v1398_v50, %v1397_v56  ;;  %v1556_v54 = vpack.c.bf16 %v1398_v50, %v702_v7  ;;  %v3489_v22 = vunpack.i.h.bf16 %v4354_v52  ;;  %v4367_v7 = vpop.permute.xlu0 %3516 }
 0x4ed   : > { %3496 = vrot.lane.b32.xlu1 %v3495_v47, %s5173_s28  ;;  %1643 = vrot.lane.b32.xlu0 %v1555_v48, %s5175_s20  ;;  %v3484_v33 = vunpack.i.h.bf16 %v3482_v57  ;;  %v1471_v46 = vsel %vm764_vm11, %v3493_v28, %v3494_v23 }
 0x4f0   : > { %v4374_v56 = vpop.permute.xlu0 %3521 }
 0x4f1   : > { %3501 = vrot.lane.b32.xlu1 %v3500_v51, %s5171_s1 }
 0x4f5   : > { %3506 = vrot.lane.b32.xlu1 %v3505_v53, %s5169_s26 }
 0x4f9   : > { %3511 = vrot.lane.b32.xlu1 %v3495_v47, %s5167_s27  ;;  %s5208_s27 = sshll.u32 %s5210_s25, 5 }
 0x4fd   : > { %3531 = vrot.lane.b32.xlu1 %v3500_v51, %s5199_s29 }
 0x501   : > { %3536 = vrot.lane.b32.xlu1 %v3505_v53, %s5200_s0  ;;  %v1408_v53 = vsel %vm726_vm5, %v3478_v58, %v3479_v61 }
 0x505   : > { %3541 = vrot.lane.b32.xlu1 %v3495_v47, %s5196_s18 }
 0x509   : > { %3551 = vrot.lane.b32.xlu1 %v3500_v51, %s5197_s21 }
 0x50d   : > { %1645 = vrot.lane.b32.xlu1 %v1556_v54, %s5175_s20  ;;  %v1430_v54 = vsel %vm740_vm7, %v3483_v3, %v3484_v33 }
 0x55f   : > { %v3497_v59 = vpop.permute.xlu1 %3496 }
 0x560   : > { %v3499_v62 = vunpack.i.h.bf16 %v3497_v59  ;;  %v3498_v63 = vunpack.i.l.bf16 %v3497_v59 }
 0x562   : > { %v1559_v5 = vpack.c.bf16 %v3499_v62, %v3479_v61  ;;  %v1418_v8 = vsel %vm726_vm5, %v4028_v35, %v3498_v63  ;;  %v1419_v48 = vsel %vm726_vm5, %v3498_v63, %v3499_v62  ;;  %v3488_v62 = vunpack.i.l.bf16 %v4354_v52 }
 0x563   : > { %v3502_v11 = vpop.permute.xlu1 %3501  ;;  %v1557_v12 = vpack.c.bf16 %v1418_v8, %v1407_v6  ;;  %v1558_v55 = vpack.c.bf16 %v1419_v48, %v1408_v53 }
 0x564   : > { %v3503_v13 = vunpack.i.l.bf16 %v3502_v11  ;;  %1651 = vrot.lane.b32.xlu1 %v1559_v5, %s5175_s20  ;;  %v3504_v43 = vunpack.i.h.bf16 %v3502_v11  ;;  %v4387_v5 = vpop.permute.xlu0 %3526  ;;  %v1451_v11 = vsel %vm754_vm6, %v4030_v36, %v3488_v62 }
 0x565   : > { %1647 = vrot.lane.b32.xlu0 %v1557_v12, %s5175_s20  ;;  %v3523_v12 = vunpack.i.l.bf16 %v4374_v56 }
 0x566   : > { %v1440_v18 = vsel %vm740_vm7, %v4032_v37, %v3503_v13  ;;  %v1441_v51 = vsel %vm740_vm7, %v3503_v13, %v3504_v43  ;;  %v1562_v63 = vpack.c.bf16 %v3504_v43, %v3484_v33  ;;  %v3519_v13 = vunpack.i.h.bf16 %v4367_v7 }
 0x567   : > { %v3507_v19 = vpop.permute.xlu1 %3506  ;;  %v1560_v1 = vpack.c.bf16 %v1440_v18, %v1429_v17  ;;  %v1561_v4 = vpack.c.bf16 %v1441_v51, %v1430_v54  ;;  %v3529_v51 = vunpack.i.h.bf16 %v4387_v5 }
 0x568   : > { %v3509_v10 = vunpack.i.h.bf16 %v3507_v19  ;;  %v3508_v57 = vunpack.i.l.bf16 %v3507_v19  ;;  %v4404_v17 = vpop.permute.xlu0 %3546  ;;  %v1488_v43 = vsel %vm775_vm8, %v3519_v13, %v4034_v41 }
 0x569   : > { %1653 = vrot.lane.b32.xlu1 %v1560_v1, %s5175_s20 }
 0x56a   : > { %v1565_v40 = vpack.c.bf16 %v3509_v10, %v3489_v22  ;;  %v1462_v58 = vsel %vm754_vm6, %v4030_v36, %v3508_v57 }
 0x56b   : > { %v3512_v42 = vpop.permute.xlu1 %3511  ;;  %v1563_v19 = vpack.c.bf16 %v1462_v58, %v1451_v11 }
 0x56c   : > { %v3514_v44 = vunpack.i.h.bf16 %v3512_v42  ;;  %v3513_v45 = vunpack.i.l.bf16 %v3512_v42 }
 0x56d   : > { %1663 = vrot.lane.b32.xlu1 %v1565_v40, %s5175_s20 }
 0x56e   : > { %v1568_v14 = vpack.c.bf16 %v3514_v44, %v3494_v23  ;;  %v1479_v47 = vsel %vm764_vm11, %v3513_v45, %v3514_v44  ;;  %v1566_v61 = vpack.c.bf16 %v3513_v45, %v3493_v28  ;;  %v3518_v28 = vunpack.i.l.bf16 %v4367_v7  ;;  %v1644_v45 = vpop.permute.xlu0 %1643 }
 0x56f   : > { %v4378_v49 = vpop.permute.xlu1 %3531  ;;  %v1567_v50 = vpack.c.bf16 %v1479_v47, %v1471_v46  ;;  %v3524_v44 = vunpack.i.h.bf16 %v4374_v56  ;;  %v1463_v46 = vsel %vm754_vm6, %v3508_v57, %v3509_v10  ;;  %v1452_v56 = vsel %vm754_vm6, %v3488_v62, %v3489_v22 }
 0x570   : > { %1669 = vrot.lane.b32.xlu0 %v1568_v14, %s5175_s20  ;;  %v3534_v8 = vunpack.i.h.bf16 %v4378_v49  ;;  %v3533_v18 = vunpack.i.l.bf16 %v4378_v49  ;;  %v3528_v10 = vunpack.i.l.bf16 %v4387_v5  ;;  %v1695_v53 = vsel %vm906_vm13, %v4201_v60, %v1644_v45 }
 0x571   : > { %1667 = vrot.lane.b32.xlu1 %v1567_v50, %s5175_s20  ;;  %v1505_v54 = vsel %vm787_vm9, %v3523_v12, %v3524_v44 }
 0x572   : > { %v1497_v40 = vsel %vm775_vm8, %v3534_v8, %v4034_v41  ;;  %v1569_v33 = vpack.c.bf16 %v3533_v18, %v3518_v28  ;;  %v1523_v58 = vsel %vm799_vm10, %v3528_v10, %v3529_v51 }
 0x573   : > { %v4385_v59 = vpop.permute.xlu1 %3536  ;;  %v1571_v48 = vpack.c.bf16 %v1497_v40, %v1488_v43 }
 0x574   : > { %1649 = vrot.lane.b32.xlu0 %v1558_v55, %s5175_s20  ;;  %v3538_v3 = vunpack.i.l.bf16 %v4385_v59  ;;  %v3539_v42 = vunpack.i.h.bf16 %v4385_v59  ;;  %v1564_v55 = vpack.c.bf16 %v1463_v46, %v1452_v56  ;;  %v1183_v59 = vld [vmem:[%s5198_s5 + $0x10] sm:$0xff] }
 0x575   : > { %1655 = vrot.lane.b32.xlu1 %v1561_v4, %s5175_s20  ;;  %v3264_v62 = vcombine.high %v1183_v59, %v1183_v59 }
 0x576   : > { %v1572_v1 = vpack.c.bf16 %v3538_v3, %v3523_v12  ;;  %v1514_v49 = vsel %vm787_vm9, %v3538_v3, %v3539_v42  ;;  %v3549_v3 = vunpack.i.h.bf16 %v4404_v17  ;;  %v1496_v12 = vsel %vm775_vm8, %v3533_v18, %v3534_v8 }
 0x577   : > { %v4395_v6 = vpop.permute.xlu1 %3541  ;;  %v1573_v22 = vpack.c.bf16 %v1514_v49, %v1505_v54  ;;  %3266 = vmatprep.mubr.msk.bf16.mxu1 %vm625_vm0, %v3264_v62  ;;  %v1506_v8 = vsel %vm787_vm9, %v3524_v44, %v4055_v9 }
 0x578   : > { %1657 = vrot.lane.b32.xlu0 %v1562_v63, %s5175_s20  ;;  %v3544_v7 = vunpack.i.h.bf16 %v4395_v6  ;;  %v3543_v14 = vunpack.i.l.bf16 %v4395_v6  ;;  %v3263_v63 = vcombine.low %v1183_v59, %v1183_v59  ;;  %v3548_v6 = vunpack.i.l.bf16 %v4404_v17 }
 0x579   : > { %1665 = vrot.lane.b32.xlu1 %v1566_v61, %s5175_s20  ;;  %v1524_v61 = vsel %vm799_vm10, %v3529_v51, %v4065_v25  ;;  %v1515_v17 = vsel %vm787_vm9, %v3539_v42, %v4055_v9  ;;  %v1546_v46 = vsel %vm811_vm12, %v3549_v3, %v4074_v34 }
 0x57a   : > { %v1533_v57 = vsel %vm799_vm10, %v3544_v7, %v4065_v25  ;;  %v1532_v52 = vsel %vm799_vm10, %v3543_v14, %v3544_v7  ;;  %1383 = vmatmul.mubr.bf16.gmra.mrb[12].mxu1 %v3263_v63  ;;  %v1545_v40 = vsel %vm811_vm12, %v3548_v6, %v3549_v3  ;;  %v1574_v18 = vpack.c.bf16 %v1515_v17, %v1506_v8 }
 0x57b   : > { %v4407_v23 = vpop.permute.xlu1 %3551  ;;  %v1576_v11 = vpack.c.bf16 %v1532_v52, %v1523_v58  ;;  %v1575_v42 = vpack.c.bf16 %v3543_v14, %v3528_v10  ;;  %v594_v14 = vld [vmem:[%s5184_s2 + $0x18] sm:$0xff]  ;;  %s5205_s2 = smov 127  }
 0x57c   : > { %1659 = vrot.lane.b32.xlu0 %v1563_v19, %s5175_s20  ;;  %v3554_v4 = vunpack.i.h.bf16 %v4407_v23  ;;  %v3553_v5 = vunpack.i.l.bf16 %v4407_v23  ;;  %v1577_v19 = vpack.c.bf16 %v1533_v57, %v1524_v61  ;;  %v1487_v23 = vsel %vm775_vm8, %v3518_v28, %v3519_v13  ;;  %v3806_v13 = vld [vmem:[%s5201_s7 + $0x4] ss:$8 sps:$4 sm:$0xff]  }
 0x57d   : > { %1677 = vrot.lane.b32.xlu1 %v1572_v1, %s5175_s20  ;;  %v1570_v43 = vpack.c.bf16 %v1496_v12, %v1487_v23  ;;  %3271 = vmatprep.mubr.msk.bf16.mxu1 %vm625_vm0, %v3806_v13 }
 0x57e   : > { %v1547_v1 = vsel %vm811_vm12, %v3553_v5, %v3554_v4  ;;  %v1578_v28 = vpack.c.bf16 %v3553_v5, %v3548_v6  ;;  %v1548_v44 = vsel %vm811_vm12, %v3554_v4, %v4074_v34 }
 0x57f   : > { %v1646_v47 = vpop.permute.xlu1 %1645  ;;  %v1580_v7 = vpack.c.bf16 %v1548_v44, %v1546_v46 }
 0x580   : > { %1671 = vrot.lane.b32.xlu0 %v1569_v33, %s5175_s20  ;;  %v1696_v50 = vsel %vm906_vm13, %v1644_v45, %v1646_v47  ;;  %v1579_v45 = vpack.c.bf16 %v1547_v1, %v1545_v40  ;;  %v1585_v33 = vld [vmem:[%s5147_s8 + $0x8] sm:$0xff] }
 0x581   : > { %1675 = vrot.lane.b32.xlu1 %v1571_v48, %s5175_s20  ;;  %1737 = vmatprep.subr.bf16.mxu1 %v1696_v50 }
 0x582   : > { %1738 = vmatpush1.bf16.msra.mxu1 %v1695_v53 }
 0x584   : > { %1661 = vrot.lane.b32.xlu0 %v1564_v55, %s5175_s20 }
 0x585   : > { %1679 = vrot.lane.b32.xlu1 %v1573_v22, %s5175_s20 }
 0x588   : > { %1685 = vrot.lane.b32.xlu0 %v1576_v11, %s5175_s20 }
 0x589   : > { %1687 = vrot.lane.b32.xlu1 %v1577_v19, %s5175_s20 }
 0x58c   : > { %1673 = vrot.lane.b32.xlu0 %v1570_v43, %s5175_s20 }
 0x58d   : > { %1691 = vrot.lane.b32.xlu1 %v1579_v45, %s5175_s20 }
 0x590   : > { %1681 = vrot.lane.b32.xlu0 %v1574_v18, %s5175_s20 }
 0x591   : > { %1689 = vrot.lane.b32.xlu1 %v1578_v28, %s5175_s20 }
 0x594   : > { %1683 = vrot.lane.b32.xlu0 %v1575_v42, %s5175_s20 }
 0x595   : > { %1594 = vperm.xlu1 %3394, %v1585_v33  }
 0x598   : > { %1693 = vrot.lane.b32.xlu0 %v1580_v7, %s5175_s20 }
 0x59c   : > { %612 = vperm.xlu0 %3353, %v594_v14   ;;  %v3804_v14 = vld [vmem:[%s5201_s7] ss:$8 sps:$4 sm:$0xff]  }
 0x5d6   : > { %v1652_v47 = vpop.permute.xlu1 %1651 }
 0x5d7   : > { %v1648_v49 = vpop.permute.xlu0 %1647 }
 0x5db   : > { %v1654_v48 = vpop.permute.xlu1 %1653 }
 0x5df   : > { %v1664_v50 = vpop.permute.xlu1 %1663 }
 0x5e2   : > { %v1670_v56 = vpop.permute.xlu0 %1669 }
 0x5e3   : > { %v1668_v51 = vpop.permute.xlu1 %1667 }
 0x5e4   : > { %v1704_v11 = vsel %vm906_vm13, %v1668_v51, %v1670_v56 }
 0x5e6   : > { %v1650_v10 = vpop.permute.xlu0 %1649 }
 0x5e7   : > { %v1656_v53 = vpop.permute.xlu1 %1655  ;;  %v1698_v54 = vsel %vm906_vm13, %v1650_v10, %v1652_v47  ;;  %v1697_v55 = vsel %vm906_vm13, %v1648_v49, %v1650_v10 }
 0x5e8   : > { %1739 = vmatprep.subr.bf16.mxu1 %v1698_v54  ;;  %v1699_v59 = vsel %vm906_vm13, %v1654_v48, %v1656_v53 }
 0x5e9   : > { %1740 = vmatpush1.bf16.msra.mxu1 %v1697_v55 }
 0x5ea   : > { %v1658_v57 = vpop.permute.xlu0 %1657 }
 0x5eb   : > { %v1666_v52 = vpop.permute.xlu1 %1665  ;;  %v1700_v22 = vsel %vm906_vm13, %v1656_v53, %v1658_v57 }
 0x5ec   : > { %1741 = vmatprep.subr.bf16.mxu1 %v1700_v22  ;;  %v1703_v19 = vsel %vm906_vm13, %v1666_v52, %v1668_v51 }
 0x5ed   : > { %1742 = vmatpush1.bf16.msra.mxu1 %v1699_v59 }
 0x5ee   : > { %v1660_v4 = vpop.permute.xlu0 %1659 }
 0x5ef   : > { %v1678_v5 = vpop.permute.xlu1 %1677 }
 0x5f2   : > { %v1672_v62 = vpop.permute.xlu0 %1671 }
 0x5f3   : > { %v1676_v63 = vpop.permute.xlu1 %1675 }
 0x5f6   : > { %v1662_v58 = vpop.permute.xlu0 %1661 }
 0x5f7   : > { %v1680_v61 = vpop.permute.xlu1 %1679  ;;  %v1702_v3 = vsel %vm906_vm13, %v1662_v58, %v1664_v50  ;;  %v1701_v6 = vsel %vm906_vm13, %v1660_v4, %v1662_v58  ;;  %v1583_v4 = vld [vmem:[%s5201_s7 + $0x10] sm:$0xff] }
 0x5f8   : > { %1743 = vmatprep.subr.bf16.mxu1 %v1702_v3  ;;  %v1707_v13 = vsel %vm906_vm13, %v1678_v5, %v1680_v61  ;;  %v3270_v5 = vcombine.high %v1583_v4, %v1583_v4 }
 0x5f9   : > { %1744 = vmatpush1.bf16.msra.mxu1 %v1701_v6 }
 0x5fa   : > { %1745 = vmatprep.subr.bf16.mxu1 %v1704_v11  ;;  %v1686_v12 = vpop.permute.xlu0 %1685 }
 0x5fb   : > { %v1688_v1 = vpop.permute.xlu1 %1687 }
 0x5fc   : > { %v1710_v18 = vsel %vm906_vm13, %v1686_v12, %v1688_v1 }
 0x5fd   : > { %1746 = vmatpush1.bf16.msra.mxu1 %v1703_v19 }
 0x5fe   : > { %v1674_v23 = vpop.permute.xlu0 %1673 }
 0x5ff   : > { %v1706_v40 = vsel %vm906_vm13, %v1674_v23, %v1676_v63  ;;  %v1705_v43 = vsel %vm906_vm13, %v1672_v62, %v1674_v23  ;;  %v1692_v45 = vpop.permute.xlu1 %1691  ;;  %v3269_v62 = vcombine.low %v1583_v4, %v1583_v4 }
 0x600   : > { %1747 = vmatprep.subr.bf16.mxu1 %v1706_v40 }
 0x601   : > { %1748 = vmatpush1.bf16.msra.mxu1 %v1705_v43 }
 0x602   : > { %v1682_v17 = vpop.permute.xlu0 %1681 }
 0x603   : > { %v1708_v8 = vsel %vm906_vm13, %v1680_v61, %v1682_v17  ;;  %v1690_v33 = vpop.permute.xlu1 %1689 }
 0x604   : > { %1749 = vmatprep.subr.bf16.mxu1 %v1708_v8  ;;  %v1711_v7 = vsel %vm906_vm13, %v1690_v33, %v1692_v45 }
 0x605   : > { %1750 = vmatpush1.bf16.msra.mxu1 %v1707_v13 }
 0x606   : > { %1751 = vmatprep.subr.bf16.mxu1 %v1710_v18  ;;  %v1684_v28 = vpop.permute.xlu0 %1683 }
 0x607   : > { %v1709_v42 = vsel %vm906_vm13, %v1684_v28, %v1686_v12 }
 0x609   : > { %1752 = vmatpush1.bf16.msra.mxu1 %v1709_v42 }
 0x60a   : > { %v1694_v44 = vpop.permute.xlu0 %1693 }
 0x60b   : > { %v1712_v46 = vsel %vm906_vm13, %v1692_v45, %v1694_v44 }
 0x60c   : > { %1753 = vmatprep.subr.bf16.mxu1 %v1712_v46 }
 0x60d   : > { %1754 = vmatpush1.bf16.msra.mxu1 %v1711_v7 }
 0x60e   : > { %3318 = vmatprep.subr.bf16.mxu1 %v3849_v27 }
 0x610   : > { %1770 = vmatmul.mubr.bf16.vlgmr.msra.gmra.mrb[16].mxu1 %v3804_v14 }
 0x611   : > { %3272 = vmatprep.mubr.msk.bf16.mxu1 %vm625_vm0, %v3270_v5 }
 0x614   : > { %v1595_v61 = vpop.permute.xlu1 %1594 }
 0x618   : > { %1780 = vmatmul.mubr.bf16.gmra.mrb[20].mxu1 %v3269_v62 }
 0x61b   : > { %v613_v47 = vpop.permute.xlu0 %612 }
 0x61c   : > { %v681_v48 = vadd.f32 %v4328_v15, %v613_v47  ;;  %v683_v49 = vadd.f32 %v4330_v38, %v613_v47 }
 0x61e   : > { %v691_v50 = vmax.f32 %v681_v48, 0.0  ;;  %v692_v56 = vmax.f32 %v683_v49, 0.0 }
 0x620   : > { %v3555_v51 = vpack.i.bf16 %v692_v56, %v691_v50  ;;  %v715_v10 = vsel %vm3985_vm1, %v691_v50, 0.0  ;;  %v716_v53 = vsel %vm3991_vm2, %v692_v56, 0.0  ;;  %v703_v55 = vsel %vm4001_vm3, %v691_v50, 0.0 }
 0x621   : > { %v3560_v54 = vpack.i.bf16 %v716_v53, %v715_v10  ;;  %v704_v15 = vsel %vm4005_vm4, %v692_v56, 0.0 }
 0x622   : > { %3556 = vrot.lane.b32.xlu0 %v3555_v51, %s5173_s28  ;;  %v3565_v38 = vpack.i.bf16 %v704_v15, %v703_v55 }
 0x626   : > { %3561 = vrot.lane.b32.xlu0 %v3560_v54, %s5171_s1 }
 0x62a   : > { %3566 = vrot.lane.b32.xlu0 %v3565_v38, %s5202_s23 }
 0x62e   : > { %3571 = vrot.lane.b32.xlu0 %v3555_v51, %s5203_s30 }
 0x632   : > { %3596 = vrot.lane.b32.xlu0 %v3560_v54, %s5199_s29 }
 0x636   : > { %3601 = vrot.lane.b32.xlu0 %v3565_v38, %s5200_s0 }
 0x63a   : > { %3606 = vrot.lane.b32.xlu0 %v3555_v51, %s5196_s18 }
 0x63e   : > { %3626 = vrot.lane.b32.xlu0 %v3560_v54, %s5197_s21 }
 0x64d   : > { %v4517_v57 = vpop.f32.mrb[12].mxu1 }
 0x64e   : > { %v4519_v52 = vpop.f32.mrb[13].mxu1 }
 0x64f   : > { %v1388_v22 = vpop.f32.mrb[14].mxu1 }
 0x650   : > { %v1389_v59 = vpop.f32.mrb[15].mxu1 }
 0x694   : > { %v3557_v42 = vpop.permute.xlu0 %3556 }
 0x695   : > { %v3558_v46 = vunpack.i.l.bf16 %v3557_v42  ;;  %v3559_v14 = vunpack.i.h.bf16 %v3557_v42 }
 0x697   : > { %v1804_v49 = vsel %vm726_vm5, %v4028_v35, %v3558_v46  ;;  %v1805_v42 = vsel %vm726_vm5, %v3558_v46, %v3559_v14 }
 0x698   : > { %v3562_v33 = vpop.permute.xlu0 %3561 }
 0x699   : > { %v3563_v50 = vunpack.i.l.bf16 %v3562_v33 }
 0x69c   : > { %v4547_v44 = vpop.permute.xlu0 %3566 }
 0x69d   : > { %v3569_v4 = vunpack.i.h.bf16 %v4547_v44 }
 0x6a0   : > { %v3572_v56 = vpop.permute.xlu0 %3571 }
 0x6a4   : > { %v4560_v5 = vpop.permute.xlu0 %3596 }
 0x6e3   : > { %v4525_v63 = vpop.f32.mrb[16].mxu1 }
 0x6e4   : > { %v4527_v58 = vpop.f32.mrb[17].mxu1 }
 0x6e5   : > { %v1775_v3 = vpop.f32.mrb[18].mxu1 }
 0x6e6   : > { %v1776_v6 = vadd.f32 %v1775_v3, %v1595_v61  ;;  %v1777_v11 = vpop.f32.mrb[19].mxu1  ;;  %v3573_v3 = vunpack.i.l.bf16 %v3572_v56 }
 0x6e7   : > { %v1778_v12 = vadd.f32 %v1777_v11, %v1595_v61  ;;  %v3574_v61 = vunpack.i.h.bf16 %v3572_v56 }
 0x6e8   : > { %v1790_v19 = vmax.f32 %v1776_v6, 0.0 }
 0x6e9   : > { %v1791_v1 = vmax.f32 %v1778_v12, 0.0 }
 0x6ea   : > { %v1794_v23 = vsel %vm4001_vm3, %v1790_v19, 0.0  ;;  %v1796_v40 = vsel %vm3985_vm1, %v1790_v19, 0.0 }
 0x6eb   : > { %v3575_v43 = vpack.i.bf16 %v1791_v1, %v1790_v19  ;;  %v1952_v17 = vpack.c.bf16 %v1794_v23, %v703_v55  ;;  %v1797_v45 = vsel %vm3991_vm2, %v1791_v1, 0.0  ;;  %v1795_v8 = vsel %vm4005_vm4, %v1791_v1, 0.0 }
 0x6ec   : > { %v3580_v13 = vpack.i.bf16 %v1797_v45, %v1796_v40  ;;  %v3585_v18 = vpack.i.bf16 %v1795_v8, %v1794_v23  ;;  %v1953_v28 = vpack.c.bf16 %v1795_v8, %v704_v15  ;;  %v1826_v15 = vsel %vm740_vm7, %v4032_v37, %v3563_v50 }
 0x6ed   : > { %3576 = vrot.lane.b32.xlu1 %v3575_v43, %s5173_s28  ;;  %2027 = vrot.lane.b32.xlu0 %v1952_v17, %s5175_s20  ;;  %v3564_v23 = vunpack.i.h.bf16 %v3562_v33  ;;  %v1868_v40 = vsel %vm764_vm11, %v3573_v3, %v3574_v61 }
 0x6ef   : > { %v1827_v33 = vsel %vm740_vm7, %v3563_v50, %v3564_v23 }
 0x6f1   : > { %3581 = vrot.lane.b32.xlu1 %v3580_v13, %s5171_s1 }
 0x6f5   : > { %3586 = vrot.lane.b32.xlu1 %v3585_v18, %s5202_s23 }
 0x6f9   : > { %3591 = vrot.lane.b32.xlu1 %v3575_v43, %s5203_s30 }
 0x6fd   : > { %3611 = vrot.lane.b32.xlu1 %v3580_v13, %s5199_s29 }
 0x701   : > { %3616 = vrot.lane.b32.xlu1 %v3585_v18, %s5200_s0 }
 0x705   : > { %3621 = vrot.lane.b32.xlu1 %v3575_v43, %s5196_s18  ;;  %v4567_v43 = vpop.permute.xlu0 %3601 }
 0x709   : > { %3631 = vrot.lane.b32.xlu1 %v3580_v13, %s5197_s21 }
 0x70d   : > { %2029 = vrot.lane.b32.xlu1 %v1953_v28, %s5175_s20 }
 0x75f   : > { %v3577_v7 = vpop.permute.xlu1 %3576 }
 0x760   : > { %v3579_v47 = vunpack.i.h.bf16 %v3577_v7  ;;  %v3578_v48 = vunpack.i.l.bf16 %v3577_v7 }
 0x762   : > { %v1815_v51 = vsel %vm726_vm5, %v4028_v35, %v3578_v48  ;;  %v1956_v10 = vpack.c.bf16 %v3579_v47, %v3559_v14  ;;  %v1816_v8 = vsel %vm726_vm5, %v3578_v48, %v3579_v47  ;;  %v3568_v47 = vunpack.i.l.bf16 %v4547_v44 }
 0x763   : > { %v3582_v53 = vpop.permute.xlu1 %3581  ;;  %v1954_v54 = vpack.c.bf16 %v1815_v51, %v1804_v49  ;;  %v1955_v7 = vpack.c.bf16 %v1816_v8, %v1805_v42 }
 0x764   : > { %v3583_v55 = vunpack.i.l.bf16 %v3582_v53  ;;  %2035 = vrot.lane.b32.xlu1 %v1956_v10, %s5175_s20  ;;  %v3584_v12 = vunpack.i.h.bf16 %v3582_v53  ;;  %v4580_v10 = vpop.permute.xlu0 %3606 }
 0x765   : > { %2031 = vrot.lane.b32.xlu0 %v1954_v54, %s5175_s20 }
 0x766   : > { %v1837_v38 = vsel %vm740_vm7, %v4032_v37, %v3583_v55  ;;  %v1838_v28 = vsel %vm740_vm7, %v3583_v55, %v3584_v12  ;;  %v1959_v48 = vpack.c.bf16 %v3584_v12, %v3564_v23  ;;  %v1848_v55 = vsel %vm754_vm6, %v4030_v36, %v3568_v47 }
 0x767   : > { %v3587_v22 = vpop.permute.xlu1 %3586  ;;  %v1957_v59 = vpack.c.bf16 %v1837_v38, %v1826_v15  ;;  %v1958_v51 = vpack.c.bf16 %v1838_v28, %v1827_v33  ;;  %v3603_v15 = vunpack.i.l.bf16 %v4567_v43  ;;  %v3599_v38 = vunpack.i.h.bf16 %v4560_v5 }
 0x768   : > { %v3589_v62 = vunpack.i.h.bf16 %v3587_v22  ;;  %v3588_v49 = vunpack.i.l.bf16 %v3587_v22  ;;  %v4597_v22 = vpop.permute.xlu0 %3626  ;;  %v3604_v23 = vunpack.i.h.bf16 %v4567_v43  ;;  %v1849_v43 = vsel %vm754_vm6, %v3568_v47, %v3569_v4 }
 0x769   : > { %2037 = vrot.lane.b32.xlu1 %v1957_v59, %s5175_s20  ;;  %v3609_v33 = vunpack.i.h.bf16 %v4580_v10 }
 0x76a   : > { %v1962_v6 = vpack.c.bf16 %v3589_v62, %v3569_v4  ;;  %v1859_v46 = vsel %vm754_vm6, %v4030_v36, %v3588_v49 }
 0x76b   : > { %v3592_v11 = vpop.permute.xlu1 %3591 }
 0x76c   : > { %v3594_v19 = vunpack.i.h.bf16 %v3592_v11  ;;  %v3593_v1 = vunpack.i.l.bf16 %v3592_v11  ;;  %v3598_v11 = vunpack.i.l.bf16 %v4560_v5 }
 0x76d   : > { %2047 = vrot.lane.b32.xlu1 %v1962_v6, %s5175_s20 }
 0x76e   : > { %v1876_v17 = vsel %vm764_vm11, %v3593_v1, %v3594_v19  ;;  %v1965_v45 = vpack.c.bf16 %v3594_v19, %v3574_v61  ;;  %v1963_v14 = vpack.c.bf16 %v3593_v1, %v3573_v3  ;;  %v1960_v61 = vpack.c.bf16 %v1859_v46, %v1848_v55 }
 0x76f   : > { %v4571_v13 = vpop.permute.xlu1 %3611  ;;  %v1964_v18 = vpack.c.bf16 %v1876_v17, %v1868_v40  ;;  %v1885_v1 = vsel %vm775_vm8, %v3599_v38, %v4034_v41  ;;  %v2028_v40 = vpop.permute.xlu0 %2027  ;;  %v1921_v46 = vsel %vm799_vm10, %v3609_v33, %v4065_v25 }
 0x770   : > { %2053 = vrot.lane.b32.xlu0 %v1965_v45, %s5175_s20  ;;  %v3614_v54 = vunpack.i.h.bf16 %v4571_v13  ;;  %v3613_v59 = vunpack.i.l.bf16 %v4571_v13  ;;  %v1860_v45 = vsel %vm754_vm6, %v3588_v49, %v3589_v62  ;;  %v3608_v62 = vunpack.i.l.bf16 %v4580_v10 }
 0x771   : > { %2051 = vrot.lane.b32.xlu1 %v1964_v18, %s5175_s20  ;;  %v1902_v49 = vsel %vm787_vm9, %v3603_v15, %v3604_v23 }
 0x772   : > { %v1894_v12 = vsel %vm775_vm8, %v3614_v54, %v4034_v41  ;;  %v1966_v17 = vpack.c.bf16 %v3613_v59, %v3598_v11  ;;  %v1920_v10 = vsel %vm799_vm10, %v3608_v62, %v3609_v33  ;;  %v1893_v55 = vsel %vm775_vm8, %v3613_v59, %v3614_v54 }
 0x773   : > { %v4578_v56 = vpop.permute.xlu1 %3616  ;;  %v1968_v18 = vpack.c.bf16 %v1894_v12, %v1885_v1  ;;  %v1903_v54 = vsel %vm787_vm9, %v3604_v23, %v4055_v9 }
 0x774   : > { %2033 = vrot.lane.b32.xlu0 %v1955_v7, %s5175_s20  ;;  %v3618_v50 = vunpack.i.l.bf16 %v4578_v56  ;;  %v3619_v19 = vunpack.i.h.bf16 %v4578_v56  ;;  %v2079_v7 = vsel %vm906_vm13, %v4201_v60, %v2028_v40  ;;  %v1961_v56 = vpack.c.bf16 %v1860_v45, %v1849_v43 }
 0x775   : > { %2039 = vrot.lane.b32.xlu1 %v1958_v51, %s5175_s20 }
 0x776   : > { %v1969_v3 = vpack.c.bf16 %v3618_v50, %v3603_v15  ;;  %v1911_v28 = vsel %vm787_vm9, %v3618_v50, %v3619_v19  ;;  %v3628_v50 = vunpack.i.l.bf16 %v4597_v22  ;;  %v1912_v1 = vsel %vm787_vm9, %v3619_v19, %v4055_v9  ;;  %v1186_v19 = vld [vmem:[%s5145_s6 + $0x10] sm:$0xff] }
 0x777   : > { %v4588_v53 = vpop.permute.xlu1 %3621 }
 0x778   : > { %2041 = vrot.lane.b32.xlu0 %v1959_v48, %s5175_s20  ;;  %v3624_v5 = vunpack.i.h.bf16 %v4588_v53  ;;  %v3623_v8 = vunpack.i.l.bf16 %v4588_v53  ;;  %v1970_v48 = vpack.c.bf16 %v1911_v28, %v1902_v49 }
 0x779   : > { %2049 = vrot.lane.b32.xlu1 %v1963_v14, %s5175_s20  ;;  %v3629_v14 = vunpack.i.h.bf16 %v4597_v22  ;;  %v1971_v22 = vpack.c.bf16 %v1912_v1, %v1903_v54 }
 0x77a   : > { %v1929_v51 = vsel %vm799_vm10, %v3623_v8, %v3624_v5  ;;  %v1930_v44 = vsel %vm799_vm10, %v3624_v5, %v4065_v25  ;;  %v1981_v5 = vld [vmem:[%s5149_s10 + $0x8] sm:$0xff] }
 0x77b   : > { %v3632_v6 = vpop.permute.xlu1 %3631  ;;  %v1973_v53 = vpack.c.bf16 %v1929_v51, %v1920_v10  ;;  %v1974_v15 = vpack.c.bf16 %v1930_v44, %v1921_v46 }
 0x77c   : > { %2043 = vrot.lane.b32.xlu0 %v1960_v61, %s5175_s20  ;;  %v3634_v4 = vunpack.i.h.bf16 %v3632_v6  ;;  %v3633_v47 = vunpack.i.l.bf16 %v3632_v6  ;;  %v1942_v6 = vsel %vm811_vm12, %v3628_v50, %v3629_v14 }
 0x77d   : > { %2061 = vrot.lane.b32.xlu1 %v1969_v3, %s5175_s20  ;;  %v1884_v3 = vsel %vm775_vm8, %v3598_v11, %v3599_v38  ;;  %v3811_v38 = vld [vmem:[%s5204_s9 + $0x4] ss:$8 sps:$4 sm:$0xff]   ;;  %v1972_v11 = vpack.c.bf16 %v3623_v8, %v3608_v62  ;;  %v837_v8 = vld [vmem:[%s5143_s4 + $0x10] sm:$0xff] }
 0x77e   : > { %v1944_v61 = vsel %vm811_vm12, %v3633_v47, %v3634_v4  ;;  %v1967_v12 = vpack.c.bf16 %v1893_v55, %v1884_v3  ;;  %v1975_v59 = vpack.c.bf16 %v3633_v47, %v3628_v50  ;;  %3275 = vmatprep.mubr.msk.bf16.mxu0 %vm625_vm0, %v3811_v38  ;;  %v1945_v23 = vsel %vm811_vm12, %v3634_v4, %v4074_v34 }
 0x77f   : > { %v2030_v13 = vpop.permute.xlu1 %2029  ;;  %vm3850_vm0 = vmmov 0  }
 0x780   : > { %2055 = vrot.lane.b32.xlu0 %v1966_v17, %s5175_s20  ;;  %v2080_v42 = vsel %vm906_vm13, %v2028_v40, %v2030_v13  ;;  %v1976_v40 = vpack.c.bf16 %v1944_v61, %v1942_v6  ;;  %v1943_v17 = vsel %vm811_vm12, %v3629_v14, %v4074_v34  ;;  %v1586_v13 = vld [vmem:[%s5147_s8 + $0x10] sm:$0xff]  ;;  %3307 = vmatprep.mubr.msk.f32.mxu1 %vm3850_vm0, %v3839_v2 }
 0x781   : > { %2059 = vrot.lane.b32.xlu1 %v1968_v18, %s5175_s20  ;;  %2118 = vmatprep.subr.bf16.mxu0 %v2080_v42  ;;  %v1977_v45 = vpack.c.bf16 %v1945_v23, %v1943_v17  ;;  %v4670_v18 = vpop.f32.mrb[20].mxu1 }
 0x782   : > { %2119 = vmatpush1.bf16.msra.mxu0 %v2079_v7  ;;  %v4672_v28 = vpop.f32.mrb[21].mxu1 }
 0x783   : > { %v1785_v42 = vpop.f32.mrb[22].mxu1 }
 0x784   : > { %2045 = vrot.lane.b32.xlu0 %v1961_v56, %s5175_s20  ;;  %v1786_v43 = vpop.f32.mrb[23].mxu1 }
 0x785   : > { %2063 = vrot.lane.b32.xlu1 %v1970_v48, %s5175_s20 }
 0x788   : > { %2069 = vrot.lane.b32.xlu0 %v1973_v53, %s5175_s20 }
 0x789   : > { %2071 = vrot.lane.b32.xlu1 %v1974_v15, %s5175_s20 }
 0x78c   : > { %2057 = vrot.lane.b32.xlu0 %v1967_v12, %s5175_s20 }
 0x78d   : > { %2075 = vrot.lane.b32.xlu1 %v1976_v40, %s5175_s20 }
 0x790   : > { %2065 = vrot.lane.b32.xlu0 %v1971_v22, %s5175_s20 }
 0x791   : > { %2073 = vrot.lane.b32.xlu1 %v1975_v59, %s5175_s20 }
 0x794   : > { %2067 = vrot.lane.b32.xlu0 %v1972_v11, %s5175_s20 }
 0x795   : > { %1199 = vperm.xlu1 %3394, %v1186_v19  }
 0x798   : > { %2077 = vrot.lane.b32.xlu0 %v1977_v45, %s5175_s20 }
 0x799   : > { %1989 = vperm.xlu1 %3394, %v1981_v5  }
 0x79c   : > { %850 = vperm.xlu0 %3353, %v837_v8  }
 0x7a0   : > { %1599 = vperm.xlu0 %3353, %v1586_v13  }
 0x7d6   : > { %v2036_v33 = vpop.permute.xlu1 %2035 }
 0x7d7   : > { %v2032_v7 = vpop.permute.xlu0 %2031 }
 0x7db   : > { %v2038_v62 = vpop.permute.xlu1 %2037 }
 0x7df   : > { %v2048_v49 = vpop.permute.xlu1 %2047 }
 0x7e2   : > { %v2054_v56 = vpop.permute.xlu0 %2053 }
 0x7e3   : > { %v2052_v51 = vpop.permute.xlu1 %2051 }
 0x7e4   : > { %v2088_v40 = vsel %vm906_vm13, %v2052_v51, %v2054_v56 }
 0x7e6   : > { %v2034_v48 = vpop.permute.xlu0 %2033 }
 0x7e7   : > { %v2040_v44 = vpop.permute.xlu1 %2039  ;;  %v2082_v4 = vsel %vm906_vm13, %v2034_v48, %v2036_v33  ;;  %v2081_v47 = vsel %vm906_vm13, %v2032_v7, %v2034_v48 }
 0x7e8   : > { %2120 = vmatprep.subr.bf16.mxu0 %v2082_v4  ;;  %v2083_v50 = vsel %vm906_vm13, %v2038_v62, %v2040_v44 }
 0x7e9   : > { %2121 = vmatpush1.bf16.msra.mxu0 %v2081_v47 }
 0x7ea   : > { %v2042_v10 = vpop.permute.xlu0 %2041 }
 0x7eb   : > { %v2050_v46 = vpop.permute.xlu1 %2049  ;;  %v2084_v14 = vsel %vm906_vm13, %v2040_v44, %v2042_v10 }
 0x7ec   : > { %2122 = vmatprep.subr.bf16.mxu0 %v2084_v14  ;;  %v2087_v38 = vsel %vm906_vm13, %v2050_v46, %v2052_v51 }
 0x7ed   : > { %2123 = vmatpush1.bf16.msra.mxu0 %v2083_v50 }
 0x7ee   : > { %v2044_v53 = vpop.permute.xlu0 %2043 }
 0x7ef   : > { %v2062_v55 = vpop.permute.xlu1 %2061 }
 0x7f2   : > { %v2056_v15 = vpop.permute.xlu0 %2055 }
 0x7f3   : > { %v2060_v61 = vpop.permute.xlu1 %2059 }
 0x7f6   : > { %v2046_v3 = vpop.permute.xlu0 %2045 }
 0x7f7   : > { %v2064_v6 = vpop.permute.xlu1 %2063  ;;  %v2086_v12 = vsel %vm906_vm13, %v2046_v3, %v2048_v49  ;;  %v2085_v1 = vsel %vm906_vm13, %v2044_v53, %v2046_v3  ;;  %v3809_v49 = vld [vmem:[%s5204_s9] ss:$8 sps:$4 sm:$0xff]  }
 0x7f8   : > { %2124 = vmatprep.subr.bf16.mxu0 %v2086_v12  ;;  %v2091_v5 = vsel %vm906_vm13, %v2062_v55, %v2064_v6  ;;  %v2182_v12 = vld [vmem:[%s5151_s12] sm:$0xff] }
 0x7f9   : > { %2125 = vmatpush1.bf16.msra.mxu0 %v2085_v1 }
 0x7fa   : > { %2126 = vmatprep.subr.bf16.mxu0 %v2088_v40  ;;  %v2070_v54 = vpop.permute.xlu0 %2069 }
 0x7fb   : > { %v2072_v22 = vpop.permute.xlu1 %2071 }
 0x7fc   : > { %v2094_v8 = vsel %vm906_vm13, %v2070_v54, %v2072_v22 }
 0x7fd   : > { %2127 = vmatpush1.bf16.msra.mxu0 %v2087_v38 }
 0x7fe   : > { %v2058_v59 = vpop.permute.xlu0 %2057 }
 0x7ff   : > { %v2090_v11 = vsel %vm906_vm13, %v2058_v59, %v2060_v61  ;;  %v2089_v19 = vsel %vm906_vm13, %v2056_v15, %v2058_v59  ;;  %v2076_v17 = vpop.permute.xlu1 %2075 }
 0x800   : > { %2128 = vmatprep.subr.bf16.mxu0 %v2090_v11 }
 0x801   : > { %2129 = vmatpush1.bf16.msra.mxu0 %v2089_v19 }
 0x802   : > { %v2066_v23 = vpop.permute.xlu0 %2065 }
 0x803   : > { %v2092_v45 = vsel %vm906_vm13, %v2064_v6, %v2066_v23  ;;  %v2074_v43 = vpop.permute.xlu1 %2073 }
 0x804   : > { %2130 = vmatprep.subr.bf16.mxu0 %v2092_v45  ;;  %v2095_v7 = vsel %vm906_vm13, %v2074_v43, %v2076_v17  ;;  %v2267_v43 = vld [vmem:[%s5153_s14] sm:$0xff] }
 0x805   : > { %2131 = vmatpush1.bf16.msra.mxu0 %v2091_v5 }
 0x806   : > { %2132 = vmatprep.subr.bf16.mxu0 %v2094_v8  ;;  %v2068_v13 = vpop.permute.xlu0 %2067 }
 0x807   : > { %v2093_v42 = vsel %vm906_vm13, %v2068_v13, %v2070_v54 }
 0x809   : > { %2133 = vmatpush1.bf16.msra.mxu0 %v2093_v42 }
 0x80a   : > { %v2078_v33 = vpop.permute.xlu0 %2077 }
 0x80b   : > { %v2096_v62 = vsel %vm906_vm13, %v2076_v17, %v2078_v33  ;;  %v1184_v33 = vld [vmem:[%s5145_s6] sm:$0xff] }
 0x80c   : > { %2134 = vmatprep.subr.bf16.mxu0 %v2096_v62  ;;  %v1980_v62 = vld [vmem:[%s5149_s10] sm:$0xff] }
 0x80d   : > { %2135 = vmatpush1.bf16.msra.mxu0 %v2095_v7 }
 0x810   : > { %2151 = vmatmul.mubr.bf16.vlgmr.msra.gmra.mrb[8].mxu0 %v3809_v49 }
 0x814   : > { %v1200_v56 = vpop.permute.xlu1 %1199 }
 0x815   : > { %v1385_v51 = vadd.f32 %v4517_v57, %v1200_v56  ;;  %v1387_v48 = vadd.f32 %v4519_v52, %v1200_v56 }
 0x817   : > { %v1395_v44 = vmax.f32 %v1385_v51, 0.0  ;;  %v1396_v4 = vmax.f32 %v1387_v48, 0.0  ;;  %v2181_v48 = vld [vmem:[%s5150_s11] sm:$0xff] }
 0x818   : > { %v1990_v1 = vpop.permute.xlu1 %1989 }
 0x819   : > { %v2168_v47 = vadd.f32 %v1396_v4, %v1395_v44  ;;  %v2263_v44 = vld [vmem:[%s5152_s13] sm:$0xff] }
 0x81b   : > { %2169 = vadd.xlane.f32.xlu1 %v2168_v47  ;;  %v851_v10 = vpop.permute.xlu0 %850 }
 0x81c   : > { %v984_v46 = vadd.f32 %v4324_v26, %v851_v10  ;;  %v986_v14 = vadd.f32 %v4326_v20, %v851_v10  ;;  %v2268_v26 = vld [vmem:[%s5153_s14 + $0x8] sm:$0xff]  ;;  %v2269_v20 = vld [vmem:[%s5153_s14 + $0x10] sm:$0xff] }
 0x81e   : > { %v994_v50 = vmax.f32 %v984_v46, 0.0  ;;  %v995_v53 = vmax.f32 %v986_v14, 0.0 }
 0x81f   : > { %v1600_v55 = vpop.permute.xlu0 %1599 }
 0x820   : > { %v1782_v15 = vadd.f32 %v4670_v18, %v1600_v55  ;;  %v1784_v61 = vadd.f32 %v4672_v28, %v1600_v55  ;;  %v2165_v3 = vadd.f32 %v995_v53, %v994_v50  ;;  %v835_v18 = vld [vmem:[%s5143_s4] sm:$0xff]  ;;  %v2264_v50 = vld [vmem:[%s5152_s13 + $0x8] sm:$0xff]  ;;  %v2265_v53 = vld [vmem:[%s5152_s13 + $0x10] sm:$0xff] }
 0x821   : > { %v1584_v28 = vld [vmem:[%s5147_s8] sm:$0xff]  ;;  %v2266_v55 = vld [vmem:[%s5152_s13 + $0x18] sm:$0xff] }
 0x822   : > { %v1792_v57 = vmax.f32 %v1782_v15, 0.0  ;;  %v1793_v6 = vmax.f32 %v1784_v61, 0.0  ;;  %2166 = vadd.xlane.f32.xlu0 %v2165_v3 }
 0x824   : > { %v2171_v52 = vadd.f32 %v1793_v6, %v1792_v57 }
 0x826   : > { %2172 = vadd.xlane.f32.xlu0 %v2171_v52 }
 0x82c   : > { %2185 = vperm.xlu1 %3394, %v2182_v12  }
 0x830   : > { %2278 = vperm.xlu1 %3394, %v2268_v26  }
 0x834   : > { %2283 = vperm.xlu1 %3394, %v2269_v20  }
 0x838   : > { %840 = vperm.xlu1 %3394, %v835_v18  }
 0x83c   : > { %1589 = vperm.xlu1 %3394, %v1584_v28  }
 0x8a8   : > { %v2170_v40 = vpop.xlane.xlu1 %2169 }
 0x8a9   : > { %v2178_v38 = vmul.f32 0.00390625, %v2170_v40 }
 0x8ac   : > { %v2186_v4 = vpop.permute.xlu1 %2185 }
 0x8af   : > { %v2167_v54 = vpop.xlane.xlu0 %2166 }
 0x8b0   : > { %v2177_v22 = vmul.f32 0.00390625, %v2167_v54  ;;  %v2279_v61 = vpop.permute.xlu1 %2278 }
 0x8b2   : > { %v3319_v59 = vpack.c.bf16 %v2178_v38, %v2177_v22 }
 0x8b3   : > { %v2173_v7 = vpop.xlane.xlu0 %2172 }
 0x8b4   : > { %3320 = vmatpush3.bf16.msra.mxu1 %v3319_v59  ;;  %v2179_v56 = vmul.f32 0.00390625, %v2173_v7  ;;  %v2284_v18 = vpop.permute.xlu1 %2283 }
 0x8b5   : > { %3321 = vmatprep.subr.bf16.mxu1 %v3849_v27  ;;  %v2270_v27 = vld [vmem:[%s5153_s14 + $0x18] sm:$0xff] }
 0x8e3   : > { %v4715_v11 = vpop.f32.mrb[8].mxu0 }
 0x8e4   : > { %v4717_v19 = vpop.f32.mrb[9].mxu0 }
 0x8e5   : > { %v2156_v23 = vpop.f32.mrb[10].mxu0 }
 0x8e6   : > { %v2157_v17 = vadd.f32 %v2156_v23, %v1990_v1  ;;  %v2158_v45 = vpop.f32.mrb[11].mxu0 }
 0x8e7   : > { %v2159_v5 = vadd.f32 %v2158_v45, %v1990_v1 }
 0x8e8   : > { %v2163_v8 = vmax.f32 %v2157_v17, 0.0 }
 0x8e9   : > { %v2164_v13 = vmax.f32 %v2159_v5, 0.0 }
 0x8eb   : > { %v2174_v42 = vadd.f32 %v2164_v13, %v2163_v8 }
 0x8ed   : > { %2175 = vadd.xlane.f32.xlu0 %v2174_v42 }
 0x903   : > { %2273 = vperm.xlu0 %3353, %v2267_v43  }
 0x907   : > { %2288 = vperm.xlu0 %3353, %v2270_v27  }
 0x90b   : > { %1189 = vperm.xlu0 %3353, %v1184_v33  }
 0x90f   : > { %1984 = vperm.xlu0 %3353, %v1980_v62  }
 0x97a   : > { %v2176_v49 = vpop.xlane.xlu0 %2175 }
 0x97b   : > { %v2180_v2 = vmul.f32 0.00390625, %v2176_v49 }
 0x97d   : > { %v3322_v51 = vpack.c.bf16 %v2180_v2, %v2179_v56 }
 0x97f   : > { %3323 = vmatpush3.bf16.msra.mxu1 %v3322_v51 }
 0x982   : > { %3308 = vmatmul.mubr.msk.f32.vlgmr.msra.gmra.mrb[24].mxu1 %vm2188_vm14, %v2181_v48  ;;  %v2274_v15 = vpop.permute.xlu0 %2273 }
 0x983   : > { %3312 = vmatprep.mubr.msk.f32.mxu1 %vm2291_vm15, %v2263_v44 }
 0x986   : > { %v2289_v12 = vpop.permute.xlu0 %2288 }
 0xa55   : > { %v2258_v47 = vpop.f32.mrb[24].mxu1 }
 0xa56   : > { %v2259_v10 = vadd.f32 %v2258_v47, %v2186_v4  ;;  %v3309_v46 = vpop.f32.mrb[25].mxu1 }
 0xa58   : > { %v2262_v14 = vmax.f32 %v2259_v10, 0.0 }
 0xa5a   : > { %3310 = vmatprep.subr.mxu1 %v2262_v14 }
 0xa5b   : > { %3311 = vmatpush3.msra.mxu1 %v2262_v14 }
 0xa5c   : > { %3313 = vmatmul.mubr.msk.f32.vlgmr.msra.gmra.mrb[26].mxu1 %vm2291_vm15, %v2264_v50 }
 0xa5d   : > { %3315 = vmatprep.mubr.msk.f32.mxu1 %vm2291_vm15, %v2265_v53 }
 0xa60   : > { %3316 = vmatmul.mubr.msk.f32.gmra.mrb[28].mxu1 %vm2291_vm15, %v2266_v55 }
 0xb2f   : > { %v3314_v3 = vpop.f32.mrb[26].mxu1 }
 0xb30   : > { %v2376_v57 = vadd.f32 %v3314_v3, %v2279_v61  ;;  %v2370_v6 = vpop.f32.mrb[27].mxu1 }
 0xb31   : > { %v2371_v52 = vadd.f32 %v2370_v6, %v2274_v15  ;;  %v841_v6 = vpop.permute.xlu1 %840 }
 0xb33   : > { %v2389_v26 = vmax.f32 %v2371_v52, %v2376_v57  ;;  %v3317_v20 = vpop.f32.mrb[28].mxu1 }
 0xb34   : > { %v2386_v28 = vadd.f32 %v3317_v20, %v2289_v12  ;;  %v2380_v1 = vpop.f32.mrb[29].mxu1  ;;  %v974_v12 = vadd.f32 %v4130_v29, %v841_v6 }
 0xb35   : > { %v2381_v40 = vadd.f32 %v2380_v1, %v2284_v18  ;;  %v1590_v20 = vpop.permute.xlu1 %1589 }
 0xb37   : > { %v2390_v54 = vmax.f32 %v2381_v40, %v2386_v28 }
 0xb39   : > { %v2391_v38 = vmax.f32 %v2389_v26, %v2390_v54  ;;  %v976_v26 = vadd.f32 %v4132_v32, %v841_v6  ;;  %v1774_v54 = vadd.f32 %v4527_v58, %v1590_v20 }
 0xb3b   : > { %v2392_v22 = vrot.slane %v2391_v38, 4 }
 0xb3d   : > { %v2393_v59 = vmax.f32 %v2391_v38, %v2392_v22 }
 0xb3f   : > { %v2394_v23 = vrot.slane %v2393_v59, 2 }
 0xb41   : > { %v2395_v17 = vmax.f32 %v2393_v59, %v2394_v23  ;;  %v990_v59 = vmax.f32 %v974_v12, 0.0  ;;  %v991_v23 = vmax.f32 %v976_v26, 0.0 }
 0xb43   : > { %v2396_v45 = vrot.slane %v2395_v17, 1 }
 0xb45   : > { %v2397_v5 = vmax.f32 %v2395_v17, %v2396_v45 }
 0xb47   : > { %v2398_v8 = vsub.f32 %v2371_v52, %v2397_v5  ;;  %v2399_v13 = vsub.f32 %v2376_v57, %v2397_v5  ;;  %v2400_v42 = vsub.f32 %v2381_v40, %v2397_v5  ;;  %v2401_v43 = vsub.f32 %v2386_v28, %v2397_v5  ;;  %v1190_v52 = vpop.permute.xlu0 %1189 }
 0xb48   : > { %v1375_v18 = vadd.f32 %v4332_v39, %v1190_v52  ;;  %v1377_v28 = vadd.f32 %v4334_v16, %v1190_v52  ;;  %v1772_v40 = vadd.f32 %v4525_v63, %v1590_v20 }
 0xb49   : > { %v2402_v27 = vmul.f32 1.442695, %v2398_v8  ;;  %v2404_v33 = vmul.f32 1.442695, %v2399_v13  ;;  %v2406_v62 = vmul.f32 1.442695, %v2400_v42 }
 0xb4a   : > { %v2408_v7 = vmul.f32 1.442695, %v2401_v43  ;;  %v1391_v17 = vmax.f32 %v1375_v18, 0.0  ;;  %v1392_v29 = vmax.f32 %v1377_v28, 0.0  ;;  %v1788_v16 = vmax.f32 %v1772_v40, 0.0 }
 0xb4b   : > { %3816 = vpow2.f32 %v2402_v27  ;;  %v1985_v1 = vpop.permute.xlu0 %1984  ;;  %v1789_v42 = vmax.f32 %v1774_v54, 0.0 }
 0xb4c   : > { %3818 = vpow2.f32 %v2404_v33  ;;  %v2153_v38 = vadd.f32 %v4715_v11, %v1985_v1  ;;  %v2155_v22 = vadd.f32 %v4717_v19, %v1985_v1 }
 0xb4d   : > { %3820 = vpow2.f32 %v2406_v62 }
 0xb4e   : > { %3822 = vpow2.f32 %v2408_v7  ;;  %v2161_v43 = vmax.f32 %v2153_v38, 0.0  ;;  %v2162_v63 = vmax.f32 %v2155_v22, 0.0 }
 0xb55   : > { %v3817_v49 = vpop.eup %3816 }
 0xb56   : > { %v3819_v56 = vpop.eup %3818 }
 0xb57   : > { %v2410_v2 = vadd.f32 %v3819_v56, %v3817_v49  ;;  %v3821_v51 = vpop.eup %3820 }
 0xb58   : > { %v3823_v44 = vpop.eup %3822 }
 0xb59   : > { %v2411_v48 = vadd.f32 %v3821_v51, %v2410_v2 }
 0xb5b   : > { %v2412_v4 = vadd.f32 %v3823_v44, %v2411_v48 }
 0xb5d   : > { %v2413_v47 = vrot.slane %v2412_v4, 4 }
 0xb5f   : > { %v2414_v10 = vadd.f32 %v2413_v47, %v2412_v4 }
 0xb61   : > { %v2415_v46 = vrot.slane %v2414_v10, 2 }
 0xb63   : > { %v2416_v14 = vadd.f32 %v2415_v46, %v2414_v10 }
 0xb65   : > { %v2417_v50 = vrot.slane %v2416_v14, 1 }
 0xb67   : > { %v2418_v53 = vadd.f32 %v2417_v50, %v2416_v14 }
 0xb69   : > { %3824 = vrcp.f32 %v2418_v53 }
 0xb73   : > { %v3825_v55 = vpop.eup %3824 }
 0xb74   : > { %v2421_v15 = vmul.f32 %v3825_v55, %v3819_v56  ;;  %v2420_v61 = vmul.f32 %v3825_v55, %v3817_v49  ;;  %v2423_v3 = vmul.f32 %v3825_v55, %v3823_v44  ;;  %v2422_v57 = vmul.f32 %v3825_v55, %v3821_v51 }
 0xb76   : > { %2431 = vperm.xlu0 %3353, %v2421_v15   ;;  %2426 = vperm.xlu1 %3394, %v2420_v61  }
 0xb7a   : > { %2441 = vperm.xlu0 %3353, %v2423_v3   ;;  %2436 = vperm.xlu1 %3394, %v2422_v57  }
 0xbf5   : > { %v2427_v45 = vpop.permute.xlu1 %2426  ;;  %v2432_v32 = vpop.permute.xlu0 %2431 }
 0xbf6   : > { %v2444_v5 = vmul.f32 %v2427_v45, %v990_v59  ;;  %v2445_v8 = vmul.f32 %v2427_v45, %v991_v23  ;;  %v2446_v39 = vmul.f32 %v2432_v32, %v1391_v17  ;;  %v2447_v13 = vmul.f32 %v2432_v32, %v1392_v29 }
 0xbf8   : > { %v3635_v27 = vpack.i.bf16 %v2445_v8, %v2444_v5  ;;  %v3640_v58 = vpack.i.bf16 %v2447_v13, %v2446_v39  ;;  %v2460_v19 = vsel %vm3985_vm1, %v2444_v5, 0.0  ;;  %v2461_v62 = vsel %vm3991_vm2, %v2445_v8, 0.0 }
 0xbf9   : > { %v2437_v33 = vpop.permute.xlu1 %2436  ;;  %v2442_v11 = vpop.permute.xlu0 %2441  ;;  %v3695_v51 = vpack.i.bf16 %v2461_v62, %v2460_v19  ;;  %v2462_v48 = vsel %vm3985_vm1, %v2446_v39, 0.0  ;;  %v2463_v44 = vsel %vm3991_vm2, %v2447_v13, 0.0  ;;  %v2452_v4 = vsel %vm4001_vm3, %v2444_v5, 0.0 }
 0xbfa   : > { %v2448_v7 = vmul.f32 %v2437_v33, %v1788_v16  ;;  %v2449_v49 = vmul.f32 %v2437_v33, %v1789_v42  ;;  %v2450_v56 = vmul.f32 %v2442_v11, %v2161_v43  ;;  %v2451_v2 = vmul.f32 %v2442_v11, %v2162_v63  ;;  %3636 = vrot.lane.b32.xlu1 %v3635_v27, %s5205_s2 }
 0xbfb   : > { %3641 = vrot.lane.b32.xlu0 %v3640_v58, %s5205_s2  ;;  %v3700_v46 = vpack.i.bf16 %v2463_v44, %v2462_v48  ;;  %v2453_v15 = vsel %vm4005_vm4, %v2445_v8, 0.0  ;;  %v2454_v6 = vsel %vm4001_vm3, %v2446_v39, 0.0  ;;  %v2455_v52 = vsel %vm4005_vm4, %v2447_v13, 0.0 }
 0xbfc   : > { %v3645_v47 = vpack.i.bf16 %v2449_v49, %v2448_v7  ;;  %v3650_v10 = vpack.i.bf16 %v2451_v2, %v2450_v56  ;;  %v2464_v14 = vsel %vm3985_vm1, %v2448_v7, 0.0  ;;  %v2465_v50 = vsel %vm3991_vm2, %v2449_v49, 0.0 }
 0xbfd   : > { %v2466_v53 = vsel %vm3985_vm1, %v2450_v56, 0.0  ;;  %v2467_v55 = vsel %vm3991_vm2, %v2451_v2, 0.0  ;;  %v3705_v61 = vpack.i.bf16 %v2465_v50, %v2464_v14  ;;  %v3715_v57 = vpack.i.bf16 %v2453_v15, %v2452_v4 }
 0xbfe   : > { %3646 = vrot.lane.b32.xlu1 %v3645_v47, %s5205_s2  ;;  %v3710_v3 = vpack.i.bf16 %v2467_v55, %v2466_v53  ;;  %v2456_v21 = vsel %vm4001_vm3, %v2448_v7, 0.0  ;;  %v2457_v24 = vsel %vm4005_vm4, %v2449_v49, 0.0  ;;  %v2458_v12 = vsel %vm4001_vm3, %v2450_v56, 0.0 }
 0xbff   : > { %3651 = vrot.lane.b32.xlu0 %v3650_v10, %s5205_s2  ;;  %v3720_v26 = vpack.i.bf16 %v2455_v52, %v2454_v6  ;;  %v3725_v20 = vpack.i.bf16 %v2457_v24, %v2456_v21  ;;  %v2459_v18 = vsel %vm4005_vm4, %v2451_v2, 0.0  ;;  %v2776_v1 = vpack.c.bf16 %v2454_v6, %v2452_v4  ;;  %s548_s2 = scalar_lea.vmem %s5156_s17, %s5208_s27 }
 0xc00   : > { %v3730_v28 = vpack.i.bf16 %v2459_v18, %v2458_v12  ;;  %v2777_v40 = vpack.c.bf16 %v2455_v52, %v2453_v15  ;;  %v2779_v54 = vpack.c.bf16 %v2459_v18, %v2457_v24  ;;  %v2778_v38 = vpack.c.bf16 %v2458_v12, %v2456_v21 }
 0xc02   : > { %3656 = vrot.lane.b32.xlu1 %v3635_v27, %s5203_s30 }
 0xc03   : > { %3661 = vrot.lane.b32.xlu0 %v3640_v58, %s5203_s30 }
 0xc06   : > { %3666 = vrot.lane.b32.xlu1 %v3645_v47, %s5203_s30 }
 0xc07   : > { %3671 = vrot.lane.b32.xlu0 %v3650_v10, %s5203_s30 }
 0xc0a   : > { %3676 = vrot.lane.b32.xlu1 %v3635_v27, %s5196_s18 }
 0xc0b   : > { %3681 = vrot.lane.b32.xlu0 %v3640_v58, %s5196_s18 }
 0xc0e   : > { %3686 = vrot.lane.b32.xlu1 %v3645_v47, %s5196_s18 }
 0xc0f   : > { %3691 = vrot.lane.b32.xlu0 %v3650_v10, %s5196_s18  ;;  %s5207_s18 = smov 17  }
 0xc12   : > { %3696 = vrot.lane.b32.xlu1 %v3695_v51, %s5206_s3 }
 0xc13   : > { %3701 = vrot.lane.b32.xlu0 %v3700_v46, %s5206_s3 }
 0xc16   : > { %3706 = vrot.lane.b32.xlu1 %v3705_v61, %s5206_s3 }
 0xc17   : > { %3711 = vrot.lane.b32.xlu0 %v3710_v3, %s5206_s3 }
 0xc1a   : > { %3716 = vrot.lane.b32.xlu1 %v3715_v57, %s5202_s23 }
 0xc1b   : > { %3721 = vrot.lane.b32.xlu0 %v3720_v26, %s5202_s23 }
 0xc1e   : > { %3726 = vrot.lane.b32.xlu1 %v3725_v20, %s5202_s23 }
 0xc1f   : > { %3731 = vrot.lane.b32.xlu0 %v3730_v28, %s5202_s23 }
 0xc22   : > { %3736 = vrot.lane.b32.xlu1 %v3695_v51, %s5199_s29 }
 0xc23   : > { %3741 = vrot.lane.b32.xlu0 %v3700_v46, %s5199_s29 }
 0xc26   : > { %3746 = vrot.lane.b32.xlu1 %v3705_v61, %s5199_s29 }
 0xc27   : > { %3751 = vrot.lane.b32.xlu0 %v3710_v3, %s5199_s29 }
 0xc2a   : > { %3756 = vrot.lane.b32.xlu1 %v3715_v57, %s5200_s0 }
 0xc2b   : > { %3761 = vrot.lane.b32.xlu0 %v3720_v26, %s5200_s0 }
 0xc2e   : > { %3766 = vrot.lane.b32.xlu1 %v3725_v20, %s5200_s0 }
 0xc2f   : > { %3771 = vrot.lane.b32.xlu0 %v3730_v28, %s5200_s0 }
 0xc32   : > { %3776 = vrot.lane.b32.xlu1 %v3695_v51, %s5197_s21 }
 0xc33   : > { %3781 = vrot.lane.b32.xlu0 %v3700_v46, %s5197_s21 }
 0xc36   : > { %3791 = vrot.lane.b32.xlu1 %v3710_v3, %s5197_s21 }
 0xc37   : > { %3786 = vrot.lane.b32.xlu0 %v3705_v61, %s5197_s21 }
 0xc3a   : > { %2911 = vrot.lane.b32.xlu1 %v2776_v1, %s5207_s18 }
 0xc3b   : > { %2913 = vrot.lane.b32.xlu0 %v2777_v40, %s5207_s18 }
 0xc3e   : > { %2915 = vrot.lane.b32.xlu1 %v2778_v38, %s5207_s18 }
 0xc3f   : > { %2917 = vrot.lane.b32.xlu0 %v2779_v54, %s5207_s18 }
 0xc6c   : > { %v3637_v30 = vpop.permute.xlu1 %3636 }
 0xc6d   : > { %v3639_v31 = vunpack.i.h.bf16 %v3637_v30  ;;  %v3642_v22 = vpop.permute.xlu0 %3641  ;;  %v3638_v63 = vunpack.i.l.bf16 %v3637_v30 }
 0xc6e   : > { %v3644_v59 = vunpack.i.h.bf16 %v3642_v22  ;;  %v3643_v27 = vunpack.i.l.bf16 %v3642_v22 }
 0xc6f   : > { %v2493_v47 = vsel %vm726_vm5, %v3638_v63, %v3639_v31  ;;  %v2492_v61 = vsel %vm726_vm5, %v4028_v35, %v3638_v63 }
 0xc70   : > { %v2782_v23 = vpack.c.bf16 %v3644_v59, %v3639_v31  ;;  %v3647_v17 = vpop.permute.xlu1 %3646  ;;  %v2495_v10 = vsel %vm726_vm5, %v3643_v27, %v3644_v59  ;;  %v2494_v3 = vsel %vm726_vm5, %v4028_v35, %v3643_v27 }
 0xc71   : > { %v3649_v29 = vunpack.i.h.bf16 %v3647_v17  ;;  %v3652_v45 = vpop.permute.xlu0 %3651  ;;  %v3648_v19 = vunpack.i.l.bf16 %v3647_v17  ;;  %v2781_v53 = vpack.c.bf16 %v2495_v10, %v2493_v47  ;;  %v2780_v21 = vpack.c.bf16 %v2494_v3, %v2492_v61 }
 0xc72   : > { %v3654_v32 = vunpack.i.h.bf16 %v3652_v45  ;;  %2923 = vrot.lane.b32.xlu0 %v2782_v23, %s5207_s18  ;;  %v3653_v62 = vunpack.i.l.bf16 %v3652_v45 }
 0xc73   : > { %v2497_v46 = vsel %vm726_vm5, %v3648_v19, %v3649_v29  ;;  %v2496_v57 = vsel %vm726_vm5, %v4028_v35, %v3648_v19 }
 0xc74   : > { %v2785_v5 = vpack.c.bf16 %v3654_v32, %v3649_v29  ;;  %v4825_v8 = vpop.permute.xlu1 %3656  ;;  %v2499_v14 = vsel %vm726_vm5, %v3653_v62, %v3654_v32  ;;  %v2498_v6 = vsel %vm726_vm5, %v4028_v35, %v3653_v62 }
 0xc75   : > { %v3659_v39 = vunpack.i.h.bf16 %v4825_v8  ;;  %v3658_v13 = vunpack.i.l.bf16 %v4825_v8  ;;  %v4829_v16 = vpop.permute.xlu0 %3661  ;;  %v2784_v55 = vpack.c.bf16 %v2499_v14, %v2497_v46  ;;  %v2783_v24 = vpack.c.bf16 %v2498_v6, %v2496_v57 }
 0xc76   : > { %v3664_v42 = vunpack.i.h.bf16 %v4829_v16  ;;  %v3663_v43 = vunpack.i.l.bf16 %v4829_v16  ;;  %2929 = vrot.lane.b32.xlu1 %v2785_v5, %s5207_s18 }
 0xc78   : > { %v2800_v58 = vpack.c.bf16 %v3664_v42, %v3659_v39  ;;  %v2798_v33 = vpack.c.bf16 %v3663_v43, %v3658_v13  ;;  %v3667_v11 = vpop.permute.xlu1 %3666 }
 0xc79   : > { %v3669_v7 = vunpack.i.h.bf16 %v3667_v11  ;;  %v3668_v49 = vunpack.i.l.bf16 %v3667_v11  ;;  %v3672_v56 = vpop.permute.xlu0 %3671  ;;  %v2617_v11 = vsel %vm764_vm11, %v3663_v43, %v3664_v42 }
 0xc7a   : > { %v3674_v2 = vunpack.i.h.bf16 %v3672_v56  ;;  %v3673_v51 = vunpack.i.l.bf16 %v3672_v56  ;;  %2955 = vrot.lane.b32.xlu1 %v2798_v33, %s5207_s18  ;;  %2959 = vrot.lane.b32.xlu0 %v2800_v58, %s5207_s18  ;;  %v2616_v33 = vsel %vm764_vm11, %v3658_v13, %v3659_v39 }
 0xc7b   : > { %v2618_v23 = vsel %vm764_vm11, %v3668_v49, %v3669_v7  ;;  %v2799_v8 = vpack.c.bf16 %v2617_v11, %v2616_v33 }
 0xc7c   : > { %v2803_v48 = vpack.c.bf16 %v3674_v2, %v3669_v7  ;;  %v2801_v44 = vpack.c.bf16 %v3673_v51, %v3668_v49  ;;  %v4844_v4 = vpop.permute.xlu1 %3676  ;;  %v2619_v45 = vsel %vm764_vm11, %v3673_v51, %v3674_v2 }
 0xc7d   : > { %v4850_v50 = vpop.permute.xlu0 %3681  ;;  %v2802_v19 = vpack.c.bf16 %v2619_v45, %v2618_v23 }
 0xc7e   : > { %2965 = vrot.lane.b32.xlu1 %v2803_v48, %s5207_s18  ;;  %2961 = vrot.lane.b32.xlu0 %v2801_v44, %s5207_s18 }
 0xc80   : > { %v4854_v15 = vpop.permute.xlu1 %3686 }
 0xc81   : > { %v4864_v52 = vpop.permute.xlu0 %3691 }
 0xc82   : > { %2927 = vrot.lane.b32.xlu0 %v2784_v55, %s5207_s18  ;;  %2921 = vrot.lane.b32.xlu1 %v2781_v53, %s5207_s18 }
 0xc84   : > { %v3697_v12 = vpop.permute.xlu1 %3696 }
 0xc85   : > { %v3699_v26 = vunpack.i.h.bf16 %v3697_v12  ;;  %v3702_v20 = vpop.permute.xlu0 %3701  ;;  %v3698_v49 = vunpack.i.l.bf16 %v3697_v12 }
 0xc86   : > { %v3704_v18 = vunpack.i.h.bf16 %v3702_v20  ;;  %2925 = vrot.lane.b32.xlu0 %v2783_v24, %s5207_s18  ;;  %2919 = vrot.lane.b32.xlu1 %v2780_v21, %s5207_s18  ;;  %v3703_v56 = vunpack.i.l.bf16 %v3702_v20 }
 0xc87   : > { %v2537_v16 = vsel %vm740_vm7, %v3698_v49, %v3699_v26  ;;  %v2536_v10 = vsel %vm740_vm7, %v4032_v37, %v3698_v49  ;;  %v3684_v49 = vunpack.i.h.bf16 %v4850_v50 }
 0xc88   : > { %v2788_v28 = vpack.c.bf16 %v3704_v18, %v3699_v26  ;;  %v3707_v1 = vpop.permute.xlu1 %3706  ;;  %v2539_v42 = vsel %vm740_vm7, %v3703_v56, %v3704_v18  ;;  %v2538_v46 = vsel %vm740_vm7, %v4032_v37, %v3703_v56  ;;  %v3683_v56 = vunpack.i.l.bf16 %v4850_v50 }
 0xc89   : > { %v3709_v40 = vunpack.i.h.bf16 %v3707_v1  ;;  %v3712_v35 = vpop.permute.xlu0 %3711  ;;  %v3708_v32 = vunpack.i.l.bf16 %v3707_v1  ;;  %v2787_v14 = vpack.c.bf16 %v2539_v42, %v2537_v16 }
 0xc8a   : > { %v3714_v54 = vunpack.i.h.bf16 %v3712_v35  ;;  %2935 = vrot.lane.b32.xlu0 %v2788_v28, %s5207_s18  ;;  %v3713_v5 = vunpack.i.l.bf16 %v3712_v35 }
 0xc8b   : > { %v2541_v2 = vsel %vm740_vm7, %v3708_v32, %v3709_v40  ;;  %v2540_v43 = vsel %vm740_vm7, %v4032_v37, %v3708_v32 }
 0xc8c   : > { %v2791_v38 = vpack.c.bf16 %v3714_v54, %v3709_v40  ;;  %v4871_v30 = vpop.permute.xlu1 %3716  ;;  %v2543_v51 = vsel %vm740_vm7, %v3713_v5, %v3714_v54  ;;  %v2542_v44 = vsel %vm740_vm7, %v4032_v37, %v3713_v5  ;;  %v2786_v37 = vpack.c.bf16 %v2538_v46, %v2536_v10 }
 0xc8d   : > { %v3719_v31 = vunpack.i.h.bf16 %v4871_v30  ;;  %v4874_v22 = vpop.permute.xlu0 %3721  ;;  %v2790_v39 = vpack.c.bf16 %v2543_v51, %v2541_v2  ;;  %v2789_v53 = vpack.c.bf16 %v2542_v44, %v2540_v43  ;;  %v3718_v57 = vunpack.i.l.bf16 %v4871_v30 }
 0xc8e   : > { %v3724_v59 = vunpack.i.h.bf16 %v4874_v22  ;;  %2941 = vrot.lane.b32.xlu1 %v2791_v38, %s5207_s18  ;;  %v3723_v6 = vunpack.i.l.bf16 %v4874_v22 }
 0xc8f   : > { %v2581_v18 = vsel %vm754_vm6, %v3718_v57, %v3719_v31  ;;  %v2580_v22 = vsel %vm754_vm6, %v4030_v36, %v3718_v57 }
 0xc90   : > { %v2794_v17 = vpack.c.bf16 %v3724_v59, %v3719_v31  ;;  %v3727_v29 = vpop.permute.xlu1 %3726  ;;  %v2583_v28 = vsel %vm754_vm6, %v3723_v6, %v3724_v59  ;;  %v2582_v31 = vsel %vm754_vm6, %v4030_v36, %v3723_v6 }
 0xc91   : > { %v3729_v63 = vunpack.i.h.bf16 %v3727_v29  ;;  %v3732_v27 = vpop.permute.xlu0 %3731  ;;  %v3728_v21 = vunpack.i.l.bf16 %v3727_v29  ;;  %v2793_v54 = vpack.c.bf16 %v2583_v28, %v2581_v18  ;;  %v2792_v32 = vpack.c.bf16 %v2582_v31, %v2580_v22 }
 0xc92   : > { %v3734_v58 = vunpack.i.h.bf16 %v3732_v27  ;;  %2947 = vrot.lane.b32.xlu0 %v2794_v17, %s5207_s18  ;;  %v3733_v24 = vunpack.i.l.bf16 %v3732_v27 }
 0xc93   : > { %v2585_v1 = vsel %vm754_vm6, %v3728_v21, %v3729_v63  ;;  %v2584_v59 = vsel %vm754_vm6, %v4030_v36, %v3728_v21 }
 0xc94   : > { %v2797_v62 = vpack.c.bf16 %v3734_v58, %v3729_v63  ;;  %v4891_v7 = vpop.permute.xlu1 %3736  ;;  %v2587_v40 = vsel %vm754_vm6, %v3733_v24, %v3734_v58  ;;  %v2586_v23 = vsel %vm754_vm6, %v4030_v36, %v3733_v24 }
 0xc95   : > { %v4895_v48 = vpop.permute.xlu0 %3741  ;;  %v2796_v38 = vpack.c.bf16 %v2587_v40, %v2585_v1  ;;  %v3738_v29 = vunpack.i.l.bf16 %v4891_v7  ;;  %v2795_v5 = vpack.c.bf16 %v2586_v23, %v2584_v59  ;;  %v3739_v36 = vunpack.i.h.bf16 %v4891_v7 }
 0xc96   : > { %2963 = vrot.lane.b32.xlu0 %v2802_v19, %s5207_s18  ;;  %2953 = vrot.lane.b32.xlu1 %v2797_v62, %s5207_s18  ;;  %v3743_v45 = vunpack.i.l.bf16 %v4895_v48  ;;  %v3744_v33 = vunpack.i.h.bf16 %v4895_v48  ;;  %v3679_v19 = vunpack.i.h.bf16 %v4844_v4  ;;  %v3678_v62 = vunpack.i.l.bf16 %v4844_v4 }
 0xc97   : > { %v2649_v16 = vsel %vm775_vm8, %v3739_v36, %v4034_v41 }
 0xc98   : > { %v4899_v13 = vpop.permute.xlu1 %3746  ;;  %v2804_v2 = vpack.c.bf16 %v3743_v45, %v3738_v29  ;;  %v2651_v42 = vsel %vm775_vm8, %v3744_v33, %v4034_v41 }
 0xc99   : > { %v4907_v47 = vpop.permute.xlu0 %3751  ;;  %v3748_v55 = vunpack.i.l.bf16 %v4899_v13  ;;  %v3749_v51 = vunpack.i.h.bf16 %v4899_v13  ;;  %v2806_v57 = vpack.c.bf16 %v2651_v42, %v2649_v16  ;;  %v3814_v16 = vld [vmem:[%s5154_s15 + $0x4] ss:$12 sps:$4 sm:$0xff]  }
 0xc9a   : > { %2939 = vrot.lane.b32.xlu0 %v2790_v39, %s5207_s18  ;;  %2957 = vrot.lane.b32.xlu1 %v2799_v8, %s5207_s18  ;;  %v3753_v61 = vunpack.i.l.bf16 %v4907_v47  ;;  %v3754_v43 = vunpack.i.h.bf16 %v4907_v47  ;;  %v2648_v47 = vsel %vm775_vm8, %v3738_v29, %v3739_v36 }
 0xc9b   : > { %v2652_v6 = vsel %vm775_vm8, %v3748_v55, %v3749_v51  ;;  %v2653_v31 = vsel %vm775_vm8, %v3749_v51, %v4034_v41  ;;  %3122 = vmatprep.mubr.bf16.mxu0 %v3814_v16 }
 0xc9c   : > { %v4917_v3 = vpop.permute.xlu1 %3756  ;;  %v2807_v26 = vpack.c.bf16 %v3753_v61, %v3748_v55  ;;  %v2655_v59 = vsel %vm775_vm8, %v3754_v43, %v4034_v41 }
 0xc9d   : > { %v4921_v12 = vpop.permute.xlu0 %3761  ;;  %v3758_v7 = vunpack.i.l.bf16 %v4917_v3 }
 0xc9e   : > { %2937 = vrot.lane.b32.xlu0 %v2789_v53, %s5207_s18  ;;  %2933 = vrot.lane.b32.xlu1 %v2787_v14, %s5207_s18  ;;  %v3763_v48 = vunpack.i.l.bf16 %v4921_v12  ;;  %v2720_v14 = vsel %vm799_vm10, %v3678_v62, %v3679_v19  ;;  %v2722_v53 = vsel %vm799_vm10, %v3683_v56, %v3684_v49  ;;  %v3764_v18 = vunpack.i.h.bf16 %v4921_v12 }
 0xc9f   : > { %v2817_v55 = vpack.c.bf16 %v2722_v53, %v2720_v14 }
 0xca0   : > { %v4929_v20 = vpop.permute.xlu1 %3766  ;;  %v2810_v21 = vpack.c.bf16 %v3763_v48, %v3758_v7 }
 0xca1   : > { %v4935_v35 = vpop.permute.xlu0 %3771  ;;  %v3768_v63 = vunpack.i.l.bf16 %v4929_v20  ;;  %v3769_v12 = vunpack.i.h.bf16 %v4929_v20  ;;  %v2721_v20 = vsel %vm799_vm10, %v3679_v19, %v4065_v25 }
 0xca2   : > { %2973 = vrot.lane.b32.xlu0 %v2807_v26, %s5207_s18  ;;  %2931 = vrot.lane.b32.xlu1 %v2786_v37, %s5207_s18  ;;  %v3773_v27 = vunpack.i.l.bf16 %v4935_v35  ;;  %v2654_v37 = vsel %vm775_vm8, %v3753_v61, %v3754_v43  ;;  %v3759_v26 = vunpack.i.h.bf16 %v4917_v3  ;;  %v2650_v61 = vsel %vm775_vm8, %v3743_v45, %v3744_v33 }
 0xca3   : > { %v2808_v40 = vpack.c.bf16 %v2654_v37, %v2652_v6  ;;  %v2688_v23 = vsel %vm787_vm9, %v3768_v63, %v3769_v12  ;;  %v3689_v45 = vunpack.i.h.bf16 %v4854_v15  ;;  %v2686_v33 = vsel %vm787_vm9, %v3763_v48, %v3764_v18 }
 0xca4   : > { %v4939_v30 = vpop.permute.xlu1 %3776  ;;  %v2813_v8 = vpack.c.bf16 %v3773_v27, %v3768_v63  ;;  %v2685_v3 = vsel %vm787_vm9, %v3759_v26, %v4055_v9  ;;  %v3694_v63 = vunpack.i.h.bf16 %v4864_v52  ;;  %v2684_v36 = vsel %vm787_vm9, %v3758_v7, %v3759_v26 }
 0xca5   : > { %v4949_v17 = vpop.permute.xlu0 %3781  ;;  %v2689_v51 = vsel %vm787_vm9, %v3769_v12, %v4055_v9  ;;  %v2725_v42 = vsel %vm799_vm10, %v3689_v45, %v4065_v25 }
 0xca6   : > { %2951 = vrot.lane.b32.xlu0 %v2796_v38, %s5207_s18  ;;  %2945 = vrot.lane.b32.xlu1 %v2793_v54, %s5207_s18  ;;  %v3774_v54 = vunpack.i.h.bf16 %v4935_v35  ;;  %v2805_v38 = vpack.c.bf16 %v2650_v61, %v2648_v47  ;;  %v2723_v35 = vsel %vm799_vm10, %v3684_v49, %v4065_v25  ;;  %v2811_v49 = vpack.c.bf16 %v2686_v33, %v2684_v36 }
 0xca7   : > { %v2818_v19 = vpack.c.bf16 %v2723_v35, %v2721_v20  ;;  %v2727_v43 = vsel %vm799_vm10, %v3694_v63, %v4065_v25 }
 0xca8   : > { %v4957_v58 = vpop.permute.xlu1 %3791  ;;  %v2690_v29 = vsel %vm787_vm9, %v3773_v27, %v3774_v54  ;;  %v3693_v27 = vunpack.i.l.bf16 %v4864_v52  ;;  %v2691_v52 = vsel %vm787_vm9, %v3774_v54, %v4055_v9  ;;  %v2821_v25 = vpack.c.bf16 %v2727_v43, %v2725_v42 }
 0xca9   : > { %v4961_v11 = vpop.permute.xlu0 %3786  ;;  %v2814_v41 = vpack.c.bf16 %v2690_v29, %v2688_v23  ;;  %v2815_v48 = vpack.c.bf16 %v2691_v52, %v2689_v51  ;;  %v3794_v14 = vunpack.i.h.bf16 %v4957_v58  ;;  %v3793_v4 = vunpack.i.l.bf16 %v4957_v58 }
 0xcaa   : > { %2949 = vrot.lane.b32.xlu0 %v2795_v5, %s5207_s18  ;;  %2943 = vrot.lane.b32.xlu1 %v2792_v32, %s5207_s18  ;;  %v3688_v32 = vunpack.i.l.bf16 %v4854_v15  ;;  %v2809_v5 = vpack.c.bf16 %v2655_v59, %v2653_v31  ;;  %v2726_v15 = vsel %vm799_vm10, %v3693_v27, %v3694_v63  ;;  %v3789_v50 = vunpack.i.h.bf16 %v4961_v11 }
 0xcab   : > { %v2762_v6 = vsel %vm811_vm12, %v3793_v4, %v3794_v14  ;;  %v2763_v26 = vsel %vm811_vm12, %v3794_v14, %v4074_v34 }
 0xcac   : > { %v2912_v39 = vpop.permute.xlu1 %2911 }
 0xcad   : > { %v3015_v44 = vsel %vm906_vm13, %v4201_v60, %v2912_v39  ;;  %v2914_v10 = vpop.permute.xlu0 %2913 }
 0xcae   : > { %2985 = vrot.lane.b32.xlu0 %v2813_v8, %s5207_s18  ;;  %2967 = vrot.lane.b32.xlu1 %v2804_v2, %s5207_s18  ;;  %v3016_v46 = vsel %vm906_vm13, %v2912_v39, %v2914_v10  ;;  %v2724_v2 = vsel %vm799_vm10, %v3688_v32, %v3689_v45  ;;  %v3779_v8 = vunpack.i.h.bf16 %v4939_v30  ;;  %v3784_v39 = vunpack.i.h.bf16 %v4949_v17 }
 0xcaf   : > { %3090 = vmatprep.subr.bf16.mxu0 %v3016_v46  ;;  %v2820_v7 = vpack.c.bf16 %v2726_v15, %v2724_v2 }
 0xcb0   : > { %3091 = vmatpush1.bf16.msra.mxu0 %v3015_v44  ;;  %v2916_v24 = vpop.permute.xlu1 %2915  ;;  %v2819_v44 = vpack.c.bf16 %v3693_v27, %v3688_v32  ;;  %v2757_v10 = vsel %vm811_vm12, %v3779_v8, %v4074_v34  ;;  %v2759_v46 = vsel %vm811_vm12, %v3784_v39, %v4074_v34 }
 0xcb1   : > { %v3017_v28 = vsel %vm906_vm13, %v4201_v60, %v2916_v24  ;;  %v2918_v1 = vpop.permute.xlu0 %2917  ;;  %v2687_v60 = vsel %vm787_vm9, %v3764_v18, %v4055_v9  ;;  %v2816_v9 = vpack.c.bf16 %v3683_v56, %v3678_v62  ;;  %v3788_v62 = vunpack.i.l.bf16 %v4961_v11 }
 0xcb2   : > { %2971 = vrot.lane.b32.xlu0 %v2806_v57, %s5207_s18  ;;  %2979 = vrot.lane.b32.xlu1 %v2810_v21, %s5207_s18  ;;  %v3018_v13 = vsel %vm906_vm13, %v2916_v24, %v2918_v1  ;;  %v2812_v22 = vpack.c.bf16 %v2687_v60, %v2685_v3  ;;  %v3778_v56 = vunpack.i.l.bf16 %v4939_v30  ;;  %v2824_v53 = vpack.c.bf16 %v2759_v46, %v2757_v10 }
 0xcb3   : > { %3092 = vmatprep.subr.bf16.mxu0 %v3018_v13  ;;  %v3783_v57 = vunpack.i.l.bf16 %v4949_v17  ;;  %v2760_v21 = vsel %vm811_vm12, %v3788_v62, %v3789_v50  ;;  %v2825_v17 = vpack.c.bf16 %v3793_v4, %v3788_v62  ;;  %v2761_v18 = vsel %vm811_vm12, %v3789_v50, %v4074_v34  ;;  %v2832_v13 = vld [vmem:[%s5155_s16] sm:$0xff] }
 0xcb4   : > { %3093 = vmatpush1.bf16.msra.mxu0 %v3017_v28  ;;  %v2826_v11 = vpack.c.bf16 %v2762_v6, %v2760_v21  ;;  %v2756_v24 = vsel %vm811_vm12, %v3778_v56, %v3779_v8  ;;  %v2833_v28 = vld [vmem:[%s5155_s16 + $0x8] sm:$0xff]  ;;  %v2827_v1 = vpack.c.bf16 %v2763_v26, %v2761_v18 }
 0xcb5   : > { %v2822_v58 = vpack.c.bf16 %v3783_v57, %v3778_v56  ;;  %v2758_v37 = vsel %vm811_vm12, %v3783_v57, %v3784_v39 }
 0xcb6   : > { %2975 = vrot.lane.b32.xlu0 %v2808_v40, %s5207_s18  ;;  %2993 = vrot.lane.b32.xlu1 %v2817_v55, %s5207_s18  ;;  %v2823_v30 = vpack.c.bf16 %v2758_v37, %v2756_v24 }
 0xcba   : > { %2983 = vrot.lane.b32.xlu0 %v2812_v22, %s5207_s18  ;;  %2969 = vrot.lane.b32.xlu1 %v2805_v38, %s5207_s18 }
 0xcbe   : > { %2987 = vrot.lane.b32.xlu0 %v2814_v41, %s5207_s18  ;;  %2977 = vrot.lane.b32.xlu1 %v2809_v5, %s5207_s18 }
 0xcc2   : > { %2995 = vrot.lane.b32.xlu0 %v2818_v19, %s5207_s18  ;;  %2981 = vrot.lane.b32.xlu1 %v2811_v49, %s5207_s18 }
 0xcc6   : > { %2999 = vrot.lane.b32.xlu0 %v2820_v7, %s5207_s18  ;;  %2989 = vrot.lane.b32.xlu1 %v2815_v48, %s5207_s18 }
 0xcca   : > { %2997 = vrot.lane.b32.xlu0 %v2819_v44, %s5207_s18  ;;  %2991 = vrot.lane.b32.xlu1 %v2816_v9, %s5207_s18 }
 0xcce   : > { %3007 = vrot.lane.b32.xlu0 %v2824_v53, %s5207_s18  ;;  %3001 = vrot.lane.b32.xlu1 %v2821_v25, %s5207_s18 }
 0xcd2   : > { %3011 = vrot.lane.b32.xlu0 %v2826_v11, %s5207_s18  ;;  %3003 = vrot.lane.b32.xlu1 %v2822_v58, %s5207_s18 }
 0xcd6   : > { %3009 = vrot.lane.b32.xlu0 %v2825_v17, %s5207_s18  ;;  %3005 = vrot.lane.b32.xlu1 %v2823_v30, %s5207_s18 }
 0xcda   : > { %2841 = vperm.xlu0 %3353, %v2833_v28   ;;  %3013 = vrot.lane.b32.xlu1 %v2827_v1, %s5207_s18 }
 0xcde   : > { %2836 = vperm.xlu1 %3394, %v2832_v13  }
 0xce4   : > { %v2924_v55 = vpop.permute.xlu0 %2923 }
 0xce8   : > { %v2930_v47 = vpop.permute.xlu1 %2929 }
 0xcec   : > { %v2956_v34 = vpop.permute.xlu1 %2955  ;;  %v2960_v61 = vpop.permute.xlu0 %2959 }
 0xcf0   : > { %v2966_v40 = vpop.permute.xlu1 %2965  ;;  %v2962_v3 = vpop.permute.xlu0 %2961 }
 0xcf4   : > { %v2928_v60 = vpop.permute.xlu0 %2927  ;;  %v2922_v12 = vpop.permute.xlu1 %2921 }
 0xcf5   : > { %v3020_v54 = vsel %vm906_vm13, %v2922_v12, %v2924_v55  ;;  %v3022_v59 = vsel %vm906_vm13, %v2928_v60, %v2930_v47 }
 0xcf6   : > { %3094 = vmatprep.subr.bf16.mxu0 %v3020_v54  ;;  %v3812_v54 = vld [vmem:[%s5154_s15] ss:$12 sps:$4 sm:$0xff]  }
 0xcf8   : > { %v2920_v38 = vpop.permute.xlu1 %2919  ;;  %v2926_v31 = vpop.permute.xlu0 %2925 }
 0xcf9   : > { %v3019_v22 = vsel %vm906_vm13, %v2920_v38, %v2922_v12  ;;  %v3021_v23 = vsel %vm906_vm13, %v2926_v31, %v2928_v60 }
 0xcfa   : > { %3095 = vmatpush1.bf16.msra.mxu0 %v3019_v22 }
 0xcfb   : > { %3096 = vmatprep.subr.bf16.mxu0 %v3022_v59 }
 0xcfc   : > { %v2936_v29 = vpop.permute.xlu0 %2935 }
 0xcfe   : > { %3097 = vmatpush1.bf16.msra.mxu0 %v3021_v23 }
 0xd00   : > { %v2942_v20 = vpop.permute.xlu1 %2941 }
 0xd04   : > { %v2948_v35 = vpop.permute.xlu0 %2947 }
 0xd08   : > { %v2964_v45 = vpop.permute.xlu0 %2963  ;;  %v2954_v32 = vpop.permute.xlu1 %2953 }
 0xd09   : > { %v3034_v4 = vsel %vm906_vm13, %v2964_v45, %v2966_v40  ;;  %v3033_v25 = vsel %vm906_vm13, %v2962_v3, %v2964_v45 }
 0xd0c   : > { %v2940_v5 = vpop.permute.xlu0 %2939  ;;  %v2958_v41 = vpop.permute.xlu1 %2957 }
 0xd0d   : > { %v3026_v2 = vsel %vm906_vm13, %v2940_v5, %v2942_v20  ;;  %v3032_v44 = vsel %vm906_vm13, %v2958_v41, %v2960_v61  ;;  %v3031_v14 = vsel %vm906_vm13, %v2956_v34, %v2958_v41 }
 0xd10   : > { %v2938_v63 = vpop.permute.xlu0 %2937  ;;  %v2934_v27 = vpop.permute.xlu1 %2933 }
 0xd11   : > { %v3024_v36 = vsel %vm906_vm13, %v2934_v27, %v2936_v29  ;;  %v3025_v52 = vsel %vm906_vm13, %v2938_v63, %v2940_v5 }
 0xd12   : > { %3098 = vmatprep.subr.bf16.mxu0 %v3024_v36 }
 0xd14   : > { %v2974_v33 = vpop.permute.xlu0 %2973  ;;  %v2932_v19 = vpop.permute.xlu1 %2931 }
 0xd15   : > { %v3023_v49 = vsel %vm906_vm13, %v2932_v19, %v2934_v27  ;;  %v3826_v19 = vld [vmem:[%s3966_s19] sm:$0xff] }
 0xd16   : > { %3099 = vmatpush1.bf16.msra.mxu0 %v3023_v49 }
 0xd17   : > { %3100 = vmatprep.subr.bf16.mxu0 %v3026_v2 }
 0xd18   : > { %v2952_v15 = vpop.permute.xlu0 %2951  ;;  %v2946_v51 = vpop.permute.xlu1 %2945 }
 0xd19   : > { %v3028_v7 = vsel %vm906_vm13, %v2946_v51, %v2948_v35  ;;  %v3030_v16 = vsel %vm906_vm13, %v2952_v15, %v2954_v32 }
 0xd1a   : > { %3101 = vmatpush1.bf16.msra.mxu0 %v3025_v52 }
 0xd1b   : > { %3102 = vmatprep.subr.bf16.mxu0 %v3028_v7 }
 0xd1c   : > { %v2950_v48 = vpop.permute.xlu0 %2949  ;;  %v2944_v8 = vpop.permute.xlu1 %2943 }
 0xd1d   : > { %v3027_v39 = vsel %vm906_vm13, %v2944_v8, %v2946_v51  ;;  %v3029_v43 = vsel %vm906_vm13, %v2950_v48, %v2952_v15  ;;  %v3827_v51 = vld [vmem:[%s3966_s19 + $0x8] sm:$0xff]  ;;  %v3828_v8 = vld [vmem:[%s3966_s19 + $0x10] sm:$0xff] }
 0xd1e   : > { %3103 = vmatpush1.bf16.msra.mxu0 %v3027_v39 }
 0xd1f   : > { %3104 = vmatprep.subr.bf16.mxu0 %v3030_v16 }
 0xd20   : > { %v2986_v9 = vpop.permute.xlu0 %2985  ;;  %v2968_v42 = vpop.permute.xlu1 %2967 }
 0xd22   : > { %3105 = vmatpush1.bf16.msra.mxu0 %v3029_v43 }
 0xd23   : > { %3106 = vmatprep.subr.bf16.mxu0 %v3032_v44 }
 0xd24   : > { %v2972_v10 = vpop.permute.xlu0 %2971  ;;  %v2980_v46 = vpop.permute.xlu1 %2979 }
 0xd26   : > { %3107 = vmatpush1.bf16.msra.mxu0 %v3031_v14 }
 0xd27   : > { %3108 = vmatprep.subr.bf16.mxu0 %v3034_v4 }
 0xd28   : > { %v2976_v50 = vpop.permute.xlu0 %2975  ;;  %v2994_v62 = vpop.permute.xlu1 %2993 }
 0xd29   : > { %v3037_v24 = vsel %vm906_vm13, %v2974_v33, %v2976_v50 }
 0xd2a   : > { %3109 = vmatpush1.bf16.msra.mxu0 %v3033_v25 }
 0xd2c   : > { %v2984_v56 = vpop.permute.xlu0 %2983  ;;  %v2970_v53 = vpop.permute.xlu1 %2969 }
 0xd2d   : > { %v3035_v57 = vsel %vm906_vm13, %v2968_v42, %v2970_v53  ;;  %v3036_v6 = vsel %vm906_vm13, %v2970_v53, %v2972_v10 }
 0xd2e   : > { %3110 = vmatprep.subr.bf16.mxu0 %v3036_v6 }
 0xd2f   : > { %3111 = vmatpush1.bf16.msra.mxu0 %v3035_v57 }
 0xd30   : > { %v2988_v21 = vpop.permute.xlu0 %2987  ;;  %v2978_v58 = vpop.permute.xlu1 %2977 }
 0xd31   : > { %v3038_v11 = vsel %vm906_vm13, %v2976_v50, %v2978_v58  ;;  %v3041_v13 = vsel %vm906_vm13, %v2986_v9, %v2988_v21  ;;  %v3829_v9 = vld [vmem:[%s3966_s19 + $0x18] sm:$0xff] }
 0xd32   : > { %3112 = vmatprep.subr.bf16.mxu0 %v3038_v11 }
 0xd33   : > { %3113 = vmatpush1.bf16.msra.mxu0 %v3037_v24 }
 0xd34   : > { %v2996_v37 = vpop.permute.xlu0 %2995  ;;  %v2982_v30 = vpop.permute.xlu1 %2981 }
 0xd35   : > { %v3039_v17 = vsel %vm906_vm13, %v2980_v46, %v2982_v30  ;;  %v3040_v26 = vsel %vm906_vm13, %v2982_v30, %v2984_v56  ;;  %v3044_v55 = vsel %vm906_vm13, %v2994_v62, %v2996_v37 }
 0xd36   : > { %3114 = vmatprep.subr.bf16.mxu0 %v3040_v26 }
 0xd37   : > { %3115 = vmatpush1.bf16.msra.mxu0 %v3039_v17 }
 0xd38   : > { %v3000_v18 = vpop.permute.xlu0 %2999  ;;  %v2990_v28 = vpop.permute.xlu1 %2989 }
 0xd39   : > { %v3042_v1 = vsel %vm906_vm13, %v2988_v21, %v2990_v28 }
 0xd3a   : > { %3116 = vmatprep.subr.bf16.mxu0 %v3042_v1 }
 0xd3b   : > { %3117 = vmatpush1.bf16.msra.mxu0 %v3041_v13 }
 0xd3c   : > { %v2998_v47 = vpop.permute.xlu0 %2997  ;;  %3118 = vmatprep.subr.bf16.mxu0 %v3044_v55  ;;  %v2992_v34 = vpop.permute.xlu1 %2991 }
 0xd3d   : > { %v3043_v61 = vsel %vm906_vm13, %v2992_v34, %v2994_v62  ;;  %v3045_v12 = vsel %vm906_vm13, %v2998_v47, %v3000_v18 }
 0xd3f   : > { %3119 = vmatpush1.bf16.msra.mxu0 %v3043_v61 }
 0xd40   : > { %v3008_v40 = vpop.permute.xlu0 %3007  ;;  %v3002_v3 = vpop.permute.xlu1 %3001 }
 0xd41   : > { %v3046_v60 = vsel %vm906_vm13, %v3000_v18, %v3002_v3 }
 0xd42   : > { %3120 = vmatprep.subr.bf16.mxu0 %v3046_v60 }
 0xd43   : > { %3121 = vmatpush1.bf16.msra.mxu0 %v3045_v12 }
 0xd44   : > { %v3004_v38 = vpop.permute.xlu1 %3003  ;;  %v3012_v22 = vpop.permute.xlu0 %3011 }
 0xd46   : > { %3123 = vmatmul.mubr.bf16.vlgmr.msra.gmra.mrb[12].mxu0 %v3812_v54 }
 0xd47   : > { %3165 = vmatprep.mubr.bf16.mxu0 %v3838_v0  ;;  %v3815_v0 = vld [vmem:[%s5154_s15 + $0x8] ss:$12 sps:$4 sm:$0xff]  }
 0xd48   : > { %v3006_v31 = vpop.permute.xlu1 %3005  ;;  %v3010_v29 = vpop.permute.xlu0 %3009 }
 0xd49   : > { %v3047_v59 = vsel %vm906_vm13, %v3004_v38, %v3006_v31  ;;  %v3048_v23 = vsel %vm906_vm13, %v3006_v31, %v3008_v40  ;;  %v3049_v45 = vsel %vm906_vm13, %v3010_v29, %v3012_v22 }
 0xd4a   : > { %3133 = vmatprep.subr.bf16.mxu0 %v3048_v23 }
 0xd4b   : > { %3134 = vmatpush1.bf16.msra.mxu0 %v3047_v59 }
 0xd4c   : > { %v3014_v20 = vpop.permute.xlu1 %3013 }
 0xd4d   : > { %v3050_v35 = vsel %vm906_vm13, %v3012_v22, %v3014_v20 }
 0xd4e   : > { %3135 = vmatprep.subr.bf16.mxu0 %v3050_v35 }
 0xd4f   : > { %3136 = vmatpush1.bf16.msra.mxu0 %v3049_v45 }
 0xd52   : > { %3284 = vmatmul.mubr.msk.bf16.vlgmr.msra.gmra.mrb[12].mxu0 %vm2188_vm14, %v3815_v0 }
 0xd59   : > { %v2842_v27 = vpop.permute.xlu0 %2841 }
 0xd5d   : > { %v2837_v32 = vpop.permute.xlu1 %2836 }
 0xe25   : > { %v3167_v5 = vpop.f32.mrb[12].mxu0 }
 0xe26   : > { %v3324_v41 = vadd.f32 %v3167_v5, %v2837_v32  ;;  %v3169_v63 = vpop.f32.mrb[13].mxu0 }
 0xe27   : > { %v3325_v36 = vadd.f32 %v3169_v63, %v2837_v32  ;;  %v3171_v33 = vpop.f32.mrb[14].mxu0 }
 0xe28   : > { %v3176_v49 = vadd.f32 %v3826_v19, %v3324_v41  ;;  %v3326_v2 = vadd.f32 %v3171_v33, %v2842_v27  ;;  %v3173_v15 = vpop.f32.mrb[15].mxu0 }
 0xe29   : > { %v3177_v52 = vadd.f32 %v3827_v51, %v3325_v36  ;;  %v3327_v7 = vadd.f32 %v3173_v15, %v2842_v27 }
 0xe2a   : > { %v3180_v48 = vmax.f32 %v3176_v49, 0.0  ;;  %v3178_v39 = vadd.f32 %v3828_v8, %v3326_v2 }
 0xe2b   : > { %v3181_v16 = vmax.f32 %v3177_v52, 0.0  ;;  %v3179_v42 = vadd.f32 %v3829_v9, %v3327_v7 }
 0xe2c   : > { %3184 = vst [vmem:[%s548_s2] sm:$0xff] %v3180_v48  ;;  %v3182_v43 = vmax.f32 %v3178_v39, 0.0 }
 0xe2d   : > { %3185 = vst [vmem:[%s548_s2 + $0x8] sm:$0xff] %v3181_v16  ;;  %v3183_v44 = vmax.f32 %v3179_v42, 0.0 }
 0xe2e   : > { %3186 = vst [vmem:[%s548_s2 + $0x10] sm:$0xff] %v3182_v43 }
 0xe2f   : > { %3187 = vst [vmem:[%s548_s2 + $0x18] sm:$0xff] %v3183_v44 }
 0xe30 PF: > { %s27_s24 = sadd.s32 1, %s3836_s24  }
 0xe31   : > { %p24_p4 = scmp.ge.s32.totalorder %s27_s24, 4  }
 0xe33   :  { %26 = sbr.rel (!%p24_p4) target bundleno = 8 (0x8), region = 118 }

</bundles_post_ra>
